<compile_context>
chip_gen: v7x
topology: tpu7x:2x2x1
jax: 0.10.0
libtpu: 0.0.40
codegen_flags: <defaults>
</compile_context>

<pallas_src>
import functools

import jax
import jax.numpy as jnp
from jax.experimental import pallas as pl
from jax.experimental.pallas import tpu as pltpu


def _round_up(x, m):
    return (x + m - 1) // m * m


def _vmem_limit_bytes():
    """Generation-aware VMEM limit with headroom for compiler scratch."""
    cap = 64 * 1024 * 1024  # safe fallback: v7x physical per-TC VMEM
    try:
        cap = int(pltpu.get_tpu_info().vmem_capacity_bytes)
    except Exception:
        pass
    return max(min(int(cap * 0.85), cap - 8 * 1024 * 1024), 16 * 1024 * 1024)


def _pick_row_tile(n_pad, num_base, vmem_limit):
    """Largest row tile (multiple of 256) whose resident set fits the budget."""
    budget = int(vmem_limit * 0.6)
    hb_bytes = 2 * n_pad * num_base * 128 * 2          # resident H_bases, 2 buffers, bf16
    for cand in (1024, 512, 256):
        if n_pad % cand:
            continue
        per_tile = (2 * cand * n_pad * 1               # int8 adjacency tile, 2 buffers
                    + cand * n_pad * 2                 # in-kernel bf16 cast temporary
                    + cand * num_base * 128 * 4        # f32 matmul result temporary
                    + 2 * cand * 128 * 4               # H_root tile, 2 buffers
                    + 2 * cand * 128 * 4               # inv_deg tile (lane-padded worst case)
                    + 2 * cand * 128 * 4               # output tile, 2 buffers
                    + cand * 128 * 4)                  # f32 accumulator scratch
        if hb_bytes + per_tile <= budget:
            return cand
    return min(256, n_pad)


# ----------------------------------------------------------------------------
# Kernel 1a: fused projection for layer 1
#   x0 = x_raw @ drug_w                  (stays in VMEM, never written to HBM)
#   H  = x0 @ [basis_0 | ... | basis_{B-1} | root]  (lane-concatenated, padded)
#   outputs: H_bases [tile_n, B*Dp] (bf16), H_root [tile_n, Dp] (f32)
# ----------------------------------------------------------------------------
def _proj_fused_kernel(xraw_ref, w0_ref, wcat_ref, hb_ref, hr_ref,
                       *, num_base, d_out_pad):
    x0 = jnp.dot(xraw_ref[...], w0_ref[...], preferred_element_type=jnp.float32)
    h = jnp.dot(x0.astype(jnp.bfloat16), wcat_ref[...],
                preferred_element_type=jnp.float32)
    nb = num_base * d_out_pad
    hb_ref[...] = h[:, :nb].astype(hb_ref.dtype)
    hr_ref[...] = h[:, nb:].astype(hr_ref.dtype)


# Kernel 1b: same, without the fused pre-projection (layer 2).
def _proj_kernel(x_ref, wcat_ref, hb_ref, hr_ref, *, num_base, d_out_pad):
    h = jnp.dot(x_ref[...], wcat_ref[...], preferred_element_type=jnp.float32)
    nb = num_base * d_out_pad
    hb_ref[...] = h[:, :nb].astype(hb_ref.dtype)
    hr_ref[...] = h[:, nb:].astype(hr_ref.dtype)


def _project(x_bf16, w_cat_bf16, num_base, d_out_pad, tile_n, vmem_limit,
             pre_w_bf16=None):
    n, din = x_bf16.shape
    n_tiles = n // tile_n
    nb = num_base * d_out_pad
    out_shape = (jax.ShapeDtypeStruct((n, nb), jnp.bfloat16),
                 jax.ShapeDtypeStruct((n, d_out_pad), jnp.float32))
    out_specs = (pl.BlockSpec((tile_n, nb), lambda i: (i, 0)),
                 pl.BlockSpec((tile_n, d_out_pad), lambda i: (i, 0)))
    cp = pltpu.CompilerParams(dimension_semantics=("parallel",),
                              vmem_limit_bytes=vmem_limit)
    if pre_w_bf16 is not None:
        kernel = functools.partial(_proj_fused_kernel,
                                   num_base=num_base, d_out_pad=d_out_pad)
        in_specs = [
            pl.BlockSpec((tile_n, din), lambda i: (i, 0)),
            pl.BlockSpec(pre_w_bf16.shape, lambda i: (0, 0)),
            pl.BlockSpec(w_cat_bf16.shape, lambda i: (0, 0)),
        ]
        args = (x_bf16, pre_w_bf16, w_cat_bf16)
    else:
        kernel = functools.partial(_proj_kernel,
                                   num_base=num_base, d_out_pad=d_out_pad)
        in_specs = [
            pl.BlockSpec((tile_n, din), lambda i: (i, 0)),
            pl.BlockSpec(w_cat_bf16.shape, lambda i: (0, 0)),
        ]
        args = (x_bf16, w_cat_bf16)
    return pl.pallas_call(
        kernel,
        out_shape=out_shape,
        grid_spec=pltpu.PrefetchScalarGridSpec(
            num_scalar_prefetch=0,
            grid=(n_tiles,),
            in_specs=in_specs,
            out_specs=out_specs,
        ),
        compiler_params=cp,
    )(*args)


# ----------------------------------------------------------------------------
# Kernel 2: relational aggregation.
#   grid = (row_tiles, R); r (relations) is the inner, sequential reduction axis.
#   r == 0   : acc = H_root_tile + bias
#   every r  : part = A_r_tile(int8 -> bf16) @ H_bases      (one MXU matmul)
#              acc += inv_deg_r * sum_b comb[r,b] * part_b  (per-tile VPU work)
#   r == R-1 : out = relu(acc) (layer 1) / acc (layer 2), 128-lane-dense store
# ----------------------------------------------------------------------------
def _agg_kernel(comb_ref, hb_ref, hr_ref, adj_ref, invdeg_ref, bias_ref,
                o_ref, acc_ref, *, num_base, d_pad, apply_relu):
    r = pl.program_id(1)

    @pl.when(r == 0)
    def _():
        acc_ref[...] = hr_ref[...] + bias_ref[...]

    # int8 edge counts -> bf16 (exact for small counts); MXU matmul, f32 acc.
    a = adj_ref[0].astype(jnp.bfloat16)
    part = jnp.dot(a, hb_ref[...], preferred_element_type=jnp.float32)

    # comb coefficients read as scalars from SMEM; combine AFTER the matmul.
    contrib = comb_ref[r, 0] * part[:, :d_pad]
    for b in range(1, num_base):
        lo = b * d_pad
        contrib = contrib + comb_ref[r, b] * part[:, lo:lo + d_pad]

    # exact f32 in-degree normalization applied per relation, per row tile.
    acc_ref[...] += invdeg_ref[0] * contrib

    @pl.when(r == pl.num_programs(1) - 1)
    def _():
        out = acc_ref[...]
        if apply_relu:
            out = jnp.maximum(out, 0.0)
        o_ref[...] = out.astype(o_ref.dtype)


def _aggregate(comb_f32, h_bases, h_root, adj_i8, inv_deg, bias_pad,
               *, apply_relu, tile_n, out_dtype, vmem_limit):
    n, nbd = h_bases.shape
    d_pad = h_root.shape[1]
    num_base = nbd // d_pad
    n_rel = adj_i8.shape[0]
    n_tiles = n // tile_n
    kernel = functools.partial(_agg_kernel, num_base=num_base, d_pad=d_pad,
                               apply_relu=apply_relu)
    return pl.pallas_call(
        kernel,
        out_shape=jax.ShapeDtypeStruct((n, d_pad), out_dtype),
        grid_spec=pltpu.PrefetchScalarGridSpec(
            num_scalar_prefetch=0,
            grid=(n_tiles, n_rel),
            in_specs=[
                pl.BlockSpec(memory_space=pltpu.MemorySpace.SMEM),         # comb (R,B) f32
                pl.BlockSpec((n, nbd), lambda i, r: (0, 0)),               # H_bases (resident)
                pl.BlockSpec((tile_n, d_pad), lambda i, r: (i, 0)),        # H_root row tile
                pl.BlockSpec((1, tile_n, n), lambda i, r: (r, i, 0)),      # A_r counts (int8)
                pl.BlockSpec((1, tile_n, 1), lambda i, r: (r, i, 0)),      # 1/deg rows (f32)
                pl.BlockSpec((1, d_pad), lambda i, r: (0, 0)),             # bias (lane-padded)
            ],
            out_specs=pl.BlockSpec((tile_n, d_pad), lambda i, r: (i, 0)),
            scratch_shapes=[pltpu.VMEM((tile_n, d_pad), jnp.float32)],
        ),
        compiler_params=pltpu.CompilerParams(
            dimension_semantics=("parallel", "arbitrary"),
            vmem_limit_bytes=vmem_limit,
        ),
    )(comb_f32, h_bases, h_root, adj_i8, inv_deg, bias_pad)


# ----------------------------------------------------------------------------
# Wrapper-side packing helpers (pure layout plumbing, tiny arrays)
# ----------------------------------------------------------------------------
def _pack_wcat(basis, root, d_in_pad, d_out_pad):
    """[basis_0 | ... | basis_{B-1} | root], each zero-padded to (d_in_pad, d_out_pad),
    concatenated along lanes -> [d_in_pad, (B+1)*d_out_pad]."""
    b, d_in, d_out = basis.shape
    w = jnp.zeros((b + 1, d_in_pad, d_out_pad), jnp.float32)
    w = w.at[:b, :d_in, :d_out].set(basis)
    w = w.at[b, :d_in, :d_out].set(root)
    return jnp.transpose(w, (1, 0, 2)).reshape(d_in_pad, (b + 1) * d_out_pad)


def _pad_lanes(v, d_pad):
    return jnp.pad(v.astype(jnp.float32), ((0, 0), (0, d_pad - v.shape[-1])))


# ----------------------------------------------------------------------------
# DDI_Encoder parameters + forward
# ----------------------------------------------------------------------------
def glorot(key, shape):
    fan_in, fan_out = shape[-2], shape[-1]
    lim = jnp.sqrt(6.0 / (fan_in + fan_out))
    return jax.random.uniform(key, shape, jnp.float32, -lim, lim)


def init_params(key, *, in_dim_drug, input_dim, num_se, num_base, hid1=64, hid2=20):
    ks = jax.random.split(key, 8)
    return {
        "drug_w": jax.random.normal(ks[0], (in_dim_drug, input_dim), jnp.float32),
        # SE_RGCN layer 1: input_dim -> hid1
        "basis1": glorot(ks[1], (num_base, input_dim, hid1)),
        "comb1": glorot(ks[2], (num_se, num_base)),
        "root1": glorot(ks[3], (input_dim, hid1)),
        "bias1": jnp.zeros((1, hid1), jnp.float32),
        # SE_RGCN layer 2: hid1 -> hid2
        "basis2": glorot(ks[4], (num_base, hid1, hid2)),
        "comb2": glorot(ks[5], (num_se, num_base)),
        "root2": glorot(ks[6], (hid1, hid2)),
        "bias2": jnp.zeros((1, hid2), jnp.float32),
    }


def build_relation_adjacency(edge_index_dict, num_nodes, num_se):
    """Raw int8 edge-count adjacency per relation [R,N,N] plus exact f32
    inverse in-degree [R,N,1] (normalization applied post-matmul in-kernel).
    TODO(synk): duplicate edges merge into counts > 1 (clipped at 127) before
                normalization; verify against the original SE_RGCN semantics."""
    counts, invd = [], []
    for r in range(num_se):
        src, dst = edge_index_dict[r]
        a = jnp.zeros((num_nodes, num_nodes), jnp.float32)
        a = a.at[dst, src].add(1.0)
        deg = jnp.clip(a.sum(axis=1, keepdims=True), 1.0, None)
        counts.append(a)
        invd.append(1.0 / deg)
    counts = jnp.stack(counts, axis=0)
    counts_i8 = jnp.clip(counts, 0.0, 127.0).astype(jnp.int8)
    inv_deg = jnp.stack(invd, axis=0)  # (R, N, 1) float32
    return counts_i8, inv_deg


def ddi_encoder_forward(params, x_drug_raw, adj_counts, inv_deg):
    bf = jnp.bfloat16
    n = x_drug_raw.shape[0]
    num_base = params["basis1"].shape[0]
    input_dim = params["basis1"].shape[1]
    hid1 = params["root1"].shape[1]
    hid2 = params["root2"].shape[1]
    dp1 = _round_up(hid1, 128)
    dp2 = _round_up(hid2, 128)

    vmem_limit = _vmem_limit_bytes()
    n_pad = _round_up(max(n, 1), 256)
    tile_n = _pick_row_tile(n_pad, num_base, vmem_limit)
    pad_n = n_pad - n

    # Pad node axis so tiles are always (multiple-of-256, 128)-aligned.
    x_pad = jnp.pad(x_drug_raw.astype(bf), ((0, pad_n), (0, 0)))
    adj_pad = jnp.pad(adj_counts, ((0, 0), (0, pad_n), (0, pad_n)))
    invdeg_pad = jnp.pad(inv_deg.astype(jnp.float32),
                         ((0, 0), (0, pad_n), (0, 0)), constant_values=1.0)
    comb1 = params["comb1"].astype(jnp.float32)
    comb2 = params["comb2"].astype(jnp.float32)

    # ---- SE_RGCN layer 1 (drug_w projection fused in; ReLU applied in-kernel) ----
    wcat1 = _pack_wcat(params["basis1"], params["root1"], input_dim, dp1).astype(bf)
    hb1, hr1 = _project(x_pad, wcat1, num_base, dp1, tile_n, vmem_limit,
                        pre_w_bf16=params["drug_w"].astype(bf))
    x1_pad = _aggregate(comb1, hb1, hr1, adj_pad, invdeg_pad,
                        _pad_lanes(params["bias1"], dp1),
                        apply_relu=True, tile_n=tile_n, out_dtype=bf,
                        vmem_limit=vmem_limit)

    # ---- SE_RGCN layer 2 (no activation); input stays 128-lane padded bf16 ----
    wcat2 = _pack_wcat(params["basis2"], params["root2"], dp1, dp2).astype(bf)
    hb2, hr2 = _project(x1_pad, wcat2, num_base, dp2, tile_n, vmem_limit)
    x2_pad = _aggregate(comb2, hb2, hr2, adj_pad, invdeg_pad,
                        _pad_lanes(params["bias2"], dp2),
                        apply_relu=False, tile_n=tile_n, out_dtype=jnp.float32,
                        vmem_limit=vmem_limit)

    x_out = x2_pad[:n, :hid2]
    # mirrors torch: after the first RGCN + relu, batch_copy['drug'].x = x_drug
    batch_copy = {"drug": {"x": x1_pad[:n, :hid1].astype(jnp.float32)}}
    return batch_copy, x_out


# ----------------------------------------------------------------------------
# Pure-JAX reference with matching precision / op order
# ----------------------------------------------------------------------------
def reference_forward(params, x_drug_raw, adj_counts, inv_deg):
    bf = jnp.bfloat16
    adj_bf = adj_counts.astype(jnp.float32).astype(bf)

    def bdot(a, b):
        return jnp.dot(a.astype(bf), b.astype(bf), preferred_element_type=jnp.float32)

    def layer(x_in, basis, comb, root, bias, apply_relu):
        num_base = basis.shape[0]
        hb = [bdot(x_in, basis[b]).astype(bf) for b in range(num_base)]
        out = bdot(x_in, root) + bias
        for r in range(comb.shape[0]):
            parts = [jnp.dot(adj_bf[r], hb[b], preferred_element_type=jnp.float32)
                     for b in range(num_base)]
            contrib = parts[0] * comb[r, 0]
            for b in range(1, num_base):
                contrib = contrib + parts[b] * comb[r, b]
            out = out + inv_deg[r] * contrib
        if apply_relu:
            out = jnp.maximum(out, 0.0)
        return out

    x0 = bdot(x_drug_raw, params["drug_w"])
    h1 = layer(x0.astype(bf), params["basis1"], params["comb1"],
               params["root1"], params["bias1"], True)
    h2 = layer(h1.astype(bf), params["basis2"], params["comb2"],
               params["root2"], params["bias2"], False)
    return h2


if __name__ == "__main__":
    # Small, module-consistent shapes.
    num_drugs = 16      # N drug nodes
    in_dim_drug = 32    # raw drug feature dim
    input_dim = 32      # projected dim (drug_w output)
    num_se = 3          # number of side-effect relations
    num_base = 2        # basis count
    num_edges = 24      # edges per relation

    key = jax.random.PRNGKey(0)
    k_param, k_x, *k_edges = jax.random.split(key, 2 + num_se)

    params = init_params(k_param, in_dim_drug=in_dim_drug, input_dim=input_dim,
                         num_se=num_se, num_base=num_base)

    x_drug_raw = jax.random.normal(k_x, (num_drugs, in_dim_drug), jnp.float32)

    edge_index_dict = {}
    for r in range(num_se):
        e_key = k_edges[r]
        src = jax.random.randint(jax.random.fold_in(e_key, 0), (num_edges,), 0, num_drugs)
        dst = jax.random.randint(jax.random.fold_in(e_key, 1), (num_edges,), 0, num_drugs)
        edge_index_dict[r] = (src, dst)

    adj_counts, inv_deg = build_relation_adjacency(edge_index_dict, num_drugs, num_se)

    fwd = jax.jit(ddi_encoder_forward)
    batch_copy, x_out = fwd(params, x_drug_raw, adj_counts, inv_deg)
    x_out = jax.block_until_ready(x_out)

    ref = reference_forward(params, x_drug_raw, adj_counts, inv_deg)
    assert x_out.shape == (num_drugs, 20)
    assert x_out.dtype == jnp.float32
    assert batch_copy["drug"]["x"].shape == (num_drugs, 64)
    assert jnp.allclose(x_out, ref, atol=5e-2, rtol=2e-2), (
        "mismatch vs reference: max abs err = "
        f"{float(jnp.max(jnp.abs(x_out - ref)))}"
    )

    print("KERNEL_OK")
</pallas_src>

<mosaic_0001>
module attributes {stable_mosaic.version = 11 : i64} {
  func.func @_proj_fused_kernel(%arg0: i32, %arg1: memref<256x32xbf16, #tpu.memory_space<vmem>>, %arg2: memref<32x32xbf16, #tpu.memory_space<vmem>>, %arg3: memref<32x384xbf16, #tpu.memory_space<vmem>>, %arg4: memref<256x256xbf16, #tpu.memory_space<vmem>>, %arg5: memref<256x128xf32, #tpu.memory_space<vmem>>) attributes {dimension_semantics = [#tpu.dimension_semantics<parallel>], iteration_bounds = array<i64: 1>, scalar_prefetch = 0 : i64, scratch_operands = 0 : i64, tpu.core_type = #tpu.core_type<tc>, window_params = [{transform_indices = @transform_0, window_bounds = array<i64: 256, 32>}, {pipeline_mode = #tpu.pipeline_mode<synchronous>, transform_indices = @transform_1, window_bounds = array<i64: 32, 32>}, {pipeline_mode = #tpu.pipeline_mode<synchronous>, transform_indices = @transform_2, window_bounds = array<i64: 32, 384>}, {transform_indices = @transform_3, window_bounds = array<i64: 256, 256>}, {transform_indices = @transform_4, window_bounds = array<i64: 256, 128>}]} {
    %c0 = arith.constant 0 : index
    %c0_0 = arith.constant 0 : index
    %0 = vector.load %arg1[%c0, %c0_0] : memref<256x32xbf16, #tpu.memory_space<vmem>>, vector<256x32xbf16>
    %c0_1 = arith.constant 0 : index
    %c0_2 = arith.constant 0 : index
    %1 = vector.load %arg2[%c0_1, %c0_2] : memref<32x32xbf16, #tpu.memory_space<vmem>>, vector<32x32xbf16>
    %cst = arith.constant dense<0.000000e+00> : vector<256x32xf32>
    %2 = tpu.matmul %0, %1, %cst {dimension_numbers = #tpu.dot_dimension_numbers<[1], [0], [0], [1], [0, 0, 1, 1], [], []>} : vector<256x32xbf16>, vector<32x32xbf16>, vector<256x32xf32> -> vector<256x32xf32>
    %3 = arith.truncf %2 : vector<256x32xf32> to vector<256x32xbf16>
    %c0_3 = arith.constant 0 : index
    %c0_4 = arith.constant 0 : index
    %4 = vector.load %arg3[%c0_3, %c0_4] : memref<32x384xbf16, #tpu.memory_space<vmem>>, vector<32x384xbf16>
    %cst_5 = arith.constant dense<0.000000e+00> : vector<256x384xf32>
    %5 = tpu.matmul %3, %4, %cst_5 {dimension_numbers = #tpu.dot_dimension_numbers<[1], [0], [0], [1], [0, 0, 1, 1], [], []>} : vector<256x32xbf16>, vector<32x384xbf16>, vector<256x384xf32> -> vector<256x384xf32>
    %6 = vector.extract_strided_slice %5 {offsets = [0, 0], sizes = [256, 256], strides = [1, 1]} : vector<256x384xf32> to vector<256x256xf32>
    %7 = arith.truncf %6 : vector<256x256xf32> to vector<256x256xbf16>
    %c0_6 = arith.constant 0 : index
    %c0_7 = arith.constant 0 : index
    %8 = vector.load %arg4[%c0_6, %c0_7] : memref<256x256xbf16, #tpu.memory_space<vmem>>, vector<256x256xbf16>
    tpu.vector_store %arg4[%c0_6, %c0_7], %7 {strides = array<i32>} : memref<256x256xbf16, #tpu.memory_space<vmem>>, vector<256x256xbf16>,
    %9 = vector.extract_strided_slice %5 {offsets = [0, 256], sizes = [256, 128], strides = [1, 1]} : vector<256x384xf32> to vector<256x128xf32>
    %c0_8 = arith.constant 0 : index
    %c0_9 = arith.constant 0 : index
    %10 = vector.load %arg5[%c0_8, %c0_9] : memref<256x128xf32, #tpu.memory_space<vmem>>, vector<256x128xf32>
    tpu.vector_store %arg5[%c0_8, %c0_9], %9 {strides = array<i32>} : memref<256x128xf32, #tpu.memory_space<vmem>>, vector<256x128xf32>,
    return
  }
  func.func @transform_0(%arg0: i32) -> (i32, i32) {
    %c0_i32 = arith.constant 0 : i32
    %c0_i32_0 = arith.constant 0 : i32
    return %arg0, %c0_i32 : i32, i32
  }
  func.func @transform_1(%arg0: i32) -> (i32, i32) {
    %c0_i32 = arith.constant 0 : i32
    %c0_i32_0 = arith.constant 0 : i32
    %c0_i32_1 = arith.constant 0 : i32
    return %c0_i32, %c0_i32_0 : i32, i32
  }
  func.func @transform_2(%arg0: i32) -> (i32, i32) {
    %c0_i32 = arith.constant 0 : i32
    %c0_i32_0 = arith.constant 0 : i32
    %c0_i32_1 = arith.constant 0 : i32
    return %c0_i32, %c0_i32_0 : i32, i32
  }
  func.func @transform_3(%arg0: i32) -> (i32, i32) {
    %c0_i32 = arith.constant 0 : i32
    %c0_i32_0 = arith.constant 0 : i32
    return %arg0, %c0_i32 : i32, i32
  }
  func.func @transform_4(%arg0: i32) -> (i32, i32) {
    %c0_i32 = arith.constant 0 : i32
    %c0_i32_0 = arith.constant 0 : i32
    return %arg0, %c0_i32 : i32, i32
  }
}

module attributes {stable_mosaic.version = 11 : i64} {
  func.func @_agg_kernel(%arg0: i32, %arg1: i32, %arg2: memref<3x2xf32, #tpu.memory_space<smem>>, %arg3: memref<256x256xbf16, #tpu.memory_space<vmem>>, %arg4: memref<256x128xf32, #tpu.memory_space<vmem>>, %arg5: memref<1x256x256xi8, #tpu.memory_space<vmem>>, %arg6: memref<1x256x1xf32, #tpu.memory_space<vmem>>, %arg7: memref<1x128xf32, #tpu.memory_space<vmem>>, %arg8: memref<256x128xbf16, #tpu.memory_space<vmem>>, %arg9: memref<256x128xf32, #tpu.memory_space<vmem>>) attributes {dimension_semantics = [#tpu.dimension_semantics<parallel>, #tpu.dimension_semantics<arbitrary>], iteration_bounds = array<i64: 1, 3>, scalar_prefetch = 0 : i64, scratch_operands = 1 : i64, tpu.core_type = #tpu.core_type<tc>, window_params = [{transform_indices = @transform_0, window_bounds = array<i64: 3, 2>}, {pipeline_mode = #tpu.pipeline_mode<synchronous>, transform_indices = @transform_1, window_bounds = array<i64: 256, 256>}, {transform_indices = @transform_2, window_bounds = array<i64: 256, 128>}, {transform_indices = @transform_3, window_bounds = array<i64: 1, 256, 256>}, {transform_indices = @transform_4, window_bounds = array<i64: 1, 256, 1>}, {pipeline_mode = #tpu.pipeline_mode<synchronous>, transform_indices = @transform_5, window_bounds = array<i64: 1, 128>}, {transform_indices = @transform_6, window_bounds = array<i64: 256, 128>}]} {
    %c0_i32 = arith.constant 0 : i32
    %0 = arith.cmpi eq, %arg1, %c0_i32 : i32
    %1 = arith.extui %0 : i1 to i32
    %c0_i32_0 = arith.constant 0 : i32
    %2 = arith.cmpi ne, %1, %c0_i32_0 : i32
    scf.if %2 {
      %c0_14 = arith.constant 0 : index
      %c0_15 = arith.constant 0 : index
      %29 = vector.load %arg4[%c0_14, %c0_15] : memref<256x128xf32, #tpu.memory_space<vmem>>, vector<256x128xf32>
      %c0_16 = arith.constant 0 : index
      %c0_17 = arith.constant 0 : index
      %30 = vector.load %arg7[%c0_16, %c0_17] : memref<1x128xf32, #tpu.memory_space<vmem>>, vector<1x128xf32>
      %31 = vector.broadcast %30 : vector<1x128xf32> to vector<256x128xf32>
      %32 = arith.addf %29, %31 : vector<256x128xf32>
      %c0_18 = arith.constant 0 : index
      %c0_19 = arith.constant 0 : index
      %33 = vector.load %arg9[%c0_18, %c0_19] : memref<256x128xf32, #tpu.memory_space<vmem>>, vector<256x128xf32>
      tpu.vector_store %arg9[%c0_18, %c0_19], %32 {strides = array<i32>} : memref<256x128xf32, #tpu.memory_space<vmem>>, vector<256x128xf32>,
    } else {
    }
    %c0 = arith.constant 0 : index
    %c0_1 = arith.constant 0 : index
    %c0_2 = arith.constant 0 : index
    %3 = vector.load %arg5[%c0, %c0_1, %c0_2] : memref<1x256x256xi8, #tpu.memory_space<vmem>>, vector<1x256x256xi8>
    %4 = vector.shape_cast %3 : vector<1x256x256xi8> to vector<256x256xi8>
    %5 = arith.sitofp %4 : vector<256x256xi8> to vector<256x256xbf16>
    %c0_3 = arith.constant 0 : index
    %c0_4 = arith.constant 0 : index
    %6 = vector.load %arg3[%c0_3, %c0_4] : memref<256x256xbf16, #tpu.memory_space<vmem>>, vector<256x256xbf16>
    %cst = arith.constant dense<0.000000e+00> : vector<256x256xf32>
    %7 = tpu.matmul %5, %6, %cst {dimension_numbers = #tpu.dot_dimension_numbers<[1], [0], [0], [1], [0, 0, 1, 1], [], []>} : vector<256x256xbf16>, vector<256x256xbf16>, vector<256x256xf32> -> vector<256x256xf32>
    %8 = arith.index_cast %arg1 : i32 to index
    %c0_5 = arith.constant 0 : index
    %9 = memref.load %arg2[%8, %c0_5] : memref<3x2xf32, #tpu.memory_space<smem>>
    %10 = vector.extract_strided_slice %7 {offsets = [0, 0], sizes = [256, 128], strides = [1, 1]} : vector<256x256xf32> to vector<256x128xf32>
    %11 = vector.broadcast %9 : f32 to vector<256x128xf32>
    %12 = arith.mulf %11, %10 : vector<256x128xf32>
    %13 = arith.index_cast %arg1 : i32 to index
    %c1 = arith.constant 1 : index
    %14 = memref.load %arg2[%13, %c1] : memref<3x2xf32, #tpu.memory_space<smem>>
    %15 = vector.extract_strided_slice %7 {offsets = [0, 128], sizes = [256, 128], strides = [1, 1]} : vector<256x256xf32> to vector<256x128xf32>
    %16 = vector.broadcast %14 : f32 to vector<256x128xf32>
    %17 = arith.mulf %16, %15 : vector<256x128xf32>
    %18 = arith.addf %12, %17 : vector<256x128xf32>
    %c0_6 = arith.constant 0 : index
    %c0_7 = arith.constant 0 : index
    %19 = vector.load %arg9[%c0_6, %c0_7] : memref<256x128xf32, #tpu.memory_space<vmem>>, vector<256x128xf32>
    %c0_8 = arith.constant 0 : index
    %c0_9 = arith.constant 0 : index
    %c0_10 = arith.constant 0 : index
    %20 = vector.load %arg6[%c0_8, %c0_9, %c0_10] : memref<1x256x1xf32, #tpu.memory_space<vmem>>, vector<1x256x1xf32>
    %21 = vector.shape_cast %20 : vector<1x256x1xf32> to vector<256x1xf32>
    %22 = vector.broadcast %21 : vector<256x1xf32> to vector<256x128xf32>
    %23 = arith.mulf %22, %18 : vector<256x128xf32>
    %24 = arith.addf %19, %23 : vector<256x128xf32>
    %c0_11 = arith.constant 0 : index
    %c0_12 = arith.constant 0 : index
    %25 = vector.load %arg9[%c0_11, %c0_12] : memref<256x128xf32, #tpu.memory_space<vmem>>, vector<256x128xf32>
    tpu.vector_store %arg9[%c0_11, %c0_12], %24 {strides = array<i32>} : memref<256x128xf32, #tpu.memory_space<vmem>>, vector<256x128xf32>,
    %c2_i32 = arith.constant 2 : i32
    %26 = arith.cmpi eq, %arg1, %c2_i32 : i32
    %27 = arith.extui %26 : i1 to i32
    %c0_i32_13 = arith.constant 0 : i32
    %28 = arith.cmpi ne, %27, %c0_i32_13 : i32
    scf.if %28 {
      %c0_14 = arith.constant 0 : index
      %c0_15 = arith.constant 0 : index
      %29 = vector.load %arg9[%c0_14, %c0_15] : memref<256x128xf32, #tpu.memory_space<vmem>>, vector<256x128xf32>
      %cst_16 = arith.constant 0.000000e+00 : f32
      %30 = vector.broadcast %cst_16 : f32 to vector<256x128xf32>
      %31 = arith.maximumf %29, %30 : vector<256x128xf32>
      %32 = arith.truncf %31 : vector<256x128xf32> to vector<256x128xbf16>
      %c0_17 = arith.constant 0 : index
      %c0_18 = arith.constant 0 : index
      %33 = vector.load %arg8[%c0_17, %c0_18] : memref<256x128xbf16, #tpu.memory_space<vmem>>, vector<256x128xbf16>
      tpu.vector_store %arg8[%c0_17, %c0_18], %32 {strides = array<i32>} : memref<256x128xbf16, #tpu.memory_space<vmem>>, vector<256x128xbf16>,
    } else {
    }
    return
  }
  func.func @transform_0(%arg0: i32, %arg1: i32) -> (i32, i32) {
    %c0_i32 = arith.constant 0 : i32
    %c0_i32_0 = arith.constant 0 : i32
    %c0_i32_1 = arith.constant 0 : i32
    return %c0_i32, %c0_i32_0 : i32, i32
  }
  func.func @transform_1(%arg0: i32, %arg1: i32) -> (i32, i32) {
    %c0_i32 = arith.constant 0 : i32
    %c0_i32_0 = arith.constant 0 : i32
    %c0_i32_1 = arith.constant 0 : i32
    return %c0_i32, %c0_i32_0 : i32, i32
  }
  func.func @transform_2(%arg0: i32, %arg1: i32) -> (i32, i32) {
    %c0_i32 = arith.constant 0 : i32
    %c0_i32_0 = arith.constant 0 : i32
    return %arg0, %c0_i32 : i32, i32
  }
  func.func @transform_3(%arg0: i32, %arg1: i32) -> (i32, i32, i32) {
    %c0_i32 = arith.constant 0 : i32
    %c0_i32_0 = arith.constant 0 : i32
    return %arg1, %arg0, %c0_i32 : i32, i32, i32
  }
  func.func @transform_4(%arg0: i32, %arg1: i32) -> (i32, i32, i32) {
    %c0_i32 = arith.constant 0 : i32
    %c0_i32_0 = arith.constant 0 : i32
    return %arg1, %arg0, %c0_i32 : i32, i32, i32
  }
  func.func @transform_5(%arg0: i32, %arg1: i32) -> (i32, i32) {
    %c0_i32 = arith.constant 0 : i32
    %c0_i32_0 = arith.constant 0 : i32
    %c0_i32_1 = arith.constant 0 : i32
    return %c0_i32, %c0_i32_0 : i32, i32
  }
  func.func @transform_6(%arg0: i32, %arg1: i32) -> (i32, i32) {
    %c0_i32 = arith.constant 0 : i32
    %c0_i32_0 = arith.constant 0 : i32
    return %arg0, %c0_i32 : i32, i32
  }
}

module attributes {stable_mosaic.version = 11 : i64} {
  func.func @_proj_kernel(%arg0: i32, %arg1: memref<256x128xbf16, #tpu.memory_space<vmem>>, %arg2: memref<128x384xbf16, #tpu.memory_space<vmem>>, %arg3: memref<256x256xbf16, #tpu.memory_space<vmem>>, %arg4: memref<256x128xf32, #tpu.memory_space<vmem>>) attributes {dimension_semantics = [#tpu.dimension_semantics<parallel>], iteration_bounds = array<i64: 1>, scalar_prefetch = 0 : i64, scratch_operands = 0 : i64, tpu.core_type = #tpu.core_type<tc>, window_params = [{transform_indices = @transform_0, window_bounds = array<i64: 256, 128>}, {pipeline_mode = #tpu.pipeline_mode<synchronous>, transform_indices = @transform_1, window_bounds = array<i64: 128, 384>}, {transform_indices = @transform_2, window_bounds = array<i64: 256, 256>}, {transform_indices = @transform_3, window_bounds = array<i64: 256, 128>}]} {
    %c0 = arith.constant 0 : index
    %c0_0 = arith.constant 0 : index
    %0 = vector.load %arg1[%c0, %c0_0] : memref<256x128xbf16, #tpu.memory_space<vmem>>, vector<256x128xbf16>
    %c0_1 = arith.constant 0 : index
    %c0_2 = arith.constant 0 : index
    %1 = vector.load %arg2[%c0_1, %c0_2] : memref<128x384xbf16, #tpu.memory_space<vmem>>, vector<128x384xbf16>
    %cst = arith.constant dense<0.000000e+00> : vector<256x384xf32>
    %2 = tpu.matmul %0, %1, %cst {dimension_numbers = #tpu.dot_dimension_numbers<[1], [0], [0], [1], [0, 0, 1, 1], [], []>} : vector<256x128xbf16>, vector<128x384xbf16>, vector<256x384xf32> -> vector<256x384xf32>
    %3 = vector.extract_strided_slice %2 {offsets = [0, 0], sizes = [256, 256], strides = [1, 1]} : vector<256x384xf32> to vector<256x256xf32>
    %4 = arith.truncf %3 : vector<256x256xf32> to vector<256x256xbf16>
    %c0_3 = arith.constant 0 : index
    %c0_4 = arith.constant 0 : index
    %5 = vector.load %arg3[%c0_3, %c0_4] : memref<256x256xbf16, #tpu.memory_space<vmem>>, vector<256x256xbf16>
    tpu.vector_store %arg3[%c0_3, %c0_4], %4 {strides = array<i32>} : memref<256x256xbf16, #tpu.memory_space<vmem>>, vector<256x256xbf16>,
    %6 = vector.extract_strided_slice %2 {offsets = [0, 256], sizes = [256, 128], strides = [1, 1]} : vector<256x384xf32> to vector<256x128xf32>
    %c0_5 = arith.constant 0 : index
    %c0_6 = arith.constant 0 : index
    %7 = vector.load %arg4[%c0_5, %c0_6] : memref<256x128xf32, #tpu.memory_space<vmem>>, vector<256x128xf32>
    tpu.vector_store %arg4[%c0_5, %c0_6], %6 {strides = array<i32>} : memref<256x128xf32, #tpu.memory_space<vmem>>, vector<256x128xf32>,
    return
  }
  func.func @transform_0(%arg0: i32) -> (i32, i32) {
    %c0_i32 = arith.constant 0 : i32
    %c0_i32_0 = arith.constant 0 : i32
    return %arg0, %c0_i32 : i32, i32
  }
  func.func @transform_1(%arg0: i32) -> (i32, i32) {
    %c0_i32 = arith.constant 0 : i32
    %c0_i32_0 = arith.constant 0 : i32
    %c0_i32_1 = arith.constant 0 : i32
    return %c0_i32, %c0_i32_0 : i32, i32
  }
  func.func @transform_2(%arg0: i32) -> (i32, i32) {
    %c0_i32 = arith.constant 0 : i32
    %c0_i32_0 = arith.constant 0 : i32
    return %arg0, %c0_i32 : i32, i32
  }
  func.func @transform_3(%arg0: i32) -> (i32, i32) {
    %c0_i32 = arith.constant 0 : i32
    %c0_i32_0 = arith.constant 0 : i32
    return %arg0, %c0_i32 : i32, i32
  }
}

module attributes {stable_mosaic.version = 11 : i64} {
  func.func @_agg_kernel(%arg0: i32, %arg1: i32, %arg2: memref<3x2xf32, #tpu.memory_space<smem>>, %arg3: memref<256x256xbf16, #tpu.memory_space<vmem>>, %arg4: memref<256x128xf32, #tpu.memory_space<vmem>>, %arg5: memref<1x256x256xi8, #tpu.memory_space<vmem>>, %arg6: memref<1x256x1xf32, #tpu.memory_space<vmem>>, %arg7: memref<1x128xf32, #tpu.memory_space<vmem>>, %arg8: memref<256x128xf32, #tpu.memory_space<vmem>>, %arg9: memref<256x128xf32, #tpu.memory_space<vmem>>) attributes {dimension_semantics = [#tpu.dimension_semantics<parallel>, #tpu.dimension_semantics<arbitrary>], iteration_bounds = array<i64: 1, 3>, scalar_prefetch = 0 : i64, scratch_operands = 1 : i64, tpu.core_type = #tpu.core_type<tc>, window_params = [{transform_indices = @transform_0, window_bounds = array<i64: 3, 2>}, {pipeline_mode = #tpu.pipeline_mode<synchronous>, transform_indices = @transform_1, window_bounds = array<i64: 256, 256>}, {transform_indices = @transform_2, window_bounds = array<i64: 256, 128>}, {transform_indices = @transform_3, window_bounds = array<i64: 1, 256, 256>}, {transform_indices = @transform_4, window_bounds = array<i64: 1, 256, 1>}, {pipeline_mode = #tpu.pipeline_mode<synchronous>, transform_indices = @transform_5, window_bounds = array<i64: 1, 128>}, {transform_indices = @transform_6, window_bounds = array<i64: 256, 128>}]} {
    %c0_i32 = arith.constant 0 : i32
    %0 = arith.cmpi eq, %arg1, %c0_i32 : i32
    %1 = arith.extui %0 : i1 to i32
    %c0_i32_0 = arith.constant 0 : i32
    %2 = arith.cmpi ne, %1, %c0_i32_0 : i32
    scf.if %2 {
      %c0_14 = arith.constant 0 : index
      %c0_15 = arith.constant 0 : index
      %29 = vector.load %arg4[%c0_14, %c0_15] : memref<256x128xf32, #tpu.memory_space<vmem>>, vector<256x128xf32>
      %c0_16 = arith.constant 0 : index
      %c0_17 = arith.constant 0 : index
      %30 = vector.load %arg7[%c0_16, %c0_17] : memref<1x128xf32, #tpu.memory_space<vmem>>, vector<1x128xf32>
      %31 = vector.broadcast %30 : vector<1x128xf32> to vector<256x128xf32>
      %32 = arith.addf %29, %31 : vector<256x128xf32>
      %c0_18 = arith.constant 0 : index
      %c0_19 = arith.constant 0 : index
      %33 = vector.load %arg9[%c0_18, %c0_19] : memref<256x128xf32, #tpu.memory_space<vmem>>, vector<256x128xf32>
      tpu.vector_store %arg9[%c0_18, %c0_19], %32 {strides = array<i32>} : memref<256x128xf32, #tpu.memory_space<vmem>>, vector<256x128xf32>,
    } else {
    }
    %c0 = arith.constant 0 : index
    %c0_1 = arith.constant 0 : index
    %c0_2 = arith.constant 0 : index
    %3 = vector.load %arg5[%c0, %c0_1, %c0_2] : memref<1x256x256xi8, #tpu.memory_space<vmem>>, vector<1x256x256xi8>
    %4 = vector.shape_cast %3 : vector<1x256x256xi8> to vector<256x256xi8>
    %5 = arith.sitofp %4 : vector<256x256xi8> to vector<256x256xbf16>
    %c0_3 = arith.constant 0 : index
    %c0_4 = arith.constant 0 : index
    %6 = vector.load %arg3[%c0_3, %c0_4] : memref<256x256xbf16, #tpu.memory_space<vmem>>, vector<256x256xbf16>
    %cst = arith.constant dense<0.000000e+00> : vector<256x256xf32>
    %7 = tpu.matmul %5, %6, %cst {dimension_numbers = #tpu.dot_dimension_numbers<[1], [0], [0], [1], [0, 0, 1, 1], [], []>} : vector<256x256xbf16>, vector<256x256xbf16>, vector<256x256xf32> -> vector<256x256xf32>
    %8 = arith.index_cast %arg1 : i32 to index
    %c0_5 = arith.constant 0 : index
    %9 = memref.load %arg2[%8, %c0_5] : memref<3x2xf32, #tpu.memory_space<smem>>
    %10 = vector.extract_strided_slice %7 {offsets = [0, 0], sizes = [256, 128], strides = [1, 1]} : vector<256x256xf32> to vector<256x128xf32>
    %11 = vector.broadcast %9 : f32 to vector<256x128xf32>
    %12 = arith.mulf %11, %10 : vector<256x128xf32>
    %13 = arith.index_cast %arg1 : i32 to index
    %c1 = arith.constant 1 : index
    %14 = memref.load %arg2[%13, %c1] : memref<3x2xf32, #tpu.memory_space<smem>>
    %15 = vector.extract_strided_slice %7 {offsets = [0, 128], sizes = [256, 128], strides = [1, 1]} : vector<256x256xf32> to vector<256x128xf32>
    %16 = vector.broadcast %14 : f32 to vector<256x128xf32>
    %17 = arith.mulf %16, %15 : vector<256x128xf32>
    %18 = arith.addf %12, %17 : vector<256x128xf32>
    %c0_6 = arith.constant 0 : index
    %c0_7 = arith.constant 0 : index
    %19 = vector.load %arg9[%c0_6, %c0_7] : memref<256x128xf32, #tpu.memory_space<vmem>>, vector<256x128xf32>
    %c0_8 = arith.constant 0 : index
    %c0_9 = arith.constant 0 : index
    %c0_10 = arith.constant 0 : index
    %20 = vector.load %arg6[%c0_8, %c0_9, %c0_10] : memref<1x256x1xf32, #tpu.memory_space<vmem>>, vector<1x256x1xf32>
    %21 = vector.shape_cast %20 : vector<1x256x1xf32> to vector<256x1xf32>
    %22 = vector.broadcast %21 : vector<256x1xf32> to vector<256x128xf32>
    %23 = arith.mulf %22, %18 : vector<256x128xf32>
    %24 = arith.addf %19, %23 : vector<256x128xf32>
    %c0_11 = arith.constant 0 : index
    %c0_12 = arith.constant 0 : index
    %25 = vector.load %arg9[%c0_11, %c0_12] : memref<256x128xf32, #tpu.memory_space<vmem>>, vector<256x128xf32>
    tpu.vector_store %arg9[%c0_11, %c0_12], %24 {strides = array<i32>} : memref<256x128xf32, #tpu.memory_space<vmem>>, vector<256x128xf32>,
    %c2_i32 = arith.constant 2 : i32
    %26 = arith.cmpi eq, %arg1, %c2_i32 : i32
    %27 = arith.extui %26 : i1 to i32
    %c0_i32_13 = arith.constant 0 : i32
    %28 = arith.cmpi ne, %27, %c0_i32_13 : i32
    scf.if %28 {
      %c0_14 = arith.constant 0 : index
      %c0_15 = arith.constant 0 : index
      %29 = vector.load %arg9[%c0_14, %c0_15] : memref<256x128xf32, #tpu.memory_space<vmem>>, vector<256x128xf32>
      %c0_16 = arith.constant 0 : index
      %c0_17 = arith.constant 0 : index
      %30 = vector.load %arg8[%c0_16, %c0_17] : memref<256x128xf32, #tpu.memory_space<vmem>>, vector<256x128xf32>
      tpu.vector_store %arg8[%c0_16, %c0_17], %29 {strides = array<i32>} : memref<256x128xf32, #tpu.memory_space<vmem>>, vector<256x128xf32>,
    } else {
    }
    return
  }
  func.func @transform_0(%arg0: i32, %arg1: i32) -> (i32, i32) {
    %c0_i32 = arith.constant 0 : i32
    %c0_i32_0 = arith.constant 0 : i32
    %c0_i32_1 = arith.constant 0 : i32
    return %c0_i32, %c0_i32_0 : i32, i32
  }
  func.func @transform_1(%arg0: i32, %arg1: i32) -> (i32, i32) {
    %c0_i32 = arith.constant 0 : i32
    %c0_i32_0 = arith.constant 0 : i32
    %c0_i32_1 = arith.constant 0 : i32
    return %c0_i32, %c0_i32_0 : i32, i32
  }
  func.func @transform_2(%arg0: i32, %arg1: i32) -> (i32, i32) {
    %c0_i32 = arith.constant 0 : i32
    %c0_i32_0 = arith.constant 0 : i32
    return %arg0, %c0_i32 : i32, i32
  }
  func.func @transform_3(%arg0: i32, %arg1: i32) -> (i32, i32, i32) {
    %c0_i32 = arith.constant 0 : i32
    %c0_i32_0 = arith.constant 0 : i32
    return %arg1, %arg0, %c0_i32 : i32, i32, i32
  }
  func.func @transform_4(%arg0: i32, %arg1: i32) -> (i32, i32, i32) {
    %c0_i32 = arith.constant 0 : i32
    %c0_i32_0 = arith.constant 0 : i32
    return %arg1, %arg0, %c0_i32 : i32, i32, i32
  }
  func.func @transform_5(%arg0: i32, %arg1: i32) -> (i32, i32) {
    %c0_i32 = arith.constant 0 : i32
    %c0_i32_0 = arith.constant 0 : i32
    %c0_i32_1 = arith.constant 0 : i32
    return %c0_i32, %c0_i32_0 : i32, i32
  }
  func.func @transform_6(%arg0: i32, %arg1: i32) -> (i32, i32) {
    %c0_i32 = arith.constant 0 : i32
    %c0_i32_0 = arith.constant 0 : i32
    return %arg0, %c0_i32 : i32, i32
  }
}

</mosaic_0001>

<bundles_post_ra>
// kernel: ddi_encoder_forward.4
= control target key start
LH: loop header
LB: loop body
LE: loop exit
PB: predicated region body
PF: predicated region fallthrough
CT: control target
= control target key end

     0   :  { %vm145_vm0 = vcmask 261120   ;;  %v1348_v24 = vmov 0   ;;  %s1702_s1 = inlined_call_operand.vmem [shape: bf16[32,32], index: 1, kind: input, shape index: {}]   ;;  %s1703_s0 = inlined_call_operand.vmem [shape: bf16[256,32], index: 0, kind: input, shape index: {}]   ;;  %s1704_s2 = inlined_call_operand.vmem [shape: bf16[32,384], index: 2, kind: input, shape index: {}]   ;;  %s1705_s4 = inlined_call_operand.vmem [shape: f32[256,128], index: 4, kind: output, shape index: {1}]   ;;  %s1706_s3 = inlined_call_operand.vmem [shape: bf16[256,256], index: 3, kind: output, shape index: {0}]  }
   0x1   :  { %v1322_v0 = vld [vmem:[%s1702_s1] sm:$0xff]   ;;  %v1323_v1 = vld [vmem:[%s1702_s1 + $0x8] sm:$0xff]   ;;  %v1326_v4 = vld [vmem:[%s1703_s0 + $0x10] sm:$0xff]   ;;  %491 = vmatprep.mubr.bf16.mxu1 %v1348_v24 }
   0x2   :  { %1249 = vmatprep.subr.bf16.mxu0 %v1322_v0  ;;  %v1324_v2 = vld [vmem:[%s1703_s0] sm:$0xff]   ;;  %v1325_v3 = vld [vmem:[%s1703_s0 + $0x8] sm:$0xff]   ;;  %v1327_v5 = vld [vmem:[%s1703_s0 + $0x18] sm:$0xff]  }
   0x3   :  { %1250 = vmatpush3.bf16.msra.mxu0 %v1322_v0  ;;  %1253 = vmatprep.mubr.msk.bf16.mxu0 %vm145_vm0, %v1324_v2  ;;  %v1328_v6 = vld [vmem:[%s1703_s0 + $0x20] sm:$0xff]   ;;  %v1343_v9 = vld [vmem:[%s1704_s2 + $0x8] ss:$12 sps:$4 sm:$0xff]   ;;  %v1331_v12 = vld [vmem:[%s1703_s0 + $0x38] sm:$0xff]  }
   0x4   :  { %1251 = vmatprep.subr.bf16.mxu0 %v1323_v1  ;;  %v1340_v7 = vld [vmem:[%s1704_s2 + $0x4] ss:$12 sps:$4 sm:$0xff]   ;;  %v1342_v8 = vld [vmem:[%s1704_s2] ss:$12 sps:$4 sm:$0xff]   ;;  %v1335_v16 = vld [vmem:[%s1703_s0 + $0x58] sm:$0xff]  }
   0x5   :  { %459 = vmatprep.subr.bf16.mxu1 %v1340_v7  ;;  %v1329_v10 = vld [vmem:[%s1703_s0 + $0x28] sm:$0xff]   ;;  %v1330_v11 = vld [vmem:[%s1703_s0 + $0x30] sm:$0xff]   ;;  %v1332_v13 = vld [vmem:[%s1703_s0 + $0x40] sm:$0xff]  }
   0x6   :  { %460 = vmatpush1.bf16.msra.mxu1 %v1342_v8  ;;  %v1333_v14 = vld [vmem:[%s1703_s0 + $0x48] sm:$0xff]   ;;  %v1334_v15 = vld [vmem:[%s1703_s0 + $0x50] sm:$0xff]   ;;  %v1336_v17 = vld [vmem:[%s1703_s0 + $0x60] sm:$0xff]  }
   0x7   :  { %1252 = vmatpush3.bf16.msra.mxu0 %v1323_v1  ;;  %v1337_v18 = vld [vmem:[%s1703_s0 + $0x68] sm:$0xff]   ;;  %v1338_v19 = vld [vmem:[%s1703_s0 + $0x70] sm:$0xff]   ;;  %v1339_v20 = vld [vmem:[%s1703_s0 + $0x78] sm:$0xff]  }
   0x8   :  { %1285 = vmatprep.subr.bf16.mxu0 %v1343_v9  ;;  %v1344_v21 = vld [vmem:[%s1704_s2 + $0x1c] ss:$12 sps:$4 sm:$0xff]   ;;  %v1346_v22 = vld [vmem:[%s1704_s2 + $0x18] ss:$12 sps:$4 sm:$0xff]   ;;  %v1347_v23 = vld [vmem:[%s1704_s2 + $0x20] ss:$12 sps:$4 sm:$0xff]  }
   0x9   :  { %461 = vmatprep.subr.bf16.mxu1 %v1344_v21 }
   0xa   :  { %1254 = vmatmul.mubr.msk.bf16.vlgmr.msra.gmra.mrb[0].mxu0 %vm145_vm0, %v1325_v3  ;;  %462 = vmatpush1.bf16.msra.mxu1 %v1346_v22 }
   0xb   :  { %1257 = vmatprep.mubr.msk.bf16.mxu0 %vm145_vm0, %v1326_v4  ;;  %1286 = vmatpush3.bf16.msra.mxu0 %v1343_v9 }
   0xc   :  { %1287 = vmatprep.subr.bf16.mxu0 %v1347_v23 }
   0xf   :  { %1288 = vmatpush3.bf16.msra.mxu0 %v1347_v23 }
  0x12   :  { %1258 = vmatmul.mubr.msk.bf16.gmra.mrb[4].mxu0 %vm145_vm0, %v1327_v5 }
  0x13   :  { %1261 = vmatprep.mubr.msk.bf16.mxu0 %vm145_vm0, %v1328_v6 }
  0x1a   :  { %1262 = vmatmul.mubr.msk.bf16.gmra.mrb[8].mxu0 %vm145_vm0, %v1329_v10 }
  0x1b   :  { %1265 = vmatprep.mubr.msk.bf16.mxu0 %vm145_vm0, %v1330_v11 }
  0x22   :  { %1266 = vmatmul.mubr.msk.bf16.gmra.mrb[12].mxu0 %vm145_vm0, %v1331_v12 }
  0x23   :  { %1269 = vmatprep.mubr.msk.bf16.mxu0 %vm145_vm0, %v1332_v13 }
  0x2a   :  { %1270 = vmatmul.mubr.msk.bf16.gmra.mrb[16].mxu0 %vm145_vm0, %v1333_v14 }
  0x2b   :  { %1273 = vmatprep.mubr.msk.bf16.mxu0 %vm145_vm0, %v1334_v15 }
  0x32   :  { %1274 = vmatmul.mubr.msk.bf16.gmra.mrb[20].mxu0 %vm145_vm0, %v1335_v16 }
  0x33   :  { %1277 = vmatprep.mubr.msk.bf16.mxu0 %vm145_vm0, %v1336_v17 }
  0x3a   :  { %1278 = vmatmul.mubr.msk.bf16.gmra.mrb[24].mxu0 %vm145_vm0, %v1337_v18 }
  0x3b   :  { %1281 = vmatprep.mubr.msk.bf16.mxu0 %vm145_vm0, %v1338_v19 }
  0x42   :  { %1282 = vmatmul.mubr.msk.bf16.gmra.mrb[28].mxu0 %vm145_vm0, %v1339_v20 }
  0xdd   :  { %v1255_v25 = vpop.f32.mrb[0].mxu0 }
  0xde   :  { %v228_v26 = vpop.f32.mrb[1].mxu0 }
  0xdf   :  { %v1256_v27 = vpop.f32.mrb[2].mxu0 }
  0xe0   :  { %v356_v28 = vpack.c.bf16 %v1256_v27, %v1255_v25  ;;  %v231_v29 = vpop.f32.mrb[3].mxu0 }
  0xe1   :  { %v355_v30 = vpack.c.bf16 %v231_v29, %v228_v26 }
  0xe3   :  { %1117 = vmatmul.mubr.msk.bf16.vlgmr.msra.gmra.mrb[0].mxu1 %vm145_vm0, %v355_v30  ;;  %1289 = vmatprep.mubr.msk.bf16.mxu0 %vm145_vm0, %v355_v30 }
  0xe4   :  { %1290 = vmatmul.mubr.msk.bf16.vlgmr.msra.gmra.mrb[32].mxu0 %vm145_vm0, %v356_v28  ;;  %501 = vmatprep.mubr.bf16.mxu1 %v1348_v24 }
  0xe5   :  { %v1259_v31 = vpop.f32.mrb[4].mxu0 }
  0xe6   :  { %v244_v32 = vpop.f32.mrb[5].mxu0 }
  0xe7   :  { %v1260_v33 = vpop.f32.mrb[6].mxu0 }
  0xe8   :  { %v358_v34 = vpack.c.bf16 %v1260_v33, %v1259_v31  ;;  %v247_v35 = vpop.f32.mrb[7].mxu0 }
  0xe9   :  { %v357_v36 = vpack.c.bf16 %v247_v35, %v244_v32 }
  0xeb   :  { %1118 = vmatmul.mubr.msk.bf16.gmra.mrb[4].mxu1 %vm145_vm0, %v356_v28  ;;  %1293 = vmatprep.mubr.msk.bf16.mxu0 %vm145_vm0, %v357_v36 }
  0xec   :  { %1294 = vmatmul.mubr.msk.bf16.gmra.mrb[36].mxu0 %vm145_vm0, %v358_v34  ;;  %511 = vmatprep.mubr.bf16.mxu1 %v1348_v24 }
  0xed   :  { %v1263_v37 = vpop.f32.mrb[8].mxu0 }
  0xee   :  { %v260_v38 = vpop.f32.mrb[9].mxu0 }
  0xef   :  { %v1264_v39 = vpop.f32.mrb[10].mxu0 }
  0xf0   :  { %v360_v40 = vpack.c.bf16 %v1264_v39, %v1263_v37  ;;  %v263_v41 = vpop.f32.mrb[11].mxu0 }
  0xf1   :  { %v359_v42 = vpack.c.bf16 %v263_v41, %v260_v38 }
  0xf3   :  { %1119 = vmatmul.mubr.msk.bf16.gmra.mrb[8].mxu1 %vm145_vm0, %v357_v36  ;;  %1297 = vmatprep.mubr.msk.bf16.mxu0 %vm145_vm0, %v359_v42 }
  0xf4   :  { %521 = vmatprep.mubr.bf16.mxu1 %v1348_v24  ;;  %1298 = vmatmul.mubr.msk.bf16.gmra.mrb[40].mxu0 %vm145_vm0, %v360_v40 }
  0xf5   :  { %v1267_v43 = vpop.f32.mrb[12].mxu0 }
  0xf6   :  { %v276_v44 = vpop.f32.mrb[13].mxu0 }
  0xf7   :  { %v1268_v45 = vpop.f32.mrb[14].mxu0 }
  0xf8   :  { %v362_v46 = vpack.c.bf16 %v1268_v45, %v1267_v43  ;;  %v279_v47 = vpop.f32.mrb[15].mxu0 }
  0xf9   :  { %v361_v48 = vpack.c.bf16 %v279_v47, %v276_v44 }
  0xfb   :  { %1120 = vmatmul.mubr.msk.bf16.gmra.mrb[12].mxu1 %vm145_vm0, %v358_v34  ;;  %1301 = vmatprep.mubr.msk.bf16.mxu0 %vm145_vm0, %v361_v48 }
  0xfc   :  { %531 = vmatprep.mubr.bf16.mxu1 %v1348_v24  ;;  %1302 = vmatmul.mubr.msk.bf16.gmra.mrb[44].mxu0 %vm145_vm0, %v362_v46 }
  0xfd   :  { %v1271_v49 = vpop.f32.mrb[16].mxu0 }
  0xfe   :  { %v292_v50 = vpop.f32.mrb[17].mxu0 }
  0xff   :  { %v1272_v51 = vpop.f32.mrb[18].mxu0 }
 0x100   :  { %v364_v52 = vpack.c.bf16 %v1272_v51, %v1271_v49  ;;  %v295_v53 = vpop.f32.mrb[19].mxu0 }
 0x101   :  { %v363_v54 = vpack.c.bf16 %v295_v53, %v292_v50 }
 0x103   :  { %1121 = vmatmul.mubr.msk.bf16.gmra.mrb[16].mxu1 %vm145_vm0, %v359_v42  ;;  %1305 = vmatprep.mubr.msk.bf16.mxu0 %vm145_vm0, %v363_v54 }
 0x104   :  { %541 = vmatprep.mubr.bf16.mxu1 %v1348_v24  ;;  %1306 = vmatmul.mubr.msk.bf16.gmra.mrb[48].mxu0 %vm145_vm0, %v364_v52 }
 0x105   :  { %v1275_v55 = vpop.f32.mrb[20].mxu0 }
 0x106   :  { %v308_v56 = vpop.f32.mrb[21].mxu0 }
 0x107   :  { %v1276_v57 = vpop.f32.mrb[22].mxu0 }
 0x108   :  { %v366_v58 = vpack.c.bf16 %v1276_v57, %v1275_v55  ;;  %v311_v59 = vpop.f32.mrb[23].mxu0 }
 0x109   :  { %v365_v60 = vpack.c.bf16 %v311_v59, %v308_v56 }
 0x10b   :  { %1122 = vmatmul.mubr.msk.bf16.gmra.mrb[20].mxu1 %vm145_vm0, %v360_v40  ;;  %1309 = vmatprep.mubr.msk.bf16.mxu0 %vm145_vm0, %v365_v60 }
 0x10c   :  { %551 = vmatprep.mubr.bf16.mxu1 %v1348_v24  ;;  %1310 = vmatmul.mubr.msk.bf16.gmra.mrb[52].mxu0 %vm145_vm0, %v366_v58 }
 0x10d   :  { %v1279_v61 = vpop.f32.mrb[24].mxu0 }
 0x10e   :  { %v324_v62 = vpop.f32.mrb[25].mxu0 }
 0x10f   :  { %v1280_v63 = vpop.f32.mrb[26].mxu0 }
 0x110   :  { %v368_v0 = vpack.c.bf16 %v1280_v63, %v1279_v61  ;;  %v327_v1 = vpop.f32.mrb[27].mxu0 }
 0x111   :  { %v367_v2 = vpack.c.bf16 %v327_v1, %v324_v62 }
 0x113   :  { %1123 = vmatmul.mubr.msk.bf16.gmra.mrb[24].mxu1 %vm145_vm0, %v361_v48  ;;  %1313 = vmatprep.mubr.msk.bf16.mxu0 %vm145_vm0, %v367_v2 }
 0x114   :  { %561 = vmatprep.mubr.bf16.mxu1 %v1348_v24  ;;  %1314 = vmatmul.mubr.msk.bf16.gmra.mrb[56].mxu0 %vm145_vm0, %v368_v0 }
 0x115   :  { %v1283_v3 = vpop.f32.mrb[28].mxu0 }
 0x116   :  { %v340_v4 = vpop.f32.mrb[29].mxu0 }
 0x117   :  { %v1284_v5 = vpop.f32.mrb[30].mxu0 }
 0x118   :  { %v370_v6 = vpack.c.bf16 %v1284_v5, %v1283_v3  ;;  %v343_v7 = vpop.f32.mrb[31].mxu0 }
 0x119   :  { %v369_v8 = vpack.c.bf16 %v343_v7, %v340_v4 }
 0x11b   :  { %1124 = vmatmul.mubr.msk.bf16.gmra.mrb[28].mxu1 %vm145_vm0, %v362_v46  ;;  %1317 = vmatprep.mubr.msk.bf16.mxu0 %vm145_vm0, %v369_v8 }
 0x11c   :  { %571 = vmatprep.mubr.bf16.mxu1 %v1348_v24  ;;  %1318 = vmatmul.mubr.msk.bf16.gmra.mrb[60].mxu0 %vm145_vm0, %v370_v6 }
 0x123   :  { %1125 = vmatmul.mubr.msk.bf16.gmra.mrb[32].mxu1 %vm145_vm0, %v363_v54 }
 0x124   :  { %581 = vmatprep.mubr.bf16.mxu1 %v1348_v24 }
 0x12b   :  { %1126 = vmatmul.mubr.msk.bf16.gmra.mrb[36].mxu1 %vm145_vm0, %v364_v52 }
 0x12c   :  { %591 = vmatprep.mubr.bf16.mxu1 %v1348_v24 }
 0x133   :  { %1127 = vmatmul.mubr.msk.bf16.gmra.mrb[40].mxu1 %vm145_vm0, %v365_v60 }
 0x134   :  { %601 = vmatprep.mubr.bf16.mxu1 %v1348_v24 }
 0x13b   :  { %1128 = vmatmul.mubr.msk.bf16.gmra.mrb[44].mxu1 %vm145_vm0, %v366_v58 }
 0x13c   :  { %611 = vmatprep.mubr.bf16.mxu1 %v1348_v24 }
 0x143   :  { %1129 = vmatmul.mubr.msk.bf16.gmra.mrb[48].mxu1 %vm145_vm0, %v367_v2 }
 0x144   :  { %621 = vmatprep.mubr.bf16.mxu1 %v1348_v24 }
 0x14b   :  { %1130 = vmatmul.mubr.msk.bf16.gmra.mrb[52].mxu1 %vm145_vm0, %v368_v0 }
 0x14c   :  { %631 = vmatprep.mubr.bf16.mxu1 %v1348_v24 }
 0x153   :  { %1131 = vmatmul.mubr.msk.bf16.gmra.mrb[56].mxu1 %vm145_vm0, %v369_v8 }
 0x154   :  { %641 = vmatprep.mubr.bf16.mxu1 %v1348_v24 }
 0x15b   :  { %1132 = vmatmul.mubr.msk.bf16.gmra.mrb[60].mxu1 %vm145_vm0, %v370_v6 }
 0x1b6   :  { %v493_v9 = vpop.f32.mrb[0].mxu1 }
 0x1b7   :  { %v495_v10 = vpop.f32.mrb[1].mxu1  ;;  %v1291_v11 = vpop.f32.mrb[32].mxu0 }
 0x1b8   :  { %v1181_v12 = vpack.c.bf16 %v495_v10, %v493_v9  ;;  %1039 = vst [vmem:[%s1705_s4 + $0x10] sm:$0xff] %v1291_v11  ;;  %v497_v13 = vpop.f32.mrb[2].mxu1  ;;  %v686_v14 = vpop.f32.mrb[33].mxu0 }
 0x1b9   :  { %1037 = vst [vmem:[%s1705_s4] sm:$0xff] %v686_v14  ;;  %v499_v15 = vpop.f32.mrb[3].mxu1  ;;  %v1292_v16 = vpop.f32.mrb[34].mxu0 }
 0x1ba   :  { %1005 = vst [vmem:[%s1706_s3] sm:$0xff] %v1181_v12  ;;  %v1182_v17 = vpack.c.bf16 %v499_v15, %v497_v13  ;;  %1040 = vst [vmem:[%s1705_s4 + $0x18] sm:$0xff] %v1292_v16  ;;  %v689_v18 = vpop.f32.mrb[35].mxu0 }
 0x1bb   :  { %1038 = vst [vmem:[%s1705_s4 + $0x8] sm:$0xff] %v689_v18 }
 0x1bc   :  { %1006 = vst [vmem:[%s1706_s3 + $0x8] sm:$0xff] %v1182_v17 }
 0x1be   :  { %v503_v19 = vpop.f32.mrb[4].mxu1 }
 0x1bf   :  { %v505_v20 = vpop.f32.mrb[5].mxu1  ;;  %v1295_v21 = vpop.f32.mrb[36].mxu0 }
 0x1c0   :  { %v1183_v22 = vpack.c.bf16 %v505_v20, %v503_v19  ;;  %v507_v23 = vpop.f32.mrb[6].mxu1  ;;  %1043 = vst [vmem:[%s1705_s4 + $0x30] sm:$0xff] %v1295_v21  ;;  %v702_v24 = vpop.f32.mrb[37].mxu0 }
 0x1c1   :  { %v509_v25 = vpop.f32.mrb[7].mxu1  ;;  %1041 = vst [vmem:[%s1705_s4 + $0x20] sm:$0xff] %v702_v24  ;;  %v1296_v26 = vpop.f32.mrb[38].mxu0 }
 0x1c2   :  { %1007 = vst [vmem:[%s1706_s3 + $0x10] sm:$0xff] %v1183_v22  ;;  %v1184_v27 = vpack.c.bf16 %v509_v25, %v507_v23  ;;  %1044 = vst [vmem:[%s1705_s4 + $0x38] sm:$0xff] %v1296_v26  ;;  %v705_v28 = vpop.f32.mrb[39].mxu0 }
 0x1c3   :  { %1042 = vst [vmem:[%s1705_s4 + $0x28] sm:$0xff] %v705_v28 }
 0x1c4   :  { %1008 = vst [vmem:[%s1706_s3 + $0x18] sm:$0xff] %v1184_v27 }
 0x1c6   :  { %v513_v29 = vpop.f32.mrb[8].mxu1 }
 0x1c7   :  { %v515_v30 = vpop.f32.mrb[9].mxu1  ;;  %v1299_v31 = vpop.f32.mrb[40].mxu0 }
 0x1c8   :  { %v1185_v32 = vpack.c.bf16 %v515_v30, %v513_v29  ;;  %v517_v33 = vpop.f32.mrb[10].mxu1  ;;  %1047 = vst [vmem:[%s1705_s4 + $0x50] sm:$0xff] %v1299_v31  ;;  %v718_v34 = vpop.f32.mrb[41].mxu0 }
 0x1c9   :  { %v519_v35 = vpop.f32.mrb[11].mxu1  ;;  %1045 = vst [vmem:[%s1705_s4 + $0x40] sm:$0xff] %v718_v34  ;;  %v1300_v36 = vpop.f32.mrb[42].mxu0 }
 0x1ca   :  { %1009 = vst [vmem:[%s1706_s3 + $0x20] sm:$0xff] %v1185_v32  ;;  %v1186_v37 = vpack.c.bf16 %v519_v35, %v517_v33  ;;  %1048 = vst [vmem:[%s1705_s4 + $0x58] sm:$0xff] %v1300_v36  ;;  %v721_v38 = vpop.f32.mrb[43].mxu0 }
 0x1cb   :  { %1046 = vst [vmem:[%s1705_s4 + $0x48] sm:$0xff] %v721_v38 }
 0x1cc   :  { %1010 = vst [vmem:[%s1706_s3 + $0x28] sm:$0xff] %v1186_v37 }
 0x1ce   :  { %v523_v39 = vpop.f32.mrb[12].mxu1 }
 0x1cf   :  { %v525_v40 = vpop.f32.mrb[13].mxu1  ;;  %v1303_v41 = vpop.f32.mrb[44].mxu0 }
 0x1d0   :  { %v1187_v42 = vpack.c.bf16 %v525_v40, %v523_v39  ;;  %v527_v43 = vpop.f32.mrb[14].mxu1  ;;  %1051 = vst [vmem:[%s1705_s4 + $0x70] sm:$0xff] %v1303_v41  ;;  %v734_v44 = vpop.f32.mrb[45].mxu0 }
 0x1d1   :  { %v529_v45 = vpop.f32.mrb[15].mxu1  ;;  %1049 = vst [vmem:[%s1705_s4 + $0x60] sm:$0xff] %v734_v44  ;;  %v1304_v46 = vpop.f32.mrb[46].mxu0 }
 0x1d2   :  { %1011 = vst [vmem:[%s1706_s3 + $0x30] sm:$0xff] %v1187_v42  ;;  %v1188_v47 = vpack.c.bf16 %v529_v45, %v527_v43  ;;  %1052 = vst [vmem:[%s1705_s4 + $0x78] sm:$0xff] %v1304_v46  ;;  %v737_v48 = vpop.f32.mrb[47].mxu0 }
 0x1d3   :  { %1050 = vst [vmem:[%s1705_s4 + $0x68] sm:$0xff] %v737_v48 }
 0x1d4   :  { %1012 = vst [vmem:[%s1706_s3 + $0x38] sm:$0xff] %v1188_v47 }
 0x1d6   :  { %v533_v49 = vpop.f32.mrb[16].mxu1 }
 0x1d7   :  { %v535_v50 = vpop.f32.mrb[17].mxu1  ;;  %v1307_v51 = vpop.f32.mrb[48].mxu0 }
 0x1d8   :  { %v1189_v52 = vpack.c.bf16 %v535_v50, %v533_v49  ;;  %v537_v53 = vpop.f32.mrb[18].mxu1  ;;  %1055 = vst [vmem:[%s1705_s4 + $0x90] sm:$0xff] %v1307_v51  ;;  %v750_v54 = vpop.f32.mrb[49].mxu0 }
 0x1d9   :  { %v539_v55 = vpop.f32.mrb[19].mxu1  ;;  %1053 = vst [vmem:[%s1705_s4 + $0x80] sm:$0xff] %v750_v54  ;;  %v1308_v56 = vpop.f32.mrb[50].mxu0 }
 0x1da   :  { %1013 = vst [vmem:[%s1706_s3 + $0x40] sm:$0xff] %v1189_v52  ;;  %v1190_v57 = vpack.c.bf16 %v539_v55, %v537_v53  ;;  %1056 = vst [vmem:[%s1705_s4 + $0x98] sm:$0xff] %v1308_v56  ;;  %v753_v58 = vpop.f32.mrb[51].mxu0 }
 0x1db   :  { %1054 = vst [vmem:[%s1705_s4 + $0x88] sm:$0xff] %v753_v58 }
 0x1dc   :  { %1014 = vst [vmem:[%s1706_s3 + $0x48] sm:$0xff] %v1190_v57 }
 0x1de   :  { %v543_v59 = vpop.f32.mrb[20].mxu1 }
 0x1df   :  { %v545_v60 = vpop.f32.mrb[21].mxu1  ;;  %v1311_v61 = vpop.f32.mrb[52].mxu0 }
 0x1e0   :  { %v1191_v62 = vpack.c.bf16 %v545_v60, %v543_v59  ;;  %v547_v63 = vpop.f32.mrb[22].mxu1  ;;  %1059 = vst [vmem:[%s1705_s4 + $0xb0] sm:$0xff] %v1311_v61  ;;  %v766_v0 = vpop.f32.mrb[53].mxu0 }
 0x1e1   :  { %v549_v1 = vpop.f32.mrb[23].mxu1  ;;  %1057 = vst [vmem:[%s1705_s4 + $0xa0] sm:$0xff] %v766_v0  ;;  %v1312_v2 = vpop.f32.mrb[54].mxu0 }
 0x1e2   :  { %1015 = vst [vmem:[%s1706_s3 + $0x50] sm:$0xff] %v1191_v62  ;;  %v1192_v3 = vpack.c.bf16 %v549_v1, %v547_v63  ;;  %1060 = vst [vmem:[%s1705_s4 + $0xb8] sm:$0xff] %v1312_v2  ;;  %v769_v4 = vpop.f32.mrb[55].mxu0 }
 0x1e3   :  { %1058 = vst [vmem:[%s1705_s4 + $0xa8] sm:$0xff] %v769_v4 }
 0x1e4   :  { %1016 = vst [vmem:[%s1706_s3 + $0x58] sm:$0xff] %v1192_v3 }
 0x1e6   :  { %v553_v5 = vpop.f32.mrb[24].mxu1 }
 0x1e7   :  { %v555_v6 = vpop.f32.mrb[25].mxu1  ;;  %v1315_v7 = vpop.f32.mrb[56].mxu0 }
 0x1e8   :  { %v1193_v8 = vpack.c.bf16 %v555_v6, %v553_v5  ;;  %v557_v9 = vpop.f32.mrb[26].mxu1  ;;  %1063 = vst [vmem:[%s1705_s4 + $0xd0] sm:$0xff] %v1315_v7  ;;  %v782_v10 = vpop.f32.mrb[57].mxu0 }
 0x1e9   :  { %v559_v11 = vpop.f32.mrb[27].mxu1  ;;  %1061 = vst [vmem:[%s1705_s4 + $0xc0] sm:$0xff] %v782_v10  ;;  %v1316_v12 = vpop.f32.mrb[58].mxu0 }
 0x1ea   :  { %1017 = vst [vmem:[%s1706_s3 + $0x60] sm:$0xff] %v1193_v8  ;;  %v1194_v13 = vpack.c.bf16 %v559_v11, %v557_v9  ;;  %1064 = vst [vmem:[%s1705_s4 + $0xd8] sm:$0xff] %v1316_v12  ;;  %v785_v14 = vpop.f32.mrb[59].mxu0 }
 0x1eb   :  { %1062 = vst [vmem:[%s1705_s4 + $0xc8] sm:$0xff] %v785_v14 }
 0x1ec   :  { %1018 = vst [vmem:[%s1706_s3 + $0x68] sm:$0xff] %v1194_v13 }
 0x1ee   :  { %v563_v15 = vpop.f32.mrb[28].mxu1 }
 0x1ef   :  { %v565_v16 = vpop.f32.mrb[29].mxu1  ;;  %v1319_v17 = vpop.f32.mrb[60].mxu0 }
 0x1f0   :  { %v1195_v18 = vpack.c.bf16 %v565_v16, %v563_v15  ;;  %v567_v19 = vpop.f32.mrb[30].mxu1  ;;  %1067 = vst [vmem:[%s1705_s4 + $0xf0] sm:$0xff] %v1319_v17  ;;  %v798_v20 = vpop.f32.mrb[61].mxu0 }
 0x1f1   :  { %v569_v21 = vpop.f32.mrb[31].mxu1  ;;  %1065 = vst [vmem:[%s1705_s4 + $0xe0] sm:$0xff] %v798_v20  ;;  %v1320_v22 = vpop.f32.mrb[62].mxu0 }
 0x1f2   :  { %1019 = vst [vmem:[%s1706_s3 + $0x70] sm:$0xff] %v1195_v18  ;;  %v1196_v23 = vpack.c.bf16 %v569_v21, %v567_v19  ;;  %1068 = vst [vmem:[%s1705_s4 + $0xf8] sm:$0xff] %v1320_v22  ;;  %v801_v24 = vpop.f32.mrb[63].mxu0 }
 0x1f3   :  { %1066 = vst [vmem:[%s1705_s4 + $0xe8] sm:$0xff] %v801_v24 }
 0x1f4   :  { %1020 = vst [vmem:[%s1706_s3 + $0x78] sm:$0xff] %v1196_v23 }
 0x1f6   :  { %v573_v25 = vpop.f32.mrb[32].mxu1 }
 0x1f7   :  { %v575_v26 = vpop.f32.mrb[33].mxu1 }
 0x1f8   :  { %v1197_v27 = vpack.c.bf16 %v575_v26, %v573_v25  ;;  %v577_v28 = vpop.f32.mrb[34].mxu1 }
 0x1f9   :  { %v579_v29 = vpop.f32.mrb[35].mxu1 }
 0x1fa   :  { %1021 = vst [vmem:[%s1706_s3 + $0x80] sm:$0xff] %v1197_v27  ;;  %v1198_v30 = vpack.c.bf16 %v579_v29, %v577_v28 }
 0x1fc   :  { %1022 = vst [vmem:[%s1706_s3 + $0x88] sm:$0xff] %v1198_v30 }
 0x1fe   :  { %v583_v31 = vpop.f32.mrb[36].mxu1 }
 0x1ff   :  { %v585_v32 = vpop.f32.mrb[37].mxu1 }
 0x200   :  { %v1199_v33 = vpack.c.bf16 %v585_v32, %v583_v31  ;;  %v587_v34 = vpop.f32.mrb[38].mxu1 }
 0x201   :  { %v589_v35 = vpop.f32.mrb[39].mxu1 }
 0x202   :  { %1023 = vst [vmem:[%s1706_s3 + $0x90] sm:$0xff] %v1199_v33  ;;  %v1200_v36 = vpack.c.bf16 %v589_v35, %v587_v34 }
 0x204   :  { %1024 = vst [vmem:[%s1706_s3 + $0x98] sm:$0xff] %v1200_v36 }
 0x206   :  { %v593_v37 = vpop.f32.mrb[40].mxu1 }
 0x207   :  { %v595_v38 = vpop.f32.mrb[41].mxu1 }
 0x208   :  { %v1201_v39 = vpack.c.bf16 %v595_v38, %v593_v37  ;;  %v597_v40 = vpop.f32.mrb[42].mxu1 }
 0x209   :  { %v599_v41 = vpop.f32.mrb[43].mxu1 }
 0x20a   :  { %1025 = vst [vmem:[%s1706_s3 + $0xa0] sm:$0xff] %v1201_v39  ;;  %v1202_v42 = vpack.c.bf16 %v599_v41, %v597_v40 }
 0x20c   :  { %1026 = vst [vmem:[%s1706_s3 + $0xa8] sm:$0xff] %v1202_v42 }
 0x20e   :  { %v603_v43 = vpop.f32.mrb[44].mxu1 }
 0x20f   :  { %v605_v44 = vpop.f32.mrb[45].mxu1 }
 0x210   :  { %v1203_v45 = vpack.c.bf16 %v605_v44, %v603_v43  ;;  %v607_v46 = vpop.f32.mrb[46].mxu1 }
 0x211   :  { %v609_v47 = vpop.f32.mrb[47].mxu1 }
 0x212   :  { %1027 = vst [vmem:[%s1706_s3 + $0xb0] sm:$0xff] %v1203_v45  ;;  %v1204_v48 = vpack.c.bf16 %v609_v47, %v607_v46 }
 0x214   :  { %1028 = vst [vmem:[%s1706_s3 + $0xb8] sm:$0xff] %v1204_v48 }
 0x216   :  { %v613_v49 = vpop.f32.mrb[48].mxu1 }
 0x217   :  { %v615_v50 = vpop.f32.mrb[49].mxu1 }
 0x218   :  { %v1205_v51 = vpack.c.bf16 %v615_v50, %v613_v49  ;;  %v617_v52 = vpop.f32.mrb[50].mxu1 }
 0x219   :  { %v619_v53 = vpop.f32.mrb[51].mxu1 }
 0x21a   :  { %1029 = vst [vmem:[%s1706_s3 + $0xc0] sm:$0xff] %v1205_v51  ;;  %v1206_v54 = vpack.c.bf16 %v619_v53, %v617_v52 }
 0x21c   :  { %1030 = vst [vmem:[%s1706_s3 + $0xc8] sm:$0xff] %v1206_v54 }
 0x21e   :  { %v623_v55 = vpop.f32.mrb[52].mxu1 }
 0x21f   :  { %v625_v56 = vpop.f32.mrb[53].mxu1 }
 0x220   :  { %v1207_v57 = vpack.c.bf16 %v625_v56, %v623_v55  ;;  %v627_v58 = vpop.f32.mrb[54].mxu1 }
 0x221   :  { %v629_v59 = vpop.f32.mrb[55].mxu1 }
 0x222   :  { %1031 = vst [vmem:[%s1706_s3 + $0xd0] sm:$0xff] %v1207_v57  ;;  %v1208_v60 = vpack.c.bf16 %v629_v59, %v627_v58 }
 0x224   :  { %1032 = vst [vmem:[%s1706_s3 + $0xd8] sm:$0xff] %v1208_v60 }
 0x226   :  { %v633_v61 = vpop.f32.mrb[56].mxu1 }
 0x227   :  { %v635_v62 = vpop.f32.mrb[57].mxu1 }
 0x228   :  { %v1209_v63 = vpack.c.bf16 %v635_v62, %v633_v61  ;;  %v637_v0 = vpop.f32.mrb[58].mxu1 }
 0x229   :  { %v639_v1 = vpop.f32.mrb[59].mxu1 }
 0x22a   :  { %1033 = vst [vmem:[%s1706_s3 + $0xe0] sm:$0xff] %v1209_v63  ;;  %v1210_v2 = vpack.c.bf16 %v639_v1, %v637_v0 }
 0x22c   :  { %1034 = vst [vmem:[%s1706_s3 + $0xe8] sm:$0xff] %v1210_v2 }
 0x22e   :  { %v643_v3 = vpop.f32.mrb[60].mxu1 }
 0x22f   :  { %v645_v4 = vpop.f32.mrb[61].mxu1 }
 0x230   :  { %v1211_v5 = vpack.c.bf16 %v645_v4, %v643_v3  ;;  %v647_v6 = vpop.f32.mrb[62].mxu1 }
 0x231   :  { %v649_v7 = vpop.f32.mrb[63].mxu1 }
 0x232   :  { %1035 = vst [vmem:[%s1706_s3 + $0xf0] sm:$0xff] %v1211_v5  ;;  %v1212_v8 = vpack.c.bf16 %v649_v7, %v647_v6 }
 0x234   :  { %1036 = vst [vmem:[%s1706_s3 + $0xf8] sm:$0xff] %v1212_v8 }

// kernel: ddi_encoder_forward.5
= control target key start
LH: loop header
LB: loop body
LE: loop exit
PB: predicated region body
PF: predicated region fallthrough
CT: control target
= control target key end

     0   :  { %11 = vsyncpa [#allocation4], 0  ;;  %s2072_s21 = smov 0   ;;  %s2074_s22 = smov 0   ;;  %s2581_s0 = inlined_call_operand.vmem [shape: f32[3,2], index: 0, kind: input, shape index: {}]   ;;  %s2582_s1 = inlined_call_operand.vmem [shape: bf16[256,256], index: 1, kind: input, shape index: {}]   ;;  %s2583_s2 = inlined_call_operand.vmem [shape: f32[256,128], index: 2, kind: input, shape index: {}]   ;;  %s2584_s3 = inlined_call_operand.vmem [shape: s8[3,256,256], index: 3, kind: input, shape index: {}]   ;;  %s2585_s4 = inlined_call_operand.vmem [shape: f32[3,256,1], index: 4, kind: input, shape index: {}]   ;;  %s2586_s5 = inlined_call_operand.vmem [shape: f32[1,128], index: 5, kind: input, shape index: {}]   ;;  %s2587_s6 = inlined_call_operand.vmem [shape: bf16[256,128], index: 6, kind: output, shape index: {}]  }
   0x1   :  { %s2076_s23 = smov 0  }
   0x2 LB: > { %s1662_s24 = sadd.s32 4294967295, %s2033_s23   ;;  %s26_s25 = sadd.s32 1, %s2029_s22  ;;  %s2033_s23 = sphi %s2076_s23, %s17_s23   ;;  %s2029_s22 = sphi %s2074_s22, %s2591_s22   ;;  %s2025_s21 = sphi %s2072_s21, %s2590_s21  }
   0x3   : > { %p27_p0 = scmp.ge.s32.totalorder %s26_s25, 3  ;;  %p1663_p1 = scmp.ge.s32.totalorder %s2033_s23, 1 }
   0x4   : > { %p205_p2 = scmp.lt.s32.totalorder %s2033_s23, 4  ;;  %p2097_p4 = scmp.eq.s32.totalorder %s1662_s24, 0 }
   0x5   : > { %s2593_s25 = smov (%p27_p0, %s26_s25), 0  ;;  %s218_s30 = sshll.u32 %s2581_s0, 4  ;;  %s219_s30 = int_to_ptr.vmem [resolvable:$true] %s218_s30 }
   0x6   : > { %p2093_p3 = pnand %p1663_p1, %p205_p2  ;;  %s1992_s7 = scalar_lea.vmem %s219_s30, 64 }
   0x7   : > { %p1993_p7 = scmp.ne.s32.totalorder %s219_s30, %s1992_s7  ;;  %p2000_p11 = scmp.lt.s32.totalorder %s219_s30, %s219_s30 }
   0x8   : > { %p1910_p5 = pneg %p2093_p3  ;;  %p2001_p12 = scmp.lt.s32.totalorder %s1992_s7, %s1992_s7 }
   0xa   : > { %p1911_p6 = pnand %p2097_p4, %p1910_p5  ;;  %p2002_p13 = por %p2001_p12, %p2000_p11 }
   0xc   : > { %p1994_p8 = pneg %p1911_p6 }
   0xe   : > { %p1995_p9 = pnand %p1994_p8, %p1993_p7 }
  0x10   : > { %p1996_p10 = pneg %p1995_p9 }
  0x12   : > { %p2003_p0 = pnand %p2002_p13, %p1996_p10 }
  0x14   : > { %2006 = shalt.err (!%p2003_p0)
}
  0x15   : > { %s2035_s8 = smov [#allocation3]   ;;  %273 = sbr.rel (%p2093_p3) target bundleno = 412 (0x19c), region = 44 }
  0x16   : > { %1913 = dma.vmem_to_smem (!%p1911_p6), %s219_s30, 64, %s2035_s8, [#allocation4]  }
  0x1c   : > { %2020 = dma.done.wait (%p2097_p4), [#allocation4], 64  }
  0x1d   : > { %2022 = vsyncadd (%p2097_p4), [#allocation4], 4294967232 }
  0x1e   : > { %279 = sfence }
  0x1f   : > { %p330_p1 = scmp.lt.s32.totalorder %s2025_s21, 2  ;;  %p1673_p2 = scmp.ne.s32.totalorder %s2025_s21, 0 }
  0x20   : > { %v360_v0 = vld [vmem:[%s2583_s2] sm:$0xff] (!%p1673_p2)  ;;  %v361_v2 = vld [vmem:[%s2583_s2 + $0x8] sm:$0xff] (!%p1673_p2)  ;;  %v362_v5 = vld [vmem:[%s2583_s2 + $0x10] sm:$0xff] (!%p1673_p2) }
  0x21   : > { %s331_s9 = scalar_select %p330_p1, %s2025_s21, 2 }
  0x22   : > { %359 = sbr.rel (%p1673_p2) target bundleno = 53 (0x35), region = 52  ;;  %v2133_v1 = vld [vmem:[%s2586_s5] ss:$0 sm:$0xff] (!%p1673_p2)  ;;  %v363_v6 = vld [vmem:[%s2583_s2 + $0x18] sm:$0xff] (!%p1673_p2)  ;;  %v365_v11 = vld [vmem:[%s2583_s2 + $0x28] sm:$0xff] (!%p1673_p2) }
  0x23   : > { %s1745_s10 = sshll.u32 %s331_s9, 7  ;;  %s1746_s11 = sshll.u32 %s331_s9, 8  ;;  %v399_v3 = vadd.f32 (!%p1673_p2), %v2133_v1, %v360_v0  ;;  %v400_v4 = vadd.f32 (!%p1673_p2), %v2133_v1, %v361_v2  ;;  %v364_v7 = vld [vmem:[%s2583_s2 + $0x20] sm:$0xff] (!%p1673_p2)  ;;  %v401_v8 = vadd.f32 (!%p1673_p2), %v2133_v1, %v362_v5  ;;  %v402_v9 = vadd.f32 (!%p1673_p2), %v2133_v1, %v363_v6  ;;  %v366_v12 = vld [vmem:[%s2583_s2 + $0x30] sm:$0xff] (!%p1673_p2)  ;;  %v367_v13 = vld [vmem:[%s2583_s2 + $0x38] sm:$0xff] (!%p1673_p2) }
  0x24   : > { %s2119_s14 = scalar_lea.vmem %s2584_s3, %s1745_s10  ;;  %s2124_s17 = scalar_lea.vmem %s2585_s4, %s1746_s11  ;;  %v403_v10 = vadd.f32 (!%p1673_p2), %v2133_v1, %v364_v7  ;;  %v404_v14 = vadd.f32 (!%p1673_p2), %v2133_v1, %v365_v11  ;;  %v405_v15 = vadd.f32 (!%p1673_p2), %v2133_v1, %v366_v12  ;;  %v406_v16 = vadd.f32 (!%p1673_p2), %v2133_v1, %v367_v13  ;;  %v368_v17 = vld [vmem:[%s2583_s2 + $0x40] sm:$0xff] (!%p1673_p2)  ;;  %v369_v18 = vld [vmem:[%s2583_s2 + $0x48] sm:$0xff] (!%p1673_p2)  ;;  %v370_v19 = vld [vmem:[%s2583_s2 + $0x50] sm:$0xff] (!%p1673_p2) }
  0x25   : > { %431 = vst [vmem:[#allocation2] sm:$0xff] (!%p1673_p2), %v399_v3  ;;  %432 = vst [vmem:[#allocation2 + $0x8] sm:$0xff] (!%p1673_p2), %v400_v4  ;;  %v407_v20 = vadd.f32 (!%p1673_p2), %v2133_v1, %v368_v17  ;;  %v408_v21 = vadd.f32 (!%p1673_p2), %v2133_v1, %v369_v18  ;;  %v409_v22 = vadd.f32 (!%p1673_p2), %v2133_v1, %v370_v19  ;;  %v371_v23 = vld [vmem:[%s2583_s2 + $0x58] sm:$0xff] (!%p1673_p2)  ;;  %v372_v24 = vld [vmem:[%s2583_s2 + $0x60] sm:$0xff] (!%p1673_p2) }
  0x26   : > { %433 = vst [vmem:[#allocation2 + $0x10] sm:$0xff] (!%p1673_p2), %v401_v8  ;;  %434 = vst [vmem:[#allocation2 + $0x18] sm:$0xff] (!%p1673_p2), %v402_v9  ;;  %v373_v25 = vld [vmem:[%s2583_s2 + $0x68] sm:$0xff] (!%p1673_p2)  ;;  %v410_v26 = vadd.f32 (!%p1673_p2), %v2133_v1, %v371_v23  ;;  %v411_v27 = vadd.f32 (!%p1673_p2), %v2133_v1, %v372_v24  ;;  %v374_v29 = vld [vmem:[%s2583_s2 + $0x70] sm:$0xff] (!%p1673_p2) }
  0x27   : > { %435 = vst [vmem:[#allocation2 + $0x20] sm:$0xff] (!%p1673_p2), %v403_v10  ;;  %436 = vst [vmem:[#allocation2 + $0x28] sm:$0xff] (!%p1673_p2), %v404_v14  ;;  %v412_v28 = vadd.f32 (!%p1673_p2), %v2133_v1, %v373_v25  ;;  %v375_v30 = vld [vmem:[%s2583_s2 + $0x78] sm:$0xff] (!%p1673_p2)  ;;  %v376_v31 = vld [vmem:[%s2583_s2 + $0x80] sm:$0xff] (!%p1673_p2)  ;;  %v413_v32 = vadd.f32 (!%p1673_p2), %v2133_v1, %v374_v29 }
  0x28   : > { %437 = vst [vmem:[#allocation2 + $0x30] sm:$0xff] (!%p1673_p2), %v405_v15  ;;  %438 = vst [vmem:[#allocation2 + $0x38] sm:$0xff] (!%p1673_p2), %v406_v16  ;;  %v414_v33 = vadd.f32 (!%p1673_p2), %v2133_v1, %v375_v30  ;;  %v415_v34 = vadd.f32 (!%p1673_p2), %v2133_v1, %v376_v31  ;;  %v377_v35 = vld [vmem:[%s2583_s2 + $0x88] sm:$0xff] (!%p1673_p2)  ;;  %v378_v36 = vld [vmem:[%s2583_s2 + $0x90] sm:$0xff] (!%p1673_p2) }
  0x29   : > { %439 = vst [vmem:[#allocation2 + $0x40] sm:$0xff] %v407_v20  ;;  %440 = vst [vmem:[#allocation2 + $0x48] sm:$0xff] %v408_v21  ;;  %v379_v37 = vld [vmem:[%s2583_s2 + $0x98] sm:$0xff]  ;;  %v416_v38 = vadd.f32 %v2133_v1, %v377_v35  ;;  %v417_v39 = vadd.f32 %v2133_v1, %v378_v36  ;;  %v380_v41 = vld [vmem:[%s2583_s2 + $0xa0] sm:$0xff] }
  0x2a   : > { %441 = vst [vmem:[#allocation2 + $0x50] sm:$0xff] %v409_v22  ;;  %442 = vst [vmem:[#allocation2 + $0x58] sm:$0xff] %v410_v26  ;;  %v418_v40 = vadd.f32 %v2133_v1, %v379_v37  ;;  %v381_v42 = vld [vmem:[%s2583_s2 + $0xa8] sm:$0xff]  ;;  %v382_v43 = vld [vmem:[%s2583_s2 + $0xb0] sm:$0xff]  ;;  %v419_v44 = vadd.f32 %v2133_v1, %v380_v41 }
  0x2b   : > { %443 = vst [vmem:[#allocation2 + $0x60] sm:$0xff] %v411_v27  ;;  %444 = vst [vmem:[#allocation2 + $0x68] sm:$0xff] %v412_v28  ;;  %v420_v45 = vadd.f32 %v2133_v1, %v381_v42  ;;  %v421_v46 = vadd.f32 %v2133_v1, %v382_v43  ;;  %v383_v47 = vld [vmem:[%s2583_s2 + $0xb8] sm:$0xff]  ;;  %v384_v48 = vld [vmem:[%s2583_s2 + $0xc0] sm:$0xff] }
  0x2c   : > { %445 = vst [vmem:[#allocation2 + $0x70] sm:$0xff] %v413_v32  ;;  %446 = vst [vmem:[#allocation2 + $0x78] sm:$0xff] %v414_v33  ;;  %v385_v49 = vld [vmem:[%s2583_s2 + $0xc8] sm:$0xff]  ;;  %v422_v50 = vadd.f32 %v2133_v1, %v383_v47  ;;  %v423_v51 = vadd.f32 %v2133_v1, %v384_v48  ;;  %v386_v53 = vld [vmem:[%s2583_s2 + $0xd0] sm:$0xff] }
  0x2d   : > { %447 = vst [vmem:[#allocation2 + $0x80] sm:$0xff] %v415_v34  ;;  %448 = vst [vmem:[#allocation2 + $0x88] sm:$0xff] %v416_v38  ;;  %v424_v52 = vadd.f32 %v2133_v1, %v385_v49  ;;  %v387_v54 = vld [vmem:[%s2583_s2 + $0xd8] sm:$0xff]  ;;  %v388_v55 = vld [vmem:[%s2583_s2 + $0xe0] sm:$0xff]  ;;  %v425_v56 = vadd.f32 %v2133_v1, %v386_v53 }
  0x2e   : > { %449 = vst [vmem:[#allocation2 + $0x90] sm:$0xff] %v417_v39  ;;  %450 = vst [vmem:[#allocation2 + $0x98] sm:$0xff] %v418_v40  ;;  %v426_v57 = vadd.f32 %v2133_v1, %v387_v54  ;;  %v427_v58 = vadd.f32 %v2133_v1, %v388_v55  ;;  %v389_v59 = vld [vmem:[%s2583_s2 + $0xe8] sm:$0xff]  ;;  %v390_v60 = vld [vmem:[%s2583_s2 + $0xf0] sm:$0xff] }
  0x2f   : > { %451 = vst [vmem:[#allocation2 + $0xa0] sm:$0xff] %v419_v44  ;;  %452 = vst [vmem:[#allocation2 + $0xa8] sm:$0xff] %v420_v45  ;;  %v391_v61 = vld [vmem:[%s2583_s2 + $0xf8] sm:$0xff]  ;;  %v428_v62 = vadd.f32 %v2133_v1, %v389_v59  ;;  %v429_v63 = vadd.f32 %v2133_v1, %v390_v60 }
  0x30   : > { %453 = vst [vmem:[#allocation2 + $0xb0] sm:$0xff] %v421_v46  ;;  %454 = vst [vmem:[#allocation2 + $0xb8] sm:$0xff] %v422_v50  ;;  %v430_v0 = vadd.f32 %v2133_v1, %v391_v61 }
  0x31   : > { %455 = vst [vmem:[#allocation2 + $0xc0] sm:$0xff] %v423_v51  ;;  %456 = vst [vmem:[#allocation2 + $0xc8] sm:$0xff] %v424_v52 }
  0x32   : > { %457 = vst [vmem:[#allocation2 + $0xd0] sm:$0xff] %v425_v56  ;;  %458 = vst [vmem:[#allocation2 + $0xd8] sm:$0xff] %v426_v57 }
  0x33   : > { %459 = vst [vmem:[#allocation2 + $0xe0] sm:$0xff] %v427_v58  ;;  %460 = vst [vmem:[#allocation2 + $0xe8] sm:$0xff] %v428_v62 }
  0x34   : > { %461 = vst [vmem:[#allocation2 + $0xf0] sm:$0xff] %v429_v63  ;;  %462 = vst [vmem:[#allocation2 + $0xf8] sm:$0xff] %v430_v0 }
  0x35 PF: > { %v1944_v2 = vld [vmem:[%s2582_s1 + $0x4] ss:$8 sps:$4 sm:$0xff]   ;;  %v1946_v3 = vld [vmem:[%s2582_s1] ss:$8 sps:$4 sm:$0xff]   ;;  %v2036_v4 = vmov 0   ;;  %v1032_v21 = vld [vmem:[%s2124_s17 + $0x10] sm:$0xff] }
  0x36   : > { %1943 = vset.pattern.permute.xlu1 %v2036_v4  ;;  %1942 = vset.pattern.permute.xlu0 %v2036_v4  ;;  %v1947_v1 = vld [vmem:[%s2582_s1 + $0x14] ss:$8 sps:$4 sm:$0xff]   ;;  %v1949_v5 = vld [vmem:[%s2582_s1 + $0x10] ss:$8 sps:$4 sm:$0xff]   ;;  %v1950_v6 = vld [vmem:[%s2582_s1 + $0x24] ss:$8 sps:$4 sm:$0xff]  }
  0x37   : > { %703 = vmatprep.subr.bf16.mxu0 %v1944_v2  ;;  %1874 = vmatprep.subr.bf16.mxu1 %v1944_v2  ;;  %v1952_v7 = vld [vmem:[%s2582_s1 + $0x20] ss:$8 sps:$4 sm:$0xff]   ;;  %v1953_v8 = vld [vmem:[%s2582_s1 + $0x34] ss:$8 sps:$4 sm:$0xff]   ;;  %v1955_v9 = vld [vmem:[%s2582_s1 + $0x30] ss:$8 sps:$4 sm:$0xff]  }
  0x38   : > { %704 = vmatpush1.bf16.msra.mxu0 %v1946_v3  ;;  %1890 = vmatpush1.bf16.msra.mxu1 %v1946_v3  ;;  %v1956_v10 = vld [vmem:[%s2582_s1 + $0x44] ss:$8 sps:$4 sm:$0xff]   ;;  %v1958_v11 = vld [vmem:[%s2582_s1 + $0x40] ss:$8 sps:$4 sm:$0xff]   ;;  %v1959_v12 = vld [vmem:[%s2582_s1 + $0x54] ss:$8 sps:$4 sm:$0xff]  }
  0x39   : > { %705 = vmatprep.subr.bf16.mxu0 %v1947_v1  ;;  %1875 = vmatprep.subr.bf16.mxu1 %v1947_v1  ;;  %v1961_v13 = vld [vmem:[%s2582_s1 + $0x50] ss:$8 sps:$4 sm:$0xff]   ;;  %v1962_v14 = vld [vmem:[%s2582_s1 + $0x64] ss:$8 sps:$4 sm:$0xff]   ;;  %v1964_v19 = vld [vmem:[%s2582_s1 + $0x60] ss:$8 sps:$4 sm:$0xff]  }
  0x3a   : > { %v2300_v15 = vld [vmem:[%s2119_s14 + $0x8] sm:$0xff]  ;;  %v1965_v20 = vld [vmem:[%s2582_s1 + $0x74] ss:$8 sps:$4 sm:$0xff]   ;;  %v1030_v22 = vld [vmem:[%s2124_s17] sm:$0xff]  ;;  %1074 = vperm.xlu1 %1943, %v1032_v21   ;;  %p1708_p3 = scmp.ne.s32.totalorder %s2025_s21, 2 }
  0x3b   : > { %v2303_v16 = vld [vmem:[%s2119_s14 + $0x48] sm:$0xff]  ;;  %v480_v17 = vunpack.c.l.s8.bf16 %v2300_v15  ;;  %1064 = vperm.xlu0 %1942, %v1030_v22   ;;  %v1967_v23 = vld [vmem:[%s2582_s1 + $0x70] ss:$8 sps:$4 sm:$0xff]   ;;  %v1034_v29 = vld [vmem:[%s2124_s17 + $0x20] sm:$0xff]  ;;  %v482_v62 = vunpack.c.h.s8.bf16 %v2300_v15 }
  0x3c   : > { %706 = vmatpush1.bf16.msra.mxu0 %v1949_v5  ;;  %1891 = vmatpush1.bf16.msra.mxu1 %v1949_v5  ;;  %v496_v18 = vunpack.c.l.s8.bf16 %v2303_v16  ;;  %v1033_v24 = vld [vmem:[%s2124_s17 + $0x18] sm:$0xff]  ;;  %v1031_v25 = vld [vmem:[%s2124_s17 + $0x8] sm:$0xff]  ;;  %v1036_v33 = vld [vmem:[%s2124_s17 + $0x30] sm:$0xff]  ;;  %v498_v63 = vunpack.c.h.s8.bf16 %v2303_v16 }
  0x3d   : > { %707 = vmatprep.subr.bf16.mxu0 %v1950_v6  ;;  %1876 = vmatprep.subr.bf16.mxu1 %v1950_v6  ;;  %v1968_v26 = vld [vmem:[%s2582_s1 + $0x84] ss:$8 sps:$4 sm:$0xff]   ;;  %v1970_v27 = vld [vmem:[%s2582_s1 + $0x80] ss:$8 sps:$4 sm:$0xff]   ;;  %v1971_v30 = vld [vmem:[%s2582_s1 + $0x94] ss:$8 sps:$4 sm:$0xff]  }
  0x3e   : > { %735 = vmatprep.mubr.bf16.mxu0 %v480_v17  ;;  %815 = vmatprep.mubr.bf16.mxu1 %v496_v18  ;;  %v1035_v28 = vld [vmem:[%s2124_s17 + $0x28] sm:$0xff]  ;;  %v1973_v31 = vld [vmem:[%s2582_s1 + $0x90] ss:$8 sps:$4 sm:$0xff]   ;;  %v1038_v37 = vld [vmem:[%s2124_s17 + $0x40] sm:$0xff] }
  0x3f   : > { %1079 = vperm.xlu1 %1943, %v1033_v24   ;;  %1069 = vperm.xlu0 %1942, %v1031_v25   ;;  %v1037_v32 = vld [vmem:[%s2124_s17 + $0x38] sm:$0xff]  ;;  %v1974_v34 = vld [vmem:[%s2582_s1 + $0xa4] ss:$8 sps:$4 sm:$0xff]   ;;  %v1976_v35 = vld [vmem:[%s2582_s1 + $0xa0] ss:$8 sps:$4 sm:$0xff]  }
  0x40   : > { %708 = vmatpush1.bf16.msra.mxu0 %v1952_v7  ;;  %1892 = vmatpush1.bf16.msra.mxu1 %v1952_v7  ;;  %v1039_v36 = vld [vmem:[%s2124_s17 + $0x48] sm:$0xff]  ;;  %v1977_v38 = vld [vmem:[%s2582_s1 + $0xb4] ss:$8 sps:$4 sm:$0xff]   ;;  %v1979_v39 = vld [vmem:[%s2582_s1 + $0xb0] ss:$8 sps:$4 sm:$0xff]  }
  0x41   : > { %709 = vmatprep.subr.bf16.mxu0 %v1953_v8  ;;  %1877 = vmatprep.subr.bf16.mxu1 %v1953_v8  ;;  %v1041_v40 = vld [vmem:[%s2124_s17 + $0x58] sm:$0xff]  ;;  %v1040_v41 = vld [vmem:[%s2124_s17 + $0x50] sm:$0xff]  ;;  %v1980_v42 = vld [vmem:[%s2582_s1 + $0xc4] ss:$8 sps:$4 sm:$0xff]  }
  0x42   : > { %v1982_v43 = vld [vmem:[%s2582_s1 + $0xc0] ss:$8 sps:$4 sm:$0xff]   ;;  %v1983_v46 = vld [vmem:[%s2582_s1 + $0xd4] ss:$8 sps:$4 sm:$0xff]   ;;  %v1985_v47 = vld [vmem:[%s2582_s1 + $0xd0] ss:$8 sps:$4 sm:$0xff]  }
  0x43   : > { %1089 = vperm.xlu1 %1943, %v1035_v28   ;;  %1084 = vperm.xlu0 %1942, %v1034_v29   ;;  %v1043_v44 = vld [vmem:[%s2124_s17 + $0x68] sm:$0xff]  ;;  %v1042_v45 = vld [vmem:[%s2124_s17 + $0x60] sm:$0xff]  ;;  %v1045_v48 = vld [vmem:[%s2124_s17 + $0x78] sm:$0xff] }
  0x44   : > { %710 = vmatpush1.bf16.msra.mxu0 %v1955_v9  ;;  %1893 = vmatpush1.bf16.msra.mxu1 %v1955_v9  ;;  %v1044_v49 = vld [vmem:[%s2124_s17 + $0x70] sm:$0xff]  ;;  %v1986_v50 = vld [vmem:[%s2582_s1 + $0xe4] ss:$8 sps:$4 sm:$0xff]   ;;  %v1988_v51 = vld [vmem:[%s2582_s1 + $0xe0] ss:$8 sps:$4 sm:$0xff]  }
  0x45   : > { %711 = vmatprep.subr.bf16.mxu0 %v1956_v10  ;;  %1878 = vmatprep.subr.bf16.mxu1 %v1956_v10  ;;  %v1047_v52 = vld [vmem:[%s2124_s17 + $0x88] sm:$0xff]  ;;  %v1046_v53 = vld [vmem:[%s2124_s17 + $0x80] sm:$0xff]  ;;  %v1989_v54 = vld [vmem:[%s2582_s1 + $0xf4] ss:$8 sps:$4 sm:$0xff]  }
  0x46   : > { %v1991_v55 = vld [vmem:[%s2582_s1 + $0xf0] ss:$8 sps:$4 sm:$0xff]   ;;  %v463_v56 = vld [vmem:[%s2119_s14] sm:$0xff]  ;;  %v1051_v0 = vld [vmem:[%s2124_s17 + $0xa8] sm:$0xff] }
  0x47   : > { %1099 = vperm.xlu1 %1943, %v1037_v32   ;;  %1094 = vperm.xlu0 %1942, %v1036_v33   ;;  %v471_v57 = vld [vmem:[%s2119_s14 + $0x40] sm:$0xff]  ;;  %v1049_v58 = vld [vmem:[%s2124_s17 + $0x98] sm:$0xff]  ;;  %v1048_v59 = vld [vmem:[%s2124_s17 + $0x90] sm:$0xff]  ;;  %v479_v60 = vunpack.c.l.s8.bf16 %v463_v56  ;;  %v481_v6 = vunpack.c.h.s8.bf16 %v463_v56 }
  0x48   : > { %712 = vmatpush1.bf16.msra.mxu0 %v1958_v11  ;;  %1894 = vmatpush1.bf16.msra.mxu1 %v1958_v11  ;;  %v495_v61 = vunpack.c.l.s8.bf16 %v471_v57  ;;  %v1050_v2 = vld [vmem:[%s2124_s17 + $0xa0] sm:$0xff]  ;;  %v466_v3 = vld [vmem:[%s2119_s14 + $0x18] sm:$0xff]  ;;  %v1052_v5 = vld [vmem:[%s2124_s17 + $0xb0] sm:$0xff]  ;;  %v497_v7 = vunpack.c.h.s8.bf16 %v471_v57 }
  0x49   : > { %713 = vmatprep.subr.bf16.mxu0 %v1959_v12  ;;  %1879 = vmatprep.subr.bf16.mxu1 %v1959_v12  ;;  %v474_v4 = vld [vmem:[%s2119_s14 + $0x58] sm:$0xff]  ;;  %v484_v8 = vunpack.c.l.s8.bf16 %v466_v3  ;;  %v1055_v10 = vld [vmem:[%s2124_s17 + $0xc8] sm:$0xff]  ;;  %v1054_v11 = vld [vmem:[%s2124_s17 + $0xc0] sm:$0xff]  ;;  %v486_v18 = vunpack.c.h.s8.bf16 %v466_v3 }
  0x4a   : > { %v1053_v1 = vld [vmem:[%s2124_s17 + $0xb8] sm:$0xff]  ;;  %v500_v9 = vunpack.c.l.s8.bf16 %v474_v4  ;;  %v465_v12 = vld [vmem:[%s2119_s14 + $0x10] sm:$0xff]  ;;  %v1058_v21 = vld [vmem:[%s2124_s17 + $0xe0] sm:$0xff] }
  0x4b   : > { %1109 = vperm.xlu1 %1943, %v1039_v36   ;;  %1104 = vperm.xlu0 %1942, %v1038_v37   ;;  %v1056_v15 = vld [vmem:[%s2124_s17 + $0xd0] sm:$0xff]  ;;  %v483_v16 = vunpack.c.l.s8.bf16 %v465_v12  ;;  %v468_v22 = vld [vmem:[%s2119_s14 + $0x28] sm:$0xff]  ;;  %v1061_v24 = vld [vmem:[%s2124_s17 + $0xf8] sm:$0xff] }
  0x4c   : > { %714 = vmatpush1.bf16.msra.mxu0 %v1961_v13  ;;  %1895 = vmatpush1.bf16.msra.mxu1 %v1961_v13  ;;  %v473_v13 = vld [vmem:[%s2119_s14 + $0x50] sm:$0xff]  ;;  %v488_v28 = vunpack.c.l.s8.bf16 %v468_v22  ;;  %v470_v36 = vld [vmem:[%s2119_s14 + $0x38] sm:$0xff] }
  0x4d   : > { %715 = vmatprep.subr.bf16.mxu0 %v1962_v14  ;;  %1880 = vmatprep.subr.bf16.mxu1 %v1962_v14  ;;  %v1057_v14 = vld [vmem:[%s2124_s17 + $0xd8] sm:$0xff]  ;;  %v499_v17 = vunpack.c.l.s8.bf16 %v473_v13  ;;  %v1060_v25 = vld [vmem:[%s2124_s17 + $0xf0] sm:$0xff] }
  0x4e   : > { %v478_v37 = vld [vmem:[%s2119_s14 + $0x78] sm:$0xff] }
  0x4f   : > { %1119 = vperm.xlu1 %1943, %v1041_v40   ;;  %1114 = vperm.xlu0 %1942, %v1040_v41   ;;  %v492_v40 = vunpack.c.l.s8.bf16 %v470_v36  ;;  %v508_v41 = vunpack.c.l.s8.bf16 %v478_v37 }
  0x50   : > { %716 = vmatpush1.bf16.msra.mxu0 %v1964_v19  ;;  %1896 = vmatpush1.bf16.msra.mxu1 %v1964_v19  ;;  %v502_v19 = vunpack.c.h.s8.bf16 %v474_v4 }
  0x51   : > { %717 = vmatprep.subr.bf16.mxu0 %v1965_v20  ;;  %1881 = vmatprep.subr.bf16.mxu1 %v1965_v20  ;;  %v1059_v20 = vld [vmem:[%s2124_s17 + $0xe8] sm:$0xff] }
  0x53   : > { %1129 = vperm.xlu1 %1943, %v1043_v44   ;;  %1124 = vperm.xlu0 %1942, %v1042_v45  }
  0x54   : > { %718 = vmatpush1.bf16.msra.mxu0 %v1967_v23  ;;  %1897 = vmatpush1.bf16.msra.mxu1 %v1967_v23  ;;  %v476_v23 = vld [vmem:[%s2119_s14 + $0x68] sm:$0xff] }
  0x55   : > { %719 = vmatprep.subr.bf16.mxu0 %v1968_v26  ;;  %1882 = vmatprep.subr.bf16.mxu1 %v1968_v26  ;;  %v485_v26 = vunpack.c.h.s8.bf16 %v465_v12  ;;  %v504_v29 = vunpack.c.l.s8.bf16 %v476_v23 }
  0x57   : > { %1139 = vperm.xlu1 %1943, %v1045_v48   ;;  %1134 = vperm.xlu0 %1942, %v1044_v49  }
  0x58   : > { %720 = vmatpush1.bf16.msra.mxu0 %v1970_v27  ;;  %1898 = vmatpush1.bf16.msra.mxu1 %v1970_v27  ;;  %v501_v27 = vunpack.c.h.s8.bf16 %v473_v13 }
  0x59   : > { %721 = vmatprep.subr.bf16.mxu0 %v1971_v30  ;;  %1883 = vmatprep.subr.bf16.mxu1 %v1971_v30  ;;  %v467_v30 = vld [vmem:[%s2119_s14 + $0x20] sm:$0xff] }
  0x5a   : > { %v487_v32 = vunpack.c.l.s8.bf16 %v467_v30 }
  0x5b   : > { %1149 = vperm.xlu1 %1943, %v1047_v52   ;;  %1144 = vperm.xlu0 %1942, %v1046_v53  }
  0x5c   : > { %722 = vmatpush1.bf16.msra.mxu0 %v1973_v31  ;;  %1899 = vmatpush1.bf16.msra.mxu1 %v1973_v31  ;;  %v475_v31 = vld [vmem:[%s2119_s14 + $0x60] sm:$0xff] }
  0x5d   : > { %723 = vmatprep.subr.bf16.mxu0 %v1974_v34  ;;  %1884 = vmatprep.subr.bf16.mxu1 %v1974_v34  ;;  %v503_v33 = vunpack.c.l.s8.bf16 %v475_v31  ;;  %v490_v34 = vunpack.c.h.s8.bf16 %v468_v22 }
  0x5f   : > { %1159 = vperm.xlu1 %1943, %v1049_v58   ;;  %1154 = vperm.xlu0 %1942, %v1048_v59  }
  0x60   : > { %724 = vmatpush1.bf16.msra.mxu0 %v1976_v35  ;;  %1900 = vmatpush1.bf16.msra.mxu1 %v1976_v35  ;;  %v506_v35 = vunpack.c.h.s8.bf16 %v476_v23  ;;  %v998_v23 = vld [vmem:[#allocation2] sm:$0xff] }
  0x61   : > { %725 = vmatprep.subr.bf16.mxu0 %v1977_v38  ;;  %1885 = vmatprep.subr.bf16.mxu1 %v1977_v38  ;;  %v489_v38 = vunpack.c.h.s8.bf16 %v467_v30  ;;  %v999_v30 = vld [vmem:[#allocation2 + $0x8] sm:$0xff] }
  0x63   : > { %1169 = vperm.xlu1 %1943, %v1051_v0   ;;  %1164 = vperm.xlu0 %1942, %v1050_v2  }
  0x64   : > { %726 = vmatpush1.bf16.msra.mxu0 %v1979_v39  ;;  %1901 = vmatpush1.bf16.msra.mxu1 %v1979_v39  ;;  %v505_v39 = vunpack.c.h.s8.bf16 %v475_v31  ;;  %v1015_v31 = vld [vmem:[#allocation2 + $0x88] sm:$0xff] }
  0x65   : > { %727 = vmatprep.subr.bf16.mxu0 %v1980_v42  ;;  %1886 = vmatprep.subr.bf16.mxu1 %v1980_v42  ;;  %v469_v42 = vld [vmem:[%s2119_s14 + $0x30] sm:$0xff] }
  0x66   : > { %v491_v44 = vunpack.c.l.s8.bf16 %v469_v42  ;;  %v493_v48 = vunpack.c.h.s8.bf16 %v469_v42 }
  0x67   : > { %1179 = vperm.xlu1 %1943, %v1053_v1   ;;  %1174 = vperm.xlu0 %1942, %v1052_v5  }
  0x68   : > { %728 = vmatpush1.bf16.msra.mxu0 %v1982_v43  ;;  %1902 = vmatpush1.bf16.msra.mxu1 %v1982_v43  ;;  %v477_v43 = vld [vmem:[%s2119_s14 + $0x70] sm:$0xff]  ;;  %s1707_s14 = sshll.u32 %s2025_s21, 7 }
  0x69   : > { %729 = vmatprep.subr.bf16.mxu0 %v1983_v46  ;;  %1887 = vmatprep.subr.bf16.mxu1 %v1983_v46  ;;  %v507_v45 = vunpack.c.l.s8.bf16 %v477_v43  ;;  %v494_v46 = vunpack.c.h.s8.bf16 %v470_v36  ;;  %v509_v49 = vunpack.c.h.s8.bf16 %v477_v43  ;;  %s931_s17 = sadd.s32 1, %s1707_s14  ;;  %s897_s26 = sld [smem:[#allocation3 + %s1707_s14]] }
  0x6a   : > { %s932_s27 = sld [smem:[#allocation3 + %s931_s17]] }
  0x6b   : > { %1189 = vperm.xlu1 %1943, %v1055_v10   ;;  %1184 = vperm.xlu0 %1942, %v1054_v11  }
  0x6c   : > { %730 = vmatpush1.bf16.msra.mxu0 %v1985_v47  ;;  %1903 = vmatpush1.bf16.msra.mxu1 %v1985_v47  ;;  %v510_v47 = vunpack.c.h.s8.bf16 %v478_v37 }
  0x6d   : > { %731 = vmatprep.subr.bf16.mxu0 %v1986_v50  ;;  %1888 = vmatprep.subr.bf16.mxu1 %v1986_v50 }
  0x6f   : > { %1199 = vperm.xlu1 %1943, %v1057_v14   ;;  %1194 = vperm.xlu0 %1942, %v1056_v15   ;;  %v2437_v0 = vstv %s897_s26 }
  0x70   : > { %732 = vmatpush1.bf16.msra.mxu0 %v1988_v51  ;;  %1904 = vmatpush1.bf16.msra.mxu1 %v1988_v51  ;;  %v2443_v4 = vstv %s932_s27 }
  0x71   : > { %733 = vmatprep.subr.bf16.mxu0 %v1989_v54  ;;  %1889 = vmatprep.subr.bf16.mxu1 %v1989_v54 }
  0x73   : > { %1209 = vperm.xlu1 %1943, %v1059_v20   ;;  %1204 = vperm.xlu0 %1942, %v1058_v21  }
  0x74   : > { %734 = vmatpush1.bf16.msra.mxu0 %v1991_v55  ;;  %1905 = vmatpush1.bf16.msra.mxu1 %v1991_v55 }
  0x77   : > { %736 = vmatmul.mubr.bf16.vlgmr.msra.gmra.mrb[0].mxu0 %v479_v60  ;;  %816 = vmatmul.mubr.bf16.vlgmr.msra.gmra.mrb[0].mxu1 %v495_v61 }
  0x78   : > { %745 = vmatprep.mubr.bf16.mxu0 %v482_v62  ;;  %825 = vmatprep.mubr.bf16.mxu1 %v498_v63 }
  0x79   : > { %1219 = vperm.xlu1 %1943, %v1061_v24   ;;  %1214 = vperm.xlu0 %1942, %v1060_v25   ;;  %v1014_v24 = vld [vmem:[#allocation2 + $0x80] sm:$0xff] }
  0x7f   : > { %746 = vmatmul.mubr.bf16.gmra.mrb[4].mxu0 %v481_v6  ;;  %826 = vmatmul.mubr.bf16.gmra.mrb[4].mxu1 %v497_v7 }
  0x80   : > { %755 = vmatprep.mubr.bf16.mxu0 %v484_v8  ;;  %835 = vmatprep.mubr.bf16.mxu1 %v500_v9 }
  0x87   : > { %756 = vmatmul.mubr.bf16.gmra.mrb[8].mxu0 %v483_v16  ;;  %836 = vmatmul.mubr.bf16.gmra.mrb[8].mxu1 %v499_v17 }
  0x88   : > { %765 = vmatprep.mubr.bf16.mxu0 %v486_v18  ;;  %845 = vmatprep.mubr.bf16.mxu1 %v502_v19 }
  0x8f   : > { %766 = vmatmul.mubr.bf16.gmra.mrb[12].mxu0 %v485_v26  ;;  %846 = vmatmul.mubr.bf16.gmra.mrb[12].mxu1 %v501_v27 }
  0x90   : > { %775 = vmatprep.mubr.bf16.mxu0 %v488_v28  ;;  %855 = vmatprep.mubr.bf16.mxu1 %v504_v29 }
  0x97   : > { %776 = vmatmul.mubr.bf16.gmra.mrb[16].mxu0 %v487_v32  ;;  %856 = vmatmul.mubr.bf16.gmra.mrb[16].mxu1 %v503_v33 }
  0x98   : > { %785 = vmatprep.mubr.bf16.mxu0 %v490_v34  ;;  %865 = vmatprep.mubr.bf16.mxu1 %v506_v35 }
  0x9f   : > { %786 = vmatmul.mubr.bf16.gmra.mrb[20].mxu0 %v489_v38  ;;  %866 = vmatmul.mubr.bf16.gmra.mrb[20].mxu1 %v505_v39 }
  0xa0   : > { %795 = vmatprep.mubr.bf16.mxu0 %v492_v40  ;;  %875 = vmatprep.mubr.bf16.mxu1 %v508_v41 }
  0xa7   : > { %796 = vmatmul.mubr.bf16.gmra.mrb[24].mxu0 %v491_v44  ;;  %876 = vmatmul.mubr.bf16.gmra.mrb[24].mxu1 %v507_v45 }
  0xa8   : > { %805 = vmatprep.mubr.bf16.mxu0 %v494_v46  ;;  %885 = vmatprep.mubr.bf16.mxu1 %v510_v47 }
  0xaf   : > { %806 = vmatmul.mubr.bf16.gmra.mrb[28].mxu0 %v493_v48  ;;  %886 = vmatmul.mubr.bf16.gmra.mrb[28].mxu1 %v509_v49 }
  0xb9   : > { %v2412_v50 = vpop.permute.xlu1 %1074 }
  0xba   : > { %v1065_v51 = vpop.permute.xlu0 %1064 }
  0xbe   : > { %v2414_v52 = vpop.permute.xlu1 %1079  ;;  %v1070_v53 = vpop.permute.xlu0 %1069 }
  0xc2   : > { %v2416_v54 = vpop.permute.xlu1 %1089  ;;  %v2418_v55 = vpop.permute.xlu0 %1084 }
  0xc6   : > { %v2420_v56 = vpop.permute.xlu1 %1099  ;;  %v2422_v57 = vpop.permute.xlu0 %1094 }
  0xca   : > { %v2424_v58 = vpop.permute.xlu1 %1109  ;;  %v2426_v59 = vpop.permute.xlu0 %1104 }
  0xce   : > { %v2429_v60 = vpop.permute.xlu1 %1119  ;;  %v2431_v61 = vpop.permute.xlu0 %1114 }
  0xd2   : > { %v2433_v62 = vpop.permute.xlu1 %1129  ;;  %v2435_v63 = vpop.permute.xlu0 %1124 }
  0xd6   : > { %v2439_v2 = vpop.permute.xlu1 %1139  ;;  %v2441_v3 = vpop.permute.xlu0 %1134 }
  0xda   : > { %v1145_v22 = vpop.permute.xlu0 %1144  ;;  %v1150_v29 = vpop.permute.xlu1 %1149 }
 0x14a   : > { %v737_v1 = vpop.f32.mrb[0].mxu0  ;;  %v817_v5 = vpop.f32.mrb[0].mxu1 }
 0x14b   : > { %v899_v6 = vmul.f32 %v2437_v0, %v737_v1  ;;  %v915_v7 = vmul.f32 %v2437_v0, %v817_v5  ;;  %v739_v8 = vpop.f32.mrb[1].mxu0  ;;  %v819_v9 = vpop.f32.mrb[1].mxu1 }
 0x14c   : > { %v934_v10 = vmul.f32 %v2443_v4, %v739_v8  ;;  %v950_v11 = vmul.f32 %v2443_v4, %v819_v9  ;;  %v741_v12 = vpop.f32.mrb[2].mxu0  ;;  %v821_v13 = vpop.f32.mrb[2].mxu1  ;;  %v1000_v9 = vld [vmem:[#allocation2 + $0x10] sm:$0xff] }
 0x14d   : > { %v900_v14 = vmul.f32 %v2437_v0, %v741_v12  ;;  %v916_v15 = vmul.f32 %v2437_v0, %v821_v13  ;;  %v743_v16 = vpop.f32.mrb[3].mxu0  ;;  %v823_v17 = vpop.f32.mrb[3].mxu1 }
 0x14e   : > { %v966_v18 = vadd.f32 %v934_v10, %v899_v6  ;;  %v982_v19 = vadd.f32 %v950_v11, %v915_v7  ;;  %v935_v20 = vmul.f32 %v2443_v4, %v743_v16  ;;  %v951_v21 = vmul.f32 %v2443_v4, %v823_v17  ;;  %v1155_v8 = vpop.permute.xlu0 %1154  ;;  %v1016_v10 = vld [vmem:[#allocation2 + $0x90] sm:$0xff]  ;;  %v1001_v16 = vld [vmem:[#allocation2 + $0x18] sm:$0xff] }
 0x14f   : > { %v1017_v17 = vld [vmem:[#allocation2 + $0x98] sm:$0xff] }
 0x150   : > { %v1222_v25 = vmul.f32 %v1065_v51, %v966_v18  ;;  %v1238_v26 = vmul.f32 %v1145_v22, %v982_v19  ;;  %v967_v27 = vadd.f32 %v935_v20, %v900_v14  ;;  %v983_v28 = vadd.f32 %v951_v21, %v916_v15  ;;  %v1160_v15 = vpop.permute.xlu1 %1159 }
 0x152   : > { %v1254_v32 = vadd.f32 %v1222_v25, %v998_v23  ;;  %v1270_v33 = vadd.f32 %v1238_v26, %v1014_v24  ;;  %v1223_v34 = vmul.f32 %v1070_v53, %v967_v27  ;;  %v1239_v35 = vmul.f32 %v1150_v29, %v983_v28  ;;  %v747_v36 = vpop.f32.mrb[4].mxu0  ;;  %v827_v37 = vpop.f32.mrb[4].mxu1 }
 0x153   : > { %v901_v38 = vmul.f32 %v2437_v0, %v747_v36  ;;  %v917_v39 = vmul.f32 %v2437_v0, %v827_v37  ;;  %v749_v40 = vpop.f32.mrb[5].mxu0  ;;  %v829_v41 = vpop.f32.mrb[5].mxu1 }
 0x154   : > { %1286 = vst [vmem:[#allocation2] sm:$0xff] %v1254_v32  ;;  %1302 = vst [vmem:[#allocation2 + $0x80] sm:$0xff] %v1270_v33  ;;  %v1255_v42 = vadd.f32 %v1223_v34, %v999_v30  ;;  %v1271_v43 = vadd.f32 %v1239_v35, %v1015_v31  ;;  %v936_v44 = vmul.f32 %v2443_v4, %v749_v40  ;;  %v751_v46 = vpop.f32.mrb[6].mxu0  ;;  %v831_v47 = vpop.f32.mrb[6].mxu1 }
 0x155   : > { %v952_v45 = vmul.f32 %v2443_v4, %v829_v41  ;;  %v902_v48 = vmul.f32 %v2437_v0, %v751_v46  ;;  %v918_v49 = vmul.f32 %v2437_v0, %v831_v47  ;;  %v753_v51 = vpop.f32.mrb[7].mxu0  ;;  %v833_v53 = vpop.f32.mrb[7].mxu1  ;;  %v1002_v41 = vld [vmem:[#allocation2 + $0x20] sm:$0xff] }
 0x156   : > { %1287 = vst [vmem:[#allocation2 + $0x8] sm:$0xff] %v1255_v42  ;;  %1303 = vst [vmem:[#allocation2 + $0x88] sm:$0xff] %v1271_v43  ;;  %v968_v1 = vadd.f32 %v936_v44, %v901_v38  ;;  %v937_v6 = vmul.f32 %v2443_v4, %v753_v51  ;;  %v953_v7 = vmul.f32 %v2443_v4, %v833_v53  ;;  %v1165_v40 = vpop.permute.xlu0 %1164  ;;  %v1018_v42 = vld [vmem:[#allocation2 + $0xa0] sm:$0xff]  ;;  %v1170_v47 = vpop.permute.xlu1 %1169 }
 0x157   : > { %v984_v5 = vadd.f32 %v952_v45, %v917_v39 }
 0x158   : > { %v1224_v11 = vmul.f32 %v2412_v50, %v968_v1  ;;  %v969_v13 = vadd.f32 %v937_v6, %v902_v48  ;;  %v985_v14 = vadd.f32 %v953_v7, %v918_v49  ;;  %v1003_v48 = vld [vmem:[#allocation2 + $0x28] sm:$0xff] }
 0x159   : > { %v1240_v12 = vmul.f32 %v1155_v8, %v984_v5  ;;  %v1019_v49 = vld [vmem:[#allocation2 + $0xa8] sm:$0xff] }
 0x15a   : > { %v1256_v18 = vadd.f32 %v1224_v11, %v1000_v9  ;;  %v1225_v20 = vmul.f32 %v2414_v52, %v969_v13  ;;  %v1241_v21 = vmul.f32 %v1160_v15, %v985_v14  ;;  %v757_v22 = vpop.f32.mrb[8].mxu0  ;;  %v837_v23 = vpop.f32.mrb[8].mxu1 }
 0x15b   : > { %v1272_v19 = vadd.f32 %v1240_v12, %v1016_v10  ;;  %v903_v24 = vmul.f32 %v2437_v0, %v757_v22  ;;  %v919_v25 = vmul.f32 %v2437_v0, %v837_v23  ;;  %v759_v26 = vpop.f32.mrb[9].mxu0  ;;  %v839_v27 = vpop.f32.mrb[9].mxu1 }
 0x15c   : > { %1288 = vst [vmem:[#allocation2 + $0x10] sm:$0xff] %v1256_v18  ;;  %v1257_v50 = vadd.f32 %v1225_v20, %v1001_v16  ;;  %v1273_v28 = vadd.f32 %v1241_v21, %v1017_v17  ;;  %v938_v29 = vmul.f32 %v2443_v4, %v759_v26  ;;  %v954_v30 = vmul.f32 %v2443_v4, %v839_v27  ;;  %v761_v31 = vpop.f32.mrb[10].mxu0  ;;  %v841_v32 = vpop.f32.mrb[10].mxu1  ;;  %v1020_v26 = vld [vmem:[#allocation2 + $0xb0] sm:$0xff] }
 0x15d   : > { %1304 = vst [vmem:[#allocation2 + $0x90] sm:$0xff] %v1272_v19  ;;  %v904_v52 = vmul.f32 %v2437_v0, %v761_v31  ;;  %v920_v33 = vmul.f32 %v2437_v0, %v841_v32  ;;  %v763_v34 = vpop.f32.mrb[11].mxu0  ;;  %v843_v35 = vpop.f32.mrb[11].mxu1  ;;  %v1005_v31 = vld [vmem:[#allocation2 + $0x38] sm:$0xff] }
 0x15e   : > { %1289 = vst [vmem:[#allocation2 + $0x18] sm:$0xff] %v1257_v50  ;;  %1305 = vst [vmem:[#allocation2 + $0x98] sm:$0xff] %v1273_v28  ;;  %v970_v36 = vadd.f32 %v938_v29, %v903_v24  ;;  %v986_v37 = vadd.f32 %v954_v30, %v919_v25  ;;  %v939_v38 = vmul.f32 %v2443_v4, %v763_v34  ;;  %v1175_v24 = vpop.permute.xlu0 %1174  ;;  %v1004_v25 = vld [vmem:[#allocation2 + $0x30] sm:$0xff]  ;;  %v1180_v30 = vpop.permute.xlu1 %1179  ;;  %v1021_v32 = vld [vmem:[#allocation2 + $0xb8] sm:$0xff] }
 0x15f   : > { %v955_v39 = vmul.f32 %v2443_v4, %v843_v35 }
 0x160   : > { %v1226_v43 = vmul.f32 %v2418_v55, %v970_v36  ;;  %v1242_v44 = vmul.f32 %v1165_v40, %v986_v37  ;;  %v971_v45 = vadd.f32 %v939_v38, %v904_v52 }
 0x161   : > { %v987_v46 = vadd.f32 %v955_v39, %v920_v33 }
 0x162   : > { %v1258_v51 = vadd.f32 %v1226_v43, %v1002_v41  ;;  %v1274_v53 = vadd.f32 %v1242_v44, %v1018_v42  ;;  %v1227_v1 = vmul.f32 %v2416_v54, %v971_v45  ;;  %v767_v6 = vpop.f32.mrb[12].mxu0  ;;  %v847_v7 = vpop.f32.mrb[12].mxu1 }
 0x163   : > { %v1243_v5 = vmul.f32 %v1170_v47, %v987_v46  ;;  %v905_v8 = vmul.f32 %v2437_v0, %v767_v6  ;;  %v921_v9 = vmul.f32 %v2437_v0, %v847_v7  ;;  %v769_v10 = vpop.f32.mrb[13].mxu0  ;;  %v849_v11 = vpop.f32.mrb[13].mxu1  ;;  %v1006_v7 = vld [vmem:[#allocation2 + $0x40] sm:$0xff] }
 0x164   : > { %1290 = vst [vmem:[#allocation2 + $0x20] sm:$0xff] %v1258_v51  ;;  %1306 = vst [vmem:[#allocation2 + $0xa0] sm:$0xff] %v1274_v53  ;;  %v1259_v55 = vadd.f32 %v1227_v1, %v1003_v48  ;;  %v940_v13 = vmul.f32 %v2443_v4, %v769_v10  ;;  %v956_v14 = vmul.f32 %v2443_v4, %v849_v11  ;;  %v771_v15 = vpop.f32.mrb[14].mxu0  ;;  %v851_v16 = vpop.f32.mrb[14].mxu1 }
 0x165   : > { %v1275_v12 = vadd.f32 %v1243_v5, %v1019_v49  ;;  %v906_v54 = vmul.f32 %v2437_v0, %v771_v15  ;;  %v922_v17 = vmul.f32 %v2437_v0, %v851_v16  ;;  %v773_v18 = vpop.f32.mrb[15].mxu0  ;;  %v853_v19 = vpop.f32.mrb[15].mxu1 }
 0x166   : > { %1291 = vst [vmem:[#allocation2 + $0x28] sm:$0xff] %v1259_v55  ;;  %v972_v20 = vadd.f32 %v940_v13, %v905_v8  ;;  %v988_v21 = vadd.f32 %v956_v14, %v921_v9  ;;  %v941_v22 = vmul.f32 %v2443_v4, %v773_v18  ;;  %v957_v23 = vmul.f32 %v2443_v4, %v853_v19  ;;  %v1185_v6 = vpop.permute.xlu0 %1184  ;;  %v1022_v8 = vld [vmem:[#allocation2 + $0xc0] sm:$0xff]  ;;  %v1007_v13 = vld [vmem:[#allocation2 + $0x48] sm:$0xff] }
 0x167   : > { %1307 = vst [vmem:[#allocation2 + $0xa8] sm:$0xff] %v1275_v12  ;;  %v1190_v12 = vpop.permute.xlu1 %1189  ;;  %v1023_v14 = vld [vmem:[#allocation2 + $0xc8] sm:$0xff] }
 0x168   : > { %v1228_v27 = vmul.f32 %v2422_v57, %v972_v20  ;;  %v1244_v50 = vmul.f32 %v1175_v24, %v988_v21  ;;  %v973_v28 = vadd.f32 %v941_v22, %v906_v54  ;;  %v989_v29 = vadd.f32 %v957_v23, %v922_v17 }
 0x16a   : > { %v1260_v52 = vadd.f32 %v1228_v27, %v1004_v25  ;;  %v1276_v33 = vadd.f32 %v1244_v50, %v1020_v26  ;;  %v1229_v34 = vmul.f32 %v2420_v56, %v973_v28  ;;  %v1245_v35 = vmul.f32 %v1180_v30, %v989_v29  ;;  %v777_v36 = vpop.f32.mrb[16].mxu0  ;;  %v857_v37 = vpop.f32.mrb[16].mxu1 }
 0x16b   : > { %v907_v38 = vmul.f32 %v2437_v0, %v777_v36  ;;  %v923_v39 = vmul.f32 %v2437_v0, %v857_v37  ;;  %v779_v40 = vpop.f32.mrb[17].mxu0  ;;  %v859_v41 = vpop.f32.mrb[17].mxu1  ;;  %v1024_v36 = vld [vmem:[#allocation2 + $0xd0] sm:$0xff] }
 0x16c   : > { %1292 = vst [vmem:[#allocation2 + $0x30] sm:$0xff] %v1260_v52  ;;  %1308 = vst [vmem:[#allocation2 + $0xb0] sm:$0xff] %v1276_v33  ;;  %v1261_v57 = vadd.f32 %v1229_v34, %v1005_v31  ;;  %v1277_v42 = vadd.f32 %v1245_v35, %v1021_v32  ;;  %v942_v43 = vmul.f32 %v2443_v4, %v779_v40  ;;  %v781_v45 = vpop.f32.mrb[18].mxu0  ;;  %v861_v46 = vpop.f32.mrb[18].mxu1  ;;  %v1008_v35 = vld [vmem:[#allocation2 + $0x50] sm:$0xff] }
 0x16d   : > { %v958_v44 = vmul.f32 %v2443_v4, %v859_v41  ;;  %v908_v56 = vmul.f32 %v2437_v0, %v781_v45  ;;  %v924_v47 = vmul.f32 %v2437_v0, %v861_v46  ;;  %v783_v48 = vpop.f32.mrb[19].mxu0  ;;  %v863_v49 = vpop.f32.mrb[19].mxu1 }
 0x16e   : > { %1293 = vst [vmem:[#allocation2 + $0x38] sm:$0xff] %v1261_v57  ;;  %1309 = vst [vmem:[#allocation2 + $0xb8] sm:$0xff] %v1277_v42  ;;  %v974_v51 = vadd.f32 %v942_v43, %v907_v38  ;;  %v943_v1 = vmul.f32 %v2443_v4, %v783_v48  ;;  %v959_v5 = vmul.f32 %v2443_v4, %v863_v49  ;;  %v1195_v34 = vpop.permute.xlu0 %1194  ;;  %v1200_v41 = vpop.permute.xlu1 %1199  ;;  %v1009_v57 = vld [vmem:[#allocation2 + $0x58] sm:$0xff] }
 0x16f   : > { %v990_v53 = vadd.f32 %v958_v44, %v923_v39  ;;  %v1025_v42 = vld [vmem:[#allocation2 + $0xd8] sm:$0xff] }
 0x170   : > { %v1230_v9 = vmul.f32 %v2426_v59, %v974_v51  ;;  %v975_v11 = vadd.f32 %v943_v1, %v908_v56  ;;  %v991_v55 = vadd.f32 %v959_v5, %v924_v47 }
 0x171   : > { %v1246_v10 = vmul.f32 %v1185_v6, %v990_v53 }
 0x172   : > { %v1262_v15 = vadd.f32 %v1230_v9, %v1006_v7  ;;  %v1231_v54 = vmul.f32 %v2424_v58, %v975_v11  ;;  %v1247_v17 = vmul.f32 %v1190_v12, %v991_v55  ;;  %v787_v18 = vpop.f32.mrb[20].mxu0  ;;  %v867_v19 = vpop.f32.mrb[20].mxu1 }
 0x173   : > { %v1278_v16 = vadd.f32 %v1246_v10, %v1022_v8  ;;  %v909_v20 = vmul.f32 %v2437_v0, %v787_v18  ;;  %v925_v21 = vmul.f32 %v2437_v0, %v867_v19  ;;  %v789_v22 = vpop.f32.mrb[21].mxu0  ;;  %v869_v23 = vpop.f32.mrb[21].mxu1 }
 0x174   : > { %1294 = vst [vmem:[#allocation2 + $0x40] sm:$0xff] %v1262_v15  ;;  %v1263_v59 = vadd.f32 %v1231_v54, %v1007_v13  ;;  %v1279_v24 = vadd.f32 %v1247_v17, %v1023_v14  ;;  %v944_v25 = vmul.f32 %v2443_v4, %v789_v22  ;;  %v960_v26 = vmul.f32 %v2443_v4, %v869_v23  ;;  %v791_v27 = vpop.f32.mrb[22].mxu0  ;;  %v871_v50 = vpop.f32.mrb[22].mxu1  ;;  %v1026_v54 = vld [vmem:[#allocation2 + $0xe0] sm:$0xff]  ;;  %v1011_v22 = vld [vmem:[#allocation2 + $0x68] sm:$0xff] }
 0x175   : > { %1310 = vst [vmem:[#allocation2 + $0xc0] sm:$0xff] %v1278_v16  ;;  %v910_v58 = vmul.f32 %v2437_v0, %v791_v27  ;;  %v926_v28 = vmul.f32 %v2437_v0, %v871_v50  ;;  %v793_v29 = vpop.f32.mrb[23].mxu0  ;;  %v873_v30 = vpop.f32.mrb[23].mxu1  ;;  %v1010_v16 = vld [vmem:[#allocation2 + $0x60] sm:$0xff]  ;;  %v1027_v23 = vld [vmem:[#allocation2 + $0xe8] sm:$0xff] }
 0x176   : > { %1295 = vst [vmem:[#allocation2 + $0x48] sm:$0xff] %v1263_v59  ;;  %1311 = vst [vmem:[#allocation2 + $0xc8] sm:$0xff] %v1279_v24  ;;  %v976_v31 = vadd.f32 %v944_v25, %v909_v20  ;;  %v992_v32 = vadd.f32 %v960_v26, %v925_v21  ;;  %v945_v52 = vmul.f32 %v2443_v4, %v793_v29  ;;  %v1205_v15 = vpop.permute.xlu0 %1204  ;;  %v1210_v21 = vpop.permute.xlu1 %1209 }
 0x177   : > { %v961_v33 = vmul.f32 %v2443_v4, %v873_v30 }
 0x178   : > { %v1232_v37 = vmul.f32 %v2431_v61, %v976_v31  ;;  %v1248_v38 = vmul.f32 %v1195_v34, %v992_v32  ;;  %v977_v39 = vadd.f32 %v945_v52, %v910_v58 }
 0x179   : > { %v993_v40 = vadd.f32 %v961_v33, %v926_v28 }
 0x17a   : > { %v1264_v43 = vadd.f32 %v1232_v37, %v1008_v35  ;;  %v1280_v44 = vadd.f32 %v1248_v38, %v1024_v36  ;;  %v1233_v45 = vmul.f32 %v2429_v60, %v977_v39  ;;  %v797_v56 = vpop.f32.mrb[24].mxu0  ;;  %v877_v47 = vpop.f32.mrb[24].mxu1 }
 0x17b   : > { %v1249_v46 = vmul.f32 %v1200_v41, %v993_v40  ;;  %v911_v48 = vmul.f32 %v2437_v0, %v797_v56  ;;  %v927_v49 = vmul.f32 %v2437_v0, %v877_v47  ;;  %v799_v51 = vpop.f32.mrb[25].mxu0  ;;  %v879_v53 = vpop.f32.mrb[25].mxu1 }
 0x17c   : > { %1296 = vst [vmem:[#allocation2 + $0x50] sm:$0xff] %v1264_v43  ;;  %1312 = vst [vmem:[#allocation2 + $0xd0] sm:$0xff] %v1280_v44  ;;  %v1265_v61 = vadd.f32 %v1233_v45, %v1009_v57  ;;  %v946_v5 = vmul.f32 %v2443_v4, %v799_v51  ;;  %v962_v6 = vmul.f32 %v2443_v4, %v879_v53  ;;  %v801_v7 = vpop.f32.mrb[26].mxu0  ;;  %v881_v8 = vpop.f32.mrb[26].mxu1  ;;  %v1028_v43 = vld [vmem:[#allocation2 + $0xf0] sm:$0xff] }
 0x17d   : > { %v1281_v1 = vadd.f32 %v1249_v46, %v1025_v42  ;;  %v912_v60 = vmul.f32 %v2437_v0, %v801_v7  ;;  %v928_v9 = vmul.f32 %v2437_v0, %v881_v8  ;;  %v803_v10 = vpop.f32.mrb[27].mxu0  ;;  %v883_v11 = vpop.f32.mrb[27].mxu1  ;;  %v1012_v42 = vld [vmem:[#allocation2 + $0x70] sm:$0xff] }
 0x17e   : > { %1297 = vst [vmem:[#allocation2 + $0x58] sm:$0xff] %v1265_v61  ;;  %v978_v55 = vadd.f32 %v946_v5, %v911_v48  ;;  %v994_v12 = vadd.f32 %v962_v6, %v927_v49  ;;  %v947_v13 = vmul.f32 %v2443_v4, %v803_v10  ;;  %v963_v14 = vmul.f32 %v2443_v4, %v883_v11  ;;  %v1215_v57 = vpop.permute.xlu0 %1214  ;;  %v1220_v47 = vpop.permute.xlu1 %1219  ;;  %v1029_v48 = vld [vmem:[#allocation2 + $0xf8] sm:$0xff]  ;;  %v1323_v5 = vld [vmem:[#allocation2 + $0x8] sm:$0xff] (!%p1708_p3)  ;;  %v1324_v6 = vld [vmem:[#allocation2 + $0x10] sm:$0xff] (!%p1708_p3) }
 0x17f   : > { %1313 = vst [vmem:[#allocation2 + $0xd8] sm:$0xff] %v1281_v1  ;;  %v1355_v8 = vmax.f32 (!%p1708_p3), %v1323_v5, 0.0  ;;  %v1326_v10 = vld [vmem:[#allocation2 + $0x20] sm:$0xff] (!%p1708_p3)  ;;  %v1327_v11 = vld [vmem:[#allocation2 + $0x28] sm:$0xff] (!%p1708_p3) }
 0x180   : > { %v1234_v17 = vmul.f32 %v2435_v63, %v978_v55  ;;  %v1250_v18 = vmul.f32 %v1205_v15, %v994_v12  ;;  %v979_v19 = vadd.f32 %v947_v13, %v912_v60  ;;  %v995_v20 = vadd.f32 %v963_v14, %v928_v9  ;;  %v1325_v60 = vld [vmem:[#allocation2 + $0x18] sm:$0xff] (!%p1708_p3)  ;;  %v1328_v13 = vld [vmem:[#allocation2 + $0x30] sm:$0xff] (!%p1708_p3)  ;;  %v1330_v15 = vld [vmem:[#allocation2 + $0x40] sm:$0xff] (!%p1708_p3) }
 0x181   : > { %v1356_v9 = vmax.f32 (!%p1708_p3), %v1324_v6, 0.0  ;;  %v1358_v55 = vmax.f32 (!%p1708_p3), %v1326_v10, 0.0  ;;  %v1359_v12 = vmax.f32 (!%p1708_p3), %v1327_v11, 0.0  ;;  %v1329_v14 = vld [vmem:[#allocation2 + $0x38] sm:$0xff] (!%p1708_p3) }
 0x182   : > { %v1266_v59 = vadd.f32 %v1234_v17, %v1010_v16  ;;  %v1282_v24 = vadd.f32 %v1250_v18, %v1026_v54  ;;  %v1235_v25 = vmul.f32 %v2433_v62, %v979_v19  ;;  %v1251_v26 = vmul.f32 %v1210_v21, %v995_v20  ;;  %v807_v27 = vpop.f32.mrb[28].mxu0  ;;  %v887_v50 = vpop.f32.mrb[28].mxu1  ;;  %v1331_v18 = vld [vmem:[#allocation2 + $0x48] sm:$0xff] (!%p1708_p3) }
 0x183   : > { %v913_v58 = vmul.f32 %v2437_v0, %v807_v27  ;;  %v929_v28 = vmul.f32 %v2437_v0, %v887_v50  ;;  %v809_v29 = vpop.f32.mrb[29].mxu0  ;;  %v889_v30 = vpop.f32.mrb[29].mxu1  ;;  %v1360_v54 = vmax.f32 (!%p1708_p3), %v1328_v13, 0.0  ;;  %v1361_v17 = vmax.f32 (!%p1708_p3), %v1329_v14, 0.0  ;;  %v1332_v20 = vld [vmem:[#allocation2 + $0x50] sm:$0xff] (!%p1708_p3) }
 0x184   : > { %1298 = vst [vmem:[#allocation2 + $0x60] sm:$0xff] %v1266_v59  ;;  %1314 = vst [vmem:[#allocation2 + $0xe0] sm:$0xff] %v1282_v24  ;;  %v1267_v63 = vadd.f32 %v1235_v25, %v1011_v22  ;;  %v1283_v31 = vadd.f32 %v1251_v26, %v1027_v23  ;;  %v948_v32 = vmul.f32 %v2443_v4, %v809_v29  ;;  %v811_v33 = vpop.f32.mrb[30].mxu0  ;;  %v891_v34 = vpop.f32.mrb[30].mxu1  ;;  %v1362_v19 = vmax.f32 (!%p1708_p3), %v1330_v15, 0.0 }
 0x185   : > { %v964_v52 = vmul.f32 %v2443_v4, %v889_v30  ;;  %v914_v62 = vmul.f32 %v2437_v0, %v811_v33  ;;  %v930_v35 = vmul.f32 %v2437_v0, %v891_v34  ;;  %v813_v36 = vpop.f32.mrb[31].mxu0  ;;  %v893_v37 = vpop.f32.mrb[31].mxu1  ;;  %v1013_v0 = vld [vmem:[#allocation2 + $0x78] sm:$0xff]  ;;  %v1792_v23 = vpack.c.bf16 (!%p1708_p3), %v1359_v12, %v1358_v55 }
 0x186   : > { %1299 = vst [vmem:[#allocation2 + $0x68] sm:$0xff] %v1267_v63  ;;  %1315 = vst [vmem:[#allocation2 + $0xe8] sm:$0xff] %v1283_v31  ;;  %v980_v38 = vadd.f32 %v948_v32, %v913_v58  ;;  %v949_v40 = vmul.f32 %v2443_v4, %v813_v36  ;;  %v965_v41 = vmul.f32 %v2443_v4, %v893_v37  ;;  %v1333_v21 = vld [vmem:[#allocation2 + $0x58] sm:$0xff] (!%p1708_p3)  ;;  %v1363_v59 = vmax.f32 (!%p1708_p3), %v1331_v18, 0.0  ;;  %v1338_v63 = vld [vmem:[#allocation2 + $0x80] sm:$0xff] (!%p1708_p3) }
 0x187   : > { %v996_v39 = vadd.f32 %v964_v52, %v929_v28  ;;  %v1364_v24 = vmax.f32 (!%p1708_p3), %v1332_v20, 0.0  ;;  %v1797_v50 = vpack.c.bf16 (!%p1708_p3), %v1361_v17, %v1360_v54  ;;  %v1365_v58 = vmax.f32 (!%p1708_p3), %v1333_v21, 0.0  ;;  %v1339_v31 = vld [vmem:[#allocation2 + $0x88] sm:$0xff] (!%p1708_p3)  ;;  %1860 = vst [vmem:[%s2587_s6 + $0x10] sm:$0xff] (!%p1708_p3), %v1792_v23   ;;  %v1342_v36 = vld [vmem:[#allocation2 + $0xa0] sm:$0xff] (!%p1708_p3) }
 0x188   : > { %v1236_v44 = vmul.f32 %v2441_v3, %v980_v38  ;;  %v981_v46 = vadd.f32 %v949_v40, %v914_v62  ;;  %v997_v56 = vadd.f32 %v965_v41, %v930_v35  ;;  %1321 = sbr.rel (%p1708_p3) target bundleno = 412 (0x19c), region = 56  ;;  %v1322_v3 = vld [vmem:[#allocation2] sm:$0xff] (!%p1708_p3)  ;;  %v1802_v32 = vpack.c.bf16 (!%p1708_p3), %v1363_v59, %v1362_v19  ;;  %v1340_v62 = vld [vmem:[#allocation2 + $0x90] sm:$0xff] (!%p1708_p3)  ;;  %v1341_v35 = vld [vmem:[#allocation2 + $0x98] sm:$0xff] (!%p1708_p3) }
 0x189   : > { %v1252_v45 = vmul.f32 %v1215_v57, %v996_v39  ;;  %v1354_v7 = vmax.f32 (!%p1708_p3), %v1322_v3, 0.0  ;;  %v1370_v34 = vmax.f32 (!%p1708_p3), %v1338_v63, 0.0  ;;  %1861 = vst [vmem:[%s2587_s6 + $0x18] sm:$0xff] (!%p1708_p3), %v1797_v50   ;;  %v1807_v37 = vpack.c.bf16 (!%p1708_p3), %v1365_v58, %v1364_v24  ;;  %v1343_v41 = vld [vmem:[#allocation2 + $0xa8] sm:$0xff] (!%p1708_p3)  ;;  %v1344_v57 = vld [vmem:[#allocation2 + $0xb0] sm:$0xff] (!%p1708_p3) }
 0x18a   : > { %v1268_v49 = vadd.f32 %v1236_v44, %v1012_v42  ;;  %v1237_v53 = vmul.f32 %v2439_v2, %v981_v46  ;;  %v1253_v61 = vmul.f32 %v1220_v47, %v997_v56  ;;  %v1357_v2 = vmax.f32 (!%p1708_p3), %v1325_v60, 0.0  ;;  %v1345_v42 = vld [vmem:[#allocation2 + $0xb8] sm:$0xff] (!%p1708_p3)  ;;  %1862 = vst [vmem:[%s2587_s6 + $0x20] sm:$0xff] (!%p1708_p3), %v1802_v32   ;;  %v1346_v56 = vld [vmem:[#allocation2 + $0xc0] sm:$0xff] (!%p1708_p3)  ;;  %v1347_v47 = vld [vmem:[#allocation2 + $0xc8] sm:$0xff] (!%p1708_p3) }
 0x18b   : > { %v1284_v51 = vadd.f32 %v1252_v45, %v1028_v43  ;;  %v1782_v16 = vpack.c.bf16 (!%p1708_p3), %v1355_v8, %v1354_v7  ;;  %v1334_v25 = vld [vmem:[#allocation2 + $0x60] sm:$0xff] (!%p1708_p3)  ;;  %v1371_v39 = vmax.f32 (!%p1708_p3), %v1339_v31, 0.0  ;;  %v1372_v40 = vmax.f32 (!%p1708_p3), %v1340_v62, 0.0  ;;  %1863 = vst [vmem:[%s2587_s6 + $0x28] sm:$0xff] (!%p1708_p3), %v1807_v37  }
 0x18c   : > { %1300 = vst [vmem:[#allocation2 + $0x70] sm:$0xff] %v1268_v49  ;;  %v1269_v1 = vadd.f32 %v1237_v53, %v1013_v0  ;;  %v1285_v4 = vadd.f32 %v1253_v61, %v1029_v48  ;;  %v1787_v22 = vpack.c.bf16 (!%p1708_p3), %v1357_v2, %v1356_v9  ;;  %v1366_v28 = vmax.f32 (!%p1708_p3), %v1334_v25, 0.0  ;;  %v1348_v0 = vld [vmem:[#allocation2 + $0xd0] sm:$0xff] (!%p1708_p3)  ;;  %v1349_v61 = vld [vmem:[#allocation2 + $0xd8] sm:$0xff] (!%p1708_p3) }
 0x18d   : > { %1316 = vst [vmem:[#allocation2 + $0xf0] sm:$0xff] %v1284_v51  ;;  %v1335_v26 = vld [vmem:[#allocation2 + $0x68] sm:$0xff] (!%p1708_p3)  ;;  %1783 = vst [vmem:[%s2587_s6] sm:$0xff] (!%p1708_p3), %v1782_v16   ;;  %v1373_v44 = vmax.f32 (!%p1708_p3), %v1341_v35, 0.0  ;;  %v1374_v45 = vmax.f32 (!%p1708_p3), %v1342_v36, 0.0  ;;  %v1375_v46 = vmax.f32 (!%p1708_p3), %v1343_v41, 0.0  ;;  %v1822_v48 = vpack.c.bf16 (!%p1708_p3), %v1371_v39, %v1370_v34 }
 0x18e   : > { %1301 = vst [vmem:[#allocation2 + $0x78] sm:$0xff] %v1269_v1  ;;  %1317 = vst [vmem:[#allocation2 + $0xf8] sm:$0xff] %v1285_v4  ;;  %v1367_v29 = vmax.f32 (!%p1708_p3), %v1335_v26, 0.0  ;;  %v1376_v49 = vmax.f32 (!%p1708_p3), %v1344_v57, 0.0  ;;  %v1377_v51 = vmax.f32 (!%p1708_p3), %v1345_v42, 0.0  ;;  %v1378_v53 = vmax.f32 (!%p1708_p3), %v1346_v56, 0.0 }
 0x18f   : > { %1859 = vst [vmem:[%s2587_s6 + $0x8] sm:$0xff] %v1787_v22   ;;  %v1350_v1 = vld [vmem:[#allocation2 + $0xe0] sm:$0xff]  ;;  %v1351_v4 = vld [vmem:[#allocation2 + $0xe8] sm:$0xff]  ;;  %v1827_v3 = vpack.c.bf16 %v1373_v44, %v1372_v40  ;;  %v1832_v5 = vpack.c.bf16 %v1375_v46, %v1374_v45  ;;  %v1379_v6 = vmax.f32 %v1347_v47, 0.0  ;;  %v1380_v7 = vmax.f32 %v1348_v0, 0.0  ;;  %1866 = vst [vmem:[%s2587_s6 + $0x40] sm:$0xff] %v1822_v48  }
 0x190   : > { %v1812_v38 = vpack.c.bf16 %v1367_v29, %v1366_v28  ;;  %v1837_v9 = vpack.c.bf16 %v1377_v51, %v1376_v49  ;;  %v1381_v10 = vmax.f32 %v1349_v61, 0.0  ;;  %v1382_v11 = vmax.f32 %v1350_v1, 0.0 }
 0x191   : > { %v1383_v2 = vmax.f32 %v1351_v4, 0.0  ;;  %1867 = vst [vmem:[%s2587_s6 + $0x48] sm:$0xff] %v1827_v3   ;;  %1868 = vst [vmem:[%s2587_s6 + $0x50] sm:$0xff] %v1832_v5   ;;  %v1842_v55 = vpack.c.bf16 %v1379_v6, %v1378_v53 }
 0x192   : > { %1864 = vst [vmem:[%s2587_s6 + $0x30] sm:$0xff] %v1812_v38   ;;  %1869 = vst [vmem:[%s2587_s6 + $0x58] sm:$0xff] %v1837_v9   ;;  %v1847_v14 = vpack.c.bf16 %v1381_v10, %v1380_v7 }
 0x193   : > { %v1336_v27 = vld [vmem:[#allocation2 + $0x70] sm:$0xff]  ;;  %v1852_v15 = vpack.c.bf16 %v1383_v2, %v1382_v11  ;;  %1870 = vst [vmem:[%s2587_s6 + $0x60] sm:$0xff] %v1842_v55  }
 0x194   : > { %v1368_v52 = vmax.f32 %v1336_v27, 0.0  ;;  %v1352_v8 = vld [vmem:[#allocation2 + $0xf0] sm:$0xff]  ;;  %1871 = vst [vmem:[%s2587_s6 + $0x68] sm:$0xff] %v1847_v14  }
 0x195   : > { %v1337_v30 = vld [vmem:[#allocation2 + $0x78] sm:$0xff]  ;;  %v1384_v12 = vmax.f32 %v1352_v8, 0.0  ;;  %1872 = vst [vmem:[%s2587_s6 + $0x70] sm:$0xff] %v1852_v15  }
 0x196   : > { %v1369_v33 = vmax.f32 %v1337_v30, 0.0  ;;  %v1353_v60 = vld [vmem:[#allocation2 + $0xf8] sm:$0xff] }
 0x197   : > { %v1385_v13 = vmax.f32 %v1353_v60, 0.0 }
 0x198   : > { %v1817_v43 = vpack.c.bf16 %v1369_v33, %v1368_v52 }
 0x199   : > { %v1857_v16 = vpack.c.bf16 %v1385_v13, %v1384_v12 }
 0x19a   : > { %1865 = vst [vmem:[%s2587_s6 + $0x38] sm:$0xff] %v1817_v43  }
 0x19b   : > { %1873 = vst [vmem:[%s2587_s6 + $0x78] sm:$0xff] %v1857_v16  }
 0x19c PF: > { %s17_s23 = sadd.s32 1, %s2033_s23   ;;  %s2590_s21 = smov %s2029_s22 }
 0x19d   : > { %p14_p4 = scmp.ge.s32.totalorder %s17_s23, 5   ;;  %s2591_s22 = smov %s2593_s25 }
 0x19f   :  { %16 = sbr.rel (!%p14_p4) target bundleno = 2 (0x2), region = 93 }
 0x1a6   :  { %1568 = vsyncpa [#allocation4], 1 }
 0x1a7   :  { %1570 = vsyncpa [#allocation4 + $0x1], 1 }

// kernel: ddi_encoder_forward.6
= control target key start
LH: loop header
LB: loop body
LE: loop exit
PB: predicated region body
PF: predicated region fallthrough
CT: control target
= control target key end

     0   :  { %v1161_v1 = vmov 0   ;;  %s1518_s1 = inlined_call_operand.vmem [shape: bf16[128,384], index: 1, kind: input, shape index: {}]   ;;  %s1519_s0 = inlined_call_operand.vmem [shape: bf16[256,128], index: 0, kind: input, shape index: {}]   ;;  %s1520_s2 = inlined_call_operand.vmem [shape: bf16[256,256], index: 2, kind: output, shape index: {0}]   ;;  %s1521_s3 = inlined_call_operand.vmem [shape: f32[256,128], index: 3, kind: output, shape index: {1}]  }
   0x1   :  { %v1113_v0 = vld [vmem:[%s1518_s1 + $0x4] ss:$12 sps:$4 sm:$0xff]   ;;  %334 = vmatprep.mubr.bf16.mxu0 %v1161_v1  ;;  %454 = vmatprep.mubr.bf16.mxu1 %v1161_v1  ;;  %v1115_v2 = vld [vmem:[%s1518_s1] ss:$12 sps:$4 sm:$0xff]   ;;  %v1116_v3 = vld [vmem:[%s1518_s1 + $0x1c] ss:$12 sps:$4 sm:$0xff]  }
   0x2   :  { %302 = vmatprep.subr.bf16.mxu0 %v1113_v0  ;;  %1096 = vmatprep.subr.bf16.mxu1 %v1113_v0  ;;  %v1118_v4 = vld [vmem:[%s1518_s1 + $0x18] ss:$12 sps:$4 sm:$0xff]   ;;  %v1119_v5 = vld [vmem:[%s1518_s1 + $0x34] ss:$12 sps:$4 sm:$0xff]   ;;  %v1121_v6 = vld [vmem:[%s1518_s1 + $0x30] ss:$12 sps:$4 sm:$0xff]  }
   0x3   :  { %303 = vmatpush1.bf16.msra.mxu0 %v1115_v2  ;;  %1104 = vmatpush1.bf16.msra.mxu1 %v1115_v2  ;;  %v1122_v7 = vld [vmem:[%s1518_s1 + $0x4c] ss:$12 sps:$4 sm:$0xff]   ;;  %v1124_v8 = vld [vmem:[%s1518_s1 + $0x48] ss:$12 sps:$4 sm:$0xff]   ;;  %v1125_v9 = vld [vmem:[%s1518_s1 + $0x64] ss:$12 sps:$4 sm:$0xff]  }
   0x4   :  { %304 = vmatprep.subr.bf16.mxu0 %v1116_v3  ;;  %1097 = vmatprep.subr.bf16.mxu1 %v1116_v3  ;;  %v1127_v10 = vld [vmem:[%s1518_s1 + $0x60] ss:$12 sps:$4 sm:$0xff]   ;;  %v1128_v11 = vld [vmem:[%s1518_s1 + $0x7c] ss:$12 sps:$4 sm:$0xff]   ;;  %v1130_v12 = vld [vmem:[%s1518_s1 + $0x78] ss:$12 sps:$4 sm:$0xff]  }
   0x5   :  { %v1131_v13 = vld [vmem:[%s1518_s1 + $0x94] ss:$12 sps:$4 sm:$0xff]   ;;  %v1133_v14 = vld [vmem:[%s1518_s1 + $0x90] ss:$12 sps:$4 sm:$0xff]   ;;  %v1134_v15 = vld [vmem:[%s1518_s1 + $0xac] ss:$12 sps:$4 sm:$0xff]  }
   0x6   :  { %v1136_v16 = vld [vmem:[%s1518_s1 + $0xa8] ss:$12 sps:$4 sm:$0xff]   ;;  %v1137_v18 = vld [vmem:[%s1519_s0] sm:$0xff]   ;;  %v1144_v24 = vld [vmem:[%s1518_s1 + $0x50] ss:$12 sps:$4 sm:$0xff]  }
   0x7   :  { %305 = vmatpush1.bf16.msra.mxu0 %v1118_v4  ;;  %1105 = vmatpush1.bf16.msra.mxu1 %v1118_v4  ;;  %v1139_v17 = vld [vmem:[%s1518_s1 + $0x8] ss:$12 sps:$4 sm:$0xff]   ;;  %v1241_v19 = vld [vmem:[%s1519_s0 + $0x60] sm:$0xff]   ;;  %v1149_v30 = vld [vmem:[%s1519_s0 + $0x18] sm:$0xff]  }
   0x8   :  { %306 = vmatprep.subr.bf16.mxu0 %v1119_v5  ;;  %1098 = vmatprep.subr.bf16.mxu1 %v1119_v5  ;;  %v1140_v20 = vld [vmem:[%s1518_s1 + $0x20] ss:$12 sps:$4 sm:$0xff]   ;;  %v1143_v21 = vld [vmem:[%s1518_s1 + $0x38] ss:$12 sps:$4 sm:$0xff]   ;;  %v1147_v25 = vld [vmem:[%s1518_s1 + $0x68] ss:$12 sps:$4 sm:$0xff]  }
   0x9   :  { %v1141_v22 = vld [vmem:[%s1519_s0 + $0x8] sm:$0xff]   ;;  %v1145_v26 = vld [vmem:[%s1519_s0 + $0x10] sm:$0xff]   ;;  %v1151_v29 = vld [vmem:[%s1518_s1 + $0x98] ss:$12 sps:$4 sm:$0xff]  }
   0xa   :  { %v1258_v23 = vld [vmem:[%s1519_s0 + $0x68] sm:$0xff]   ;;  %v1146_v27 = vld [vmem:[%s1519_s0 + $0x70] sm:$0xff]   ;;  %v1150_v31 = vld [vmem:[%s1519_s0 + $0x78] sm:$0xff]  }
   0xb   :  { %307 = vmatpush1.bf16.msra.mxu0 %v1121_v6  ;;  %1106 = vmatpush1.bf16.msra.mxu1 %v1121_v6  ;;  %v1148_v28 = vld [vmem:[%s1518_s1 + $0x80] ss:$12 sps:$4 sm:$0xff]   ;;  %v1152_v32 = vld [vmem:[%s1518_s1 + $0xb0] ss:$12 sps:$4 sm:$0xff]  }
   0xc   :  { %308 = vmatprep.subr.bf16.mxu0 %v1122_v7  ;;  %1099 = vmatprep.subr.bf16.mxu1 %v1122_v7  ;;  %v1153_v33 = vld [vmem:[%s1519_s0 + $0x20] sm:$0xff]   ;;  %v1154_v34 = vld [vmem:[%s1519_s0 + $0x28] sm:$0xff]   ;;  %v1155_v35 = vld [vmem:[%s1519_s0 + $0x30] sm:$0xff]  }
   0xd   :  { %v1156_v36 = vld [vmem:[%s1519_s0 + $0x38] sm:$0xff]   ;;  %v1157_v37 = vld [vmem:[%s1519_s0 + $0x40] sm:$0xff]   ;;  %v1158_v38 = vld [vmem:[%s1519_s0 + $0x48] sm:$0xff]  }
   0xe   :  { %v1159_v39 = vld [vmem:[%s1519_s0 + $0x50] sm:$0xff]   ;;  %v1160_v40 = vld [vmem:[%s1519_s0 + $0x58] sm:$0xff]  }
   0xf   :  { %309 = vmatpush1.bf16.msra.mxu0 %v1124_v8  ;;  %1107 = vmatpush1.bf16.msra.mxu1 %v1124_v8 }
  0x10   :  { %310 = vmatprep.subr.bf16.mxu0 %v1125_v9  ;;  %1100 = vmatprep.subr.bf16.mxu1 %v1125_v9 }
  0x13   :  { %311 = vmatpush1.bf16.msra.mxu0 %v1127_v10  ;;  %1108 = vmatpush1.bf16.msra.mxu1 %v1127_v10 }
  0x14   :  { %312 = vmatprep.subr.bf16.mxu0 %v1128_v11  ;;  %1101 = vmatprep.subr.bf16.mxu1 %v1128_v11 }
  0x17   :  { %313 = vmatpush1.bf16.msra.mxu0 %v1130_v12  ;;  %1109 = vmatpush1.bf16.msra.mxu1 %v1130_v12 }
  0x18   :  { %314 = vmatprep.subr.bf16.mxu0 %v1131_v13  ;;  %1102 = vmatprep.subr.bf16.mxu1 %v1131_v13 }
  0x1b   :  { %315 = vmatpush1.bf16.msra.mxu0 %v1133_v14  ;;  %1110 = vmatpush1.bf16.msra.mxu1 %v1133_v14 }
  0x1c   :  { %316 = vmatprep.subr.bf16.mxu0 %v1134_v15  ;;  %1103 = vmatprep.subr.bf16.mxu1 %v1134_v15 }
  0x1f   :  { %317 = vmatpush1.bf16.msra.mxu0 %v1136_v16  ;;  %1111 = vmatpush1.bf16.msra.mxu1 %v1136_v16 }
  0x20   :  { %1048 = vmatprep.subr.bf16.mxu1 %v1139_v17 }
  0x22   :  { %335 = vmatmul.mubr.bf16.vlgmr.msra.gmra.mrb[0].mxu0 %v1137_v18  ;;  %455 = vmatmul.mubr.bf16.vlgmr.msra.gmra.mrb[0].mxu1 %v1241_v19 }
  0x23   :  { %1049 = vmatpush3.bf16.msra.mxu1 %v1139_v17  ;;  %344 = vmatprep.mubr.bf16.mxu0 %v1161_v1 }
  0x24   :  { %1050 = vmatprep.subr.bf16.mxu1 %v1140_v20  ;;  %464 = vmatprep.mubr.bf16.mxu1 %v1161_v1 }
  0x27   :  { %1051 = vmatpush3.bf16.msra.mxu1 %v1140_v20 }
  0x28   :  { %1052 = vmatprep.subr.bf16.mxu1 %v1143_v21 }
  0x2a   :  { %345 = vmatmul.mubr.bf16.gmra.mrb[4].mxu0 %v1141_v22  ;;  %465 = vmatmul.mubr.bf16.gmra.mrb[4].mxu1 %v1258_v23 }
  0x2b   :  { %1053 = vmatpush3.bf16.msra.mxu1 %v1143_v21  ;;  %354 = vmatprep.mubr.bf16.mxu0 %v1161_v1 }
  0x2c   :  { %1054 = vmatprep.subr.bf16.mxu1 %v1144_v24  ;;  %474 = vmatprep.mubr.bf16.mxu1 %v1161_v1 }
  0x2f   :  { %1055 = vmatpush3.bf16.msra.mxu1 %v1144_v24 }
  0x30   :  { %1056 = vmatprep.subr.bf16.mxu1 %v1147_v25 }
  0x32   :  { %355 = vmatmul.mubr.bf16.gmra.mrb[8].mxu0 %v1145_v26  ;;  %475 = vmatmul.mubr.bf16.gmra.mrb[8].mxu1 %v1146_v27 }
  0x33   :  { %1057 = vmatpush3.bf16.msra.mxu1 %v1147_v25  ;;  %364 = vmatprep.mubr.bf16.mxu0 %v1161_v1 }
  0x34   :  { %1058 = vmatprep.subr.bf16.mxu1 %v1148_v28  ;;  %484 = vmatprep.mubr.bf16.mxu1 %v1161_v1 }
  0x37   :  { %1059 = vmatpush3.bf16.msra.mxu1 %v1148_v28 }
  0x38   :  { %1060 = vmatprep.subr.bf16.mxu1 %v1151_v29 }
  0x3a   :  { %365 = vmatmul.mubr.bf16.gmra.mrb[12].mxu0 %v1149_v30  ;;  %485 = vmatmul.mubr.bf16.gmra.mrb[12].mxu1 %v1150_v31 }
  0x3b   :  { %1061 = vmatpush3.bf16.msra.mxu1 %v1151_v29  ;;  %374 = vmatprep.mubr.bf16.mxu0 %v1161_v1 }
  0x3c   :  { %1062 = vmatprep.subr.bf16.mxu1 %v1152_v32  ;;  %1064 = vmatprep.mubr.bf16.mxu1 %v1137_v18 }
  0x3f   :  { %1063 = vmatpush3.bf16.msra.mxu1 %v1152_v32 }
  0x42   :  { %375 = vmatmul.mubr.bf16.gmra.mrb[16].mxu0 %v1153_v33  ;;  %1065 = vmatmul.mubr.bf16.vlgmr.msra.gmra.mrb[16].mxu1 %v1141_v22 }
  0x43   :  { %384 = vmatprep.mubr.bf16.mxu0 %v1161_v1  ;;  %1068 = vmatprep.mubr.bf16.mxu1 %v1145_v26 }
  0x4a   :  { %385 = vmatmul.mubr.bf16.gmra.mrb[20].mxu0 %v1154_v34  ;;  %1069 = vmatmul.mubr.bf16.gmra.mrb[20].mxu1 %v1149_v30 }
  0x4b   :  { %394 = vmatprep.mubr.bf16.mxu0 %v1161_v1  ;;  %1072 = vmatprep.mubr.bf16.mxu1 %v1153_v33 }
  0x52   :  { %395 = vmatmul.mubr.bf16.gmra.mrb[24].mxu0 %v1155_v35  ;;  %1073 = vmatmul.mubr.bf16.gmra.mrb[24].mxu1 %v1154_v34 }
  0x53   :  { %404 = vmatprep.mubr.bf16.mxu0 %v1161_v1  ;;  %1076 = vmatprep.mubr.bf16.mxu1 %v1155_v35 }
  0x5a   :  { %405 = vmatmul.mubr.bf16.gmra.mrb[28].mxu0 %v1156_v36  ;;  %1077 = vmatmul.mubr.bf16.gmra.mrb[28].mxu1 %v1156_v36 }
  0x5b   :  { %414 = vmatprep.mubr.bf16.mxu0 %v1161_v1  ;;  %1080 = vmatprep.mubr.bf16.mxu1 %v1157_v37 }
  0x62   :  { %415 = vmatmul.mubr.bf16.gmra.mrb[32].mxu0 %v1157_v37  ;;  %1081 = vmatmul.mubr.bf16.gmra.mrb[32].mxu1 %v1158_v38 }
  0x63   :  { %424 = vmatprep.mubr.bf16.mxu0 %v1161_v1  ;;  %1084 = vmatprep.mubr.bf16.mxu1 %v1159_v39 }
  0x6a   :  { %425 = vmatmul.mubr.bf16.gmra.mrb[36].mxu0 %v1158_v38  ;;  %1085 = vmatmul.mubr.bf16.gmra.mrb[36].mxu1 %v1160_v40 }
  0x6b   :  { %434 = vmatprep.mubr.bf16.mxu0 %v1161_v1  ;;  %1088 = vmatprep.mubr.bf16.mxu1 %v1241_v19 }
  0x72   :  { %435 = vmatmul.mubr.bf16.gmra.mrb[40].mxu0 %v1159_v39  ;;  %1089 = vmatmul.mubr.bf16.gmra.mrb[40].mxu1 %v1258_v23 }
  0x73   :  { %444 = vmatprep.mubr.bf16.mxu0 %v1161_v1  ;;  %1092 = vmatprep.mubr.bf16.mxu1 %v1146_v27 }
  0x7a   :  { %445 = vmatmul.mubr.bf16.gmra.mrb[44].mxu0 %v1160_v40  ;;  %1093 = vmatmul.mubr.bf16.gmra.mrb[44].mxu1 %v1150_v31 }
  0xf5   :  { %v336_v41 = vpop.f32.mrb[0].mxu0  ;;  %v456_v42 = vpop.f32.mrb[0].mxu1 }
  0xf6   :  { %v338_v43 = vpop.f32.mrb[1].mxu0  ;;  %v458_v44 = vpop.f32.mrb[1].mxu1 }
  0xf7   :  { %v992_v45 = vpack.c.bf16 %v338_v43, %v336_v41  ;;  %v1016_v46 = vpack.c.bf16 %v458_v44, %v456_v42  ;;  %v340_v47 = vpop.f32.mrb[2].mxu0  ;;  %v460_v48 = vpop.f32.mrb[2].mxu1 }
  0xf8   :  { %v342_v49 = vpop.f32.mrb[3].mxu0  ;;  %v462_v50 = vpop.f32.mrb[3].mxu1 }
  0xf9   :  { %848 = vst [vmem:[%s1520_s2] sm:$0xff] %v992_v45  ;;  %872 = vst [vmem:[%s1520_s2 + $0xc0] sm:$0xff] %v1016_v46  ;;  %v993_v51 = vpack.c.bf16 %v342_v49, %v340_v47  ;;  %v1017_v52 = vpack.c.bf16 %v462_v50, %v460_v48 }
  0xfb   :  { %849 = vst [vmem:[%s1520_s2 + $0x8] sm:$0xff] %v993_v51  ;;  %873 = vst [vmem:[%s1520_s2 + $0xc8] sm:$0xff] %v1017_v52 }
  0xfd   :  { %v346_v53 = vpop.f32.mrb[4].mxu0  ;;  %v466_v54 = vpop.f32.mrb[4].mxu1 }
  0xfe   :  { %v348_v55 = vpop.f32.mrb[5].mxu0  ;;  %v468_v56 = vpop.f32.mrb[5].mxu1 }
  0xff   :  { %v994_v57 = vpack.c.bf16 %v348_v55, %v346_v53  ;;  %v1018_v58 = vpack.c.bf16 %v468_v56, %v466_v54  ;;  %v350_v59 = vpop.f32.mrb[6].mxu0  ;;  %v470_v60 = vpop.f32.mrb[6].mxu1 }
 0x100   :  { %v352_v61 = vpop.f32.mrb[7].mxu0  ;;  %v472_v62 = vpop.f32.mrb[7].mxu1 }
 0x101   :  { %850 = vst [vmem:[%s1520_s2 + $0x10] sm:$0xff] %v994_v57  ;;  %874 = vst [vmem:[%s1520_s2 + $0xd0] sm:$0xff] %v1018_v58  ;;  %v995_v63 = vpack.c.bf16 %v352_v61, %v350_v59  ;;  %v1019_v0 = vpack.c.bf16 %v472_v62, %v470_v60 }
 0x103   :  { %851 = vst [vmem:[%s1520_s2 + $0x18] sm:$0xff] %v995_v63  ;;  %875 = vst [vmem:[%s1520_s2 + $0xd8] sm:$0xff] %v1019_v0 }
 0x105   :  { %v356_v1 = vpop.f32.mrb[8].mxu0  ;;  %v476_v2 = vpop.f32.mrb[8].mxu1 }
 0x106   :  { %v358_v3 = vpop.f32.mrb[9].mxu0  ;;  %v478_v4 = vpop.f32.mrb[9].mxu1 }
 0x107   :  { %v996_v5 = vpack.c.bf16 %v358_v3, %v356_v1  ;;  %v1020_v6 = vpack.c.bf16 %v478_v4, %v476_v2  ;;  %v360_v7 = vpop.f32.mrb[10].mxu0  ;;  %v480_v8 = vpop.f32.mrb[10].mxu1 }
 0x108   :  { %v362_v9 = vpop.f32.mrb[11].mxu0  ;;  %v482_v10 = vpop.f32.mrb[11].mxu1 }
 0x109   :  { %852 = vst [vmem:[%s1520_s2 + $0x20] sm:$0xff] %v996_v5  ;;  %876 = vst [vmem:[%s1520_s2 + $0xe0] sm:$0xff] %v1020_v6  ;;  %v997_v11 = vpack.c.bf16 %v362_v9, %v360_v7  ;;  %v1021_v12 = vpack.c.bf16 %v482_v10, %v480_v8 }
 0x10b   :  { %853 = vst [vmem:[%s1520_s2 + $0x28] sm:$0xff] %v997_v11  ;;  %877 = vst [vmem:[%s1520_s2 + $0xe8] sm:$0xff] %v1021_v12 }
 0x10d   :  { %v366_v13 = vpop.f32.mrb[12].mxu0  ;;  %v486_v14 = vpop.f32.mrb[12].mxu1 }
 0x10e   :  { %v368_v15 = vpop.f32.mrb[13].mxu0  ;;  %v488_v16 = vpop.f32.mrb[13].mxu1 }
 0x10f   :  { %v998_v17 = vpack.c.bf16 %v368_v15, %v366_v13  ;;  %v1022_v18 = vpack.c.bf16 %v488_v16, %v486_v14  ;;  %v370_v19 = vpop.f32.mrb[14].mxu0  ;;  %v490_v20 = vpop.f32.mrb[14].mxu1 }
 0x110   :  { %v372_v21 = vpop.f32.mrb[15].mxu0  ;;  %v492_v22 = vpop.f32.mrb[15].mxu1 }
 0x111   :  { %854 = vst [vmem:[%s1520_s2 + $0x30] sm:$0xff] %v998_v17  ;;  %878 = vst [vmem:[%s1520_s2 + $0xf0] sm:$0xff] %v1022_v18  ;;  %v999_v23 = vpack.c.bf16 %v372_v21, %v370_v19  ;;  %v1023_v24 = vpack.c.bf16 %v492_v22, %v490_v20 }
 0x113   :  { %855 = vst [vmem:[%s1520_s2 + $0x38] sm:$0xff] %v999_v23  ;;  %879 = vst [vmem:[%s1520_s2 + $0xf8] sm:$0xff] %v1023_v24 }
 0x115   :  { %v376_v25 = vpop.f32.mrb[16].mxu0  ;;  %v1066_v26 = vpop.f32.mrb[16].mxu1 }
 0x116   :  { %882 = vst [vmem:[%s1521_s3 + $0x10] sm:$0xff] %v1066_v26  ;;  %v378_v27 = vpop.f32.mrb[17].mxu0  ;;  %v529_v28 = vpop.f32.mrb[17].mxu1 }
 0x117   :  { %v1000_v29 = vpack.c.bf16 %v378_v27, %v376_v25  ;;  %880 = vst [vmem:[%s1521_s3] sm:$0xff] %v529_v28  ;;  %v380_v30 = vpop.f32.mrb[18].mxu0  ;;  %v1067_v31 = vpop.f32.mrb[18].mxu1 }
 0x118   :  { %883 = vst [vmem:[%s1521_s3 + $0x18] sm:$0xff] %v1067_v31  ;;  %v382_v32 = vpop.f32.mrb[19].mxu0  ;;  %v532_v33 = vpop.f32.mrb[19].mxu1 }
 0x119   :  { %856 = vst [vmem:[%s1520_s2 + $0x40] sm:$0xff] %v1000_v29  ;;  %v1001_v34 = vpack.c.bf16 %v382_v32, %v380_v30  ;;  %881 = vst [vmem:[%s1521_s3 + $0x8] sm:$0xff] %v532_v33 }
 0x11b   :  { %857 = vst [vmem:[%s1520_s2 + $0x48] sm:$0xff] %v1001_v34 }
 0x11d   :  { %v386_v35 = vpop.f32.mrb[20].mxu0  ;;  %v1070_v36 = vpop.f32.mrb[20].mxu1 }
 0x11e   :  { %886 = vst [vmem:[%s1521_s3 + $0x30] sm:$0xff] %v1070_v36  ;;  %v388_v37 = vpop.f32.mrb[21].mxu0  ;;  %v545_v38 = vpop.f32.mrb[21].mxu1 }
 0x11f   :  { %v1002_v39 = vpack.c.bf16 %v388_v37, %v386_v35  ;;  %884 = vst [vmem:[%s1521_s3 + $0x20] sm:$0xff] %v545_v38  ;;  %v390_v40 = vpop.f32.mrb[22].mxu0  ;;  %v1071_v41 = vpop.f32.mrb[22].mxu1 }
 0x120   :  { %887 = vst [vmem:[%s1521_s3 + $0x38] sm:$0xff] %v1071_v41  ;;  %v392_v42 = vpop.f32.mrb[23].mxu0  ;;  %v548_v43 = vpop.f32.mrb[23].mxu1 }
 0x121   :  { %858 = vst [vmem:[%s1520_s2 + $0x50] sm:$0xff] %v1002_v39  ;;  %v1003_v44 = vpack.c.bf16 %v392_v42, %v390_v40  ;;  %885 = vst [vmem:[%s1521_s3 + $0x28] sm:$0xff] %v548_v43 }
 0x123   :  { %859 = vst [vmem:[%s1520_s2 + $0x58] sm:$0xff] %v1003_v44 }
 0x125   :  { %v396_v45 = vpop.f32.mrb[24].mxu0  ;;  %v1074_v46 = vpop.f32.mrb[24].mxu1 }
 0x126   :  { %890 = vst [vmem:[%s1521_s3 + $0x50] sm:$0xff] %v1074_v46  ;;  %v398_v47 = vpop.f32.mrb[25].mxu0  ;;  %v561_v48 = vpop.f32.mrb[25].mxu1 }
 0x127   :  { %v1004_v49 = vpack.c.bf16 %v398_v47, %v396_v45  ;;  %888 = vst [vmem:[%s1521_s3 + $0x40] sm:$0xff] %v561_v48  ;;  %v400_v50 = vpop.f32.mrb[26].mxu0  ;;  %v1075_v51 = vpop.f32.mrb[26].mxu1 }
 0x128   :  { %891 = vst [vmem:[%s1521_s3 + $0x58] sm:$0xff] %v1075_v51  ;;  %v402_v52 = vpop.f32.mrb[27].mxu0  ;;  %v564_v53 = vpop.f32.mrb[27].mxu1 }
 0x129   :  { %860 = vst [vmem:[%s1520_s2 + $0x60] sm:$0xff] %v1004_v49  ;;  %v1005_v54 = vpack.c.bf16 %v402_v52, %v400_v50  ;;  %889 = vst [vmem:[%s1521_s3 + $0x48] sm:$0xff] %v564_v53 }
 0x12b   :  { %861 = vst [vmem:[%s1520_s2 + $0x68] sm:$0xff] %v1005_v54 }
 0x12d   :  { %v406_v55 = vpop.f32.mrb[28].mxu0  ;;  %v1078_v56 = vpop.f32.mrb[28].mxu1 }
 0x12e   :  { %894 = vst [vmem:[%s1521_s3 + $0x70] sm:$0xff] %v1078_v56  ;;  %v408_v57 = vpop.f32.mrb[29].mxu0  ;;  %v577_v58 = vpop.f32.mrb[29].mxu1 }
 0x12f   :  { %v1006_v59 = vpack.c.bf16 %v408_v57, %v406_v55  ;;  %892 = vst [vmem:[%s1521_s3 + $0x60] sm:$0xff] %v577_v58  ;;  %v410_v60 = vpop.f32.mrb[30].mxu0  ;;  %v1079_v61 = vpop.f32.mrb[30].mxu1 }
 0x130   :  { %895 = vst [vmem:[%s1521_s3 + $0x78] sm:$0xff] %v1079_v61  ;;  %v412_v62 = vpop.f32.mrb[31].mxu0  ;;  %v580_v63 = vpop.f32.mrb[31].mxu1 }
 0x131   :  { %862 = vst [vmem:[%s1520_s2 + $0x70] sm:$0xff] %v1006_v59  ;;  %v1007_v0 = vpack.c.bf16 %v412_v62, %v410_v60  ;;  %893 = vst [vmem:[%s1521_s3 + $0x68] sm:$0xff] %v580_v63 }
 0x133   :  { %863 = vst [vmem:[%s1520_s2 + $0x78] sm:$0xff] %v1007_v0 }
 0x135   :  { %v416_v1 = vpop.f32.mrb[32].mxu0  ;;  %v1082_v2 = vpop.f32.mrb[32].mxu1 }
 0x136   :  { %898 = vst [vmem:[%s1521_s3 + $0x90] sm:$0xff] %v1082_v2  ;;  %v418_v3 = vpop.f32.mrb[33].mxu0  ;;  %v593_v4 = vpop.f32.mrb[33].mxu1 }
 0x137   :  { %v1008_v5 = vpack.c.bf16 %v418_v3, %v416_v1  ;;  %896 = vst [vmem:[%s1521_s3 + $0x80] sm:$0xff] %v593_v4  ;;  %v420_v6 = vpop.f32.mrb[34].mxu0  ;;  %v1083_v7 = vpop.f32.mrb[34].mxu1 }
 0x138   :  { %899 = vst [vmem:[%s1521_s3 + $0x98] sm:$0xff] %v1083_v7  ;;  %v422_v8 = vpop.f32.mrb[35].mxu0  ;;  %v596_v9 = vpop.f32.mrb[35].mxu1 }
 0x139   :  { %864 = vst [vmem:[%s1520_s2 + $0x80] sm:$0xff] %v1008_v5  ;;  %v1009_v10 = vpack.c.bf16 %v422_v8, %v420_v6  ;;  %897 = vst [vmem:[%s1521_s3 + $0x88] sm:$0xff] %v596_v9 }
 0x13b   :  { %865 = vst [vmem:[%s1520_s2 + $0x88] sm:$0xff] %v1009_v10 }
 0x13d   :  { %v426_v11 = vpop.f32.mrb[36].mxu0  ;;  %v1086_v12 = vpop.f32.mrb[36].mxu1 }
 0x13e   :  { %902 = vst [vmem:[%s1521_s3 + $0xb0] sm:$0xff] %v1086_v12  ;;  %v428_v13 = vpop.f32.mrb[37].mxu0  ;;  %v609_v14 = vpop.f32.mrb[37].mxu1 }
 0x13f   :  { %v1010_v15 = vpack.c.bf16 %v428_v13, %v426_v11  ;;  %900 = vst [vmem:[%s1521_s3 + $0xa0] sm:$0xff] %v609_v14  ;;  %v430_v16 = vpop.f32.mrb[38].mxu0  ;;  %v1087_v17 = vpop.f32.mrb[38].mxu1 }
 0x140   :  { %903 = vst [vmem:[%s1521_s3 + $0xb8] sm:$0xff] %v1087_v17  ;;  %v432_v18 = vpop.f32.mrb[39].mxu0  ;;  %v612_v19 = vpop.f32.mrb[39].mxu1 }
 0x141   :  { %866 = vst [vmem:[%s1520_s2 + $0x90] sm:$0xff] %v1010_v15  ;;  %v1011_v20 = vpack.c.bf16 %v432_v18, %v430_v16  ;;  %901 = vst [vmem:[%s1521_s3 + $0xa8] sm:$0xff] %v612_v19 }
 0x143   :  { %867 = vst [vmem:[%s1520_s2 + $0x98] sm:$0xff] %v1011_v20 }
 0x145   :  { %v436_v21 = vpop.f32.mrb[40].mxu0  ;;  %v1090_v22 = vpop.f32.mrb[40].mxu1 }
 0x146   :  { %906 = vst [vmem:[%s1521_s3 + $0xd0] sm:$0xff] %v1090_v22  ;;  %v438_v23 = vpop.f32.mrb[41].mxu0  ;;  %v625_v24 = vpop.f32.mrb[41].mxu1 }
 0x147   :  { %v1012_v25 = vpack.c.bf16 %v438_v23, %v436_v21  ;;  %904 = vst [vmem:[%s1521_s3 + $0xc0] sm:$0xff] %v625_v24  ;;  %v440_v26 = vpop.f32.mrb[42].mxu0  ;;  %v1091_v27 = vpop.f32.mrb[42].mxu1 }
 0x148   :  { %907 = vst [vmem:[%s1521_s3 + $0xd8] sm:$0xff] %v1091_v27  ;;  %v442_v28 = vpop.f32.mrb[43].mxu0  ;;  %v628_v29 = vpop.f32.mrb[43].mxu1 }
 0x149   :  { %868 = vst [vmem:[%s1520_s2 + $0xa0] sm:$0xff] %v1012_v25  ;;  %v1013_v30 = vpack.c.bf16 %v442_v28, %v440_v26  ;;  %905 = vst [vmem:[%s1521_s3 + $0xc8] sm:$0xff] %v628_v29 }
 0x14b   :  { %869 = vst [vmem:[%s1520_s2 + $0xa8] sm:$0xff] %v1013_v30 }
 0x14d   :  { %v446_v31 = vpop.f32.mrb[44].mxu0  ;;  %v1094_v32 = vpop.f32.mrb[44].mxu1 }
 0x14e   :  { %910 = vst [vmem:[%s1521_s3 + $0xf0] sm:$0xff] %v1094_v32  ;;  %v448_v33 = vpop.f32.mrb[45].mxu0  ;;  %v641_v34 = vpop.f32.mrb[45].mxu1 }
 0x14f   :  { %v1014_v35 = vpack.c.bf16 %v448_v33, %v446_v31  ;;  %908 = vst [vmem:[%s1521_s3 + $0xe0] sm:$0xff] %v641_v34  ;;  %v450_v36 = vpop.f32.mrb[46].mxu0  ;;  %v1095_v37 = vpop.f32.mrb[46].mxu1 }
 0x150   :  { %911 = vst [vmem:[%s1521_s3 + $0xf8] sm:$0xff] %v1095_v37  ;;  %v452_v38 = vpop.f32.mrb[47].mxu0  ;;  %v644_v39 = vpop.f32.mrb[47].mxu1 }
 0x151   :  { %870 = vst [vmem:[%s1520_s2 + $0xb0] sm:$0xff] %v1014_v35  ;;  %v1015_v40 = vpack.c.bf16 %v452_v38, %v450_v36  ;;  %909 = vst [vmem:[%s1521_s3 + $0xe8] sm:$0xff] %v644_v39 }
 0x153   :  { %871 = vst [vmem:[%s1520_s2 + $0xb8] sm:$0xff] %v1015_v40 }

// kernel: ddi_encoder_forward.7
= control target key start
LH: loop header
LB: loop body
LE: loop exit
PB: predicated region body
PF: predicated region fallthrough
CT: control target
= control target key end

     0   :  { %11 = vsyncpa [#allocation4], 0  ;;  %s1753_s21 = smov 0   ;;  %s1755_s22 = smov 0   ;;  %s2310_s0 = inlined_call_operand.vmem [shape: f32[3,2], index: 0, kind: input, shape index: {}]   ;;  %s2311_s1 = inlined_call_operand.vmem [shape: bf16[256,256], index: 1, kind: input, shape index: {}]   ;;  %s2312_s2 = inlined_call_operand.vmem [shape: f32[256,128], index: 2, kind: input, shape index: {}]   ;;  %s2313_s3 = inlined_call_operand.vmem [shape: s8[3,256,256], index: 3, kind: input, shape index: {}]   ;;  %s2314_s4 = inlined_call_operand.vmem [shape: f32[3,256,1], index: 4, kind: input, shape index: {}]   ;;  %s2315_s5 = inlined_call_operand.vmem [shape: f32[1,128], index: 5, kind: input, shape index: {}]   ;;  %s2316_s6 = inlined_call_operand.vmem [shape: f32[256,128], index: 6, kind: output, shape index: {}]  }
   0x1   :  { %s1757_s23 = smov 0  }
   0x2 LB: > { %s1502_s24 = sadd.s32 4294967295, %s1714_s23   ;;  %s26_s25 = sadd.s32 1, %s1710_s22  ;;  %s1714_s23 = sphi %s1757_s23, %s17_s23   ;;  %s1710_s22 = sphi %s1755_s22, %s2320_s22   ;;  %s1706_s21 = sphi %s1753_s21, %s2319_s21  }
   0x3   : > { %p27_p0 = scmp.ge.s32.totalorder %s26_s25, 3  ;;  %p1503_p1 = scmp.ge.s32.totalorder %s1714_s23, 1 }
   0x4   : > { %p205_p2 = scmp.lt.s32.totalorder %s1714_s23, 4  ;;  %p1778_p4 = scmp.eq.s32.totalorder %s1502_s24, 0 }
   0x5   : > { %s2322_s25 = smov (%p27_p0, %s26_s25), 0  ;;  %s218_s30 = sshll.u32 %s2310_s0, 4  ;;  %s219_s30 = int_to_ptr.vmem [resolvable:$true] %s218_s30 }
   0x6   : > { %p1774_p3 = pnand %p1503_p1, %p205_p2  ;;  %s1673_s7 = scalar_lea.vmem %s219_s30, 64 }
   0x7   : > { %p1674_p7 = scmp.ne.s32.totalorder %s219_s30, %s1673_s7  ;;  %p1681_p11 = scmp.lt.s32.totalorder %s219_s30, %s219_s30 }
   0x8   : > { %p1591_p5 = pneg %p1774_p3  ;;  %p1682_p12 = scmp.lt.s32.totalorder %s1673_s7, %s1673_s7 }
   0xa   : > { %p1592_p6 = pnand %p1778_p4, %p1591_p5  ;;  %p1683_p13 = por %p1682_p12, %p1681_p11 }
   0xc   : > { %p1675_p8 = pneg %p1592_p6 }
   0xe   : > { %p1676_p9 = pnand %p1675_p8, %p1674_p7 }
  0x10   : > { %p1677_p10 = pneg %p1676_p9 }
  0x12   : > { %p1684_p0 = pnand %p1683_p13, %p1677_p10 }
  0x14   : > { %1687 = shalt.err (!%p1684_p0)
}
  0x15   : > { %s1716_s8 = smov [#allocation3]   ;;  %273 = sbr.rel (%p1774_p3) target bundleno = 408 (0x198), region = 44 }
  0x16   : > { %1594 = dma.vmem_to_smem (!%p1592_p6), %s219_s30, 64, %s1716_s8, [#allocation4]  }
  0x1c   : > { %1701 = dma.done.wait (%p1778_p4), [#allocation4], 64  }
  0x1d   : > { %1703 = vsyncadd (%p1778_p4), [#allocation4], 4294967232 }
  0x1e   : > { %279 = sfence }
  0x1f   : > { %p330_p1 = scmp.lt.s32.totalorder %s1706_s21, 2  ;;  %p1513_p2 = scmp.ne.s32.totalorder %s1706_s21, 0 }
  0x20   : > { %v360_v0 = vld [vmem:[%s2312_s2] sm:$0xff] (!%p1513_p2)  ;;  %v361_v2 = vld [vmem:[%s2312_s2 + $0x8] sm:$0xff] (!%p1513_p2)  ;;  %v362_v5 = vld [vmem:[%s2312_s2 + $0x10] sm:$0xff] (!%p1513_p2) }
  0x21   : > { %s331_s9 = scalar_select %p330_p1, %s1706_s21, 2 }
  0x22   : > { %359 = sbr.rel (%p1513_p2) target bundleno = 53 (0x35), region = 52  ;;  %v1814_v1 = vld [vmem:[%s2315_s5] ss:$0 sm:$0xff] (!%p1513_p2)  ;;  %v363_v6 = vld [vmem:[%s2312_s2 + $0x18] sm:$0xff] (!%p1513_p2)  ;;  %v365_v11 = vld [vmem:[%s2312_s2 + $0x28] sm:$0xff] (!%p1513_p2) }
  0x23   : > { %s1553_s10 = sshll.u32 %s331_s9, 7  ;;  %s1554_s11 = sshll.u32 %s331_s9, 8  ;;  %v399_v3 = vadd.f32 (!%p1513_p2), %v1814_v1, %v360_v0  ;;  %v400_v4 = vadd.f32 (!%p1513_p2), %v1814_v1, %v361_v2  ;;  %v364_v7 = vld [vmem:[%s2312_s2 + $0x20] sm:$0xff] (!%p1513_p2)  ;;  %v401_v8 = vadd.f32 (!%p1513_p2), %v1814_v1, %v362_v5  ;;  %v402_v9 = vadd.f32 (!%p1513_p2), %v1814_v1, %v363_v6  ;;  %v366_v12 = vld [vmem:[%s2312_s2 + $0x30] sm:$0xff] (!%p1513_p2)  ;;  %v367_v13 = vld [vmem:[%s2312_s2 + $0x38] sm:$0xff] (!%p1513_p2) }
  0x24   : > { %s1800_s14 = scalar_lea.vmem %s2313_s3, %s1553_s10  ;;  %s1805_s17 = scalar_lea.vmem %s2314_s4, %s1554_s11  ;;  %v403_v10 = vadd.f32 (!%p1513_p2), %v1814_v1, %v364_v7  ;;  %v404_v14 = vadd.f32 (!%p1513_p2), %v1814_v1, %v365_v11  ;;  %v405_v15 = vadd.f32 (!%p1513_p2), %v1814_v1, %v366_v12  ;;  %v406_v16 = vadd.f32 (!%p1513_p2), %v1814_v1, %v367_v13  ;;  %v368_v17 = vld [vmem:[%s2312_s2 + $0x40] sm:$0xff] (!%p1513_p2)  ;;  %v369_v18 = vld [vmem:[%s2312_s2 + $0x48] sm:$0xff] (!%p1513_p2)  ;;  %v370_v19 = vld [vmem:[%s2312_s2 + $0x50] sm:$0xff] (!%p1513_p2) }
  0x25   : > { %431 = vst [vmem:[#allocation2] sm:$0xff] (!%p1513_p2), %v399_v3  ;;  %432 = vst [vmem:[#allocation2 + $0x8] sm:$0xff] (!%p1513_p2), %v400_v4  ;;  %v407_v20 = vadd.f32 (!%p1513_p2), %v1814_v1, %v368_v17  ;;  %v408_v21 = vadd.f32 (!%p1513_p2), %v1814_v1, %v369_v18  ;;  %v409_v22 = vadd.f32 (!%p1513_p2), %v1814_v1, %v370_v19  ;;  %v371_v23 = vld [vmem:[%s2312_s2 + $0x58] sm:$0xff] (!%p1513_p2)  ;;  %v372_v24 = vld [vmem:[%s2312_s2 + $0x60] sm:$0xff] (!%p1513_p2) }
  0x26   : > { %433 = vst [vmem:[#allocation2 + $0x10] sm:$0xff] (!%p1513_p2), %v401_v8  ;;  %434 = vst [vmem:[#allocation2 + $0x18] sm:$0xff] (!%p1513_p2), %v402_v9  ;;  %v373_v25 = vld [vmem:[%s2312_s2 + $0x68] sm:$0xff] (!%p1513_p2)  ;;  %v410_v26 = vadd.f32 (!%p1513_p2), %v1814_v1, %v371_v23  ;;  %v411_v27 = vadd.f32 (!%p1513_p2), %v1814_v1, %v372_v24  ;;  %v374_v29 = vld [vmem:[%s2312_s2 + $0x70] sm:$0xff] (!%p1513_p2) }
  0x27   : > { %435 = vst [vmem:[#allocation2 + $0x20] sm:$0xff] (!%p1513_p2), %v403_v10  ;;  %436 = vst [vmem:[#allocation2 + $0x28] sm:$0xff] (!%p1513_p2), %v404_v14  ;;  %v412_v28 = vadd.f32 (!%p1513_p2), %v1814_v1, %v373_v25  ;;  %v375_v30 = vld [vmem:[%s2312_s2 + $0x78] sm:$0xff] (!%p1513_p2)  ;;  %v376_v31 = vld [vmem:[%s2312_s2 + $0x80] sm:$0xff] (!%p1513_p2)  ;;  %v413_v32 = vadd.f32 (!%p1513_p2), %v1814_v1, %v374_v29 }
  0x28   : > { %437 = vst [vmem:[#allocation2 + $0x30] sm:$0xff] (!%p1513_p2), %v405_v15  ;;  %438 = vst [vmem:[#allocation2 + $0x38] sm:$0xff] (!%p1513_p2), %v406_v16  ;;  %v414_v33 = vadd.f32 (!%p1513_p2), %v1814_v1, %v375_v30  ;;  %v415_v34 = vadd.f32 (!%p1513_p2), %v1814_v1, %v376_v31  ;;  %v377_v35 = vld [vmem:[%s2312_s2 + $0x88] sm:$0xff] (!%p1513_p2)  ;;  %v378_v36 = vld [vmem:[%s2312_s2 + $0x90] sm:$0xff] (!%p1513_p2) }
  0x29   : > { %439 = vst [vmem:[#allocation2 + $0x40] sm:$0xff] %v407_v20  ;;  %440 = vst [vmem:[#allocation2 + $0x48] sm:$0xff] %v408_v21  ;;  %v379_v37 = vld [vmem:[%s2312_s2 + $0x98] sm:$0xff]  ;;  %v416_v38 = vadd.f32 %v1814_v1, %v377_v35  ;;  %v417_v39 = vadd.f32 %v1814_v1, %v378_v36  ;;  %v380_v41 = vld [vmem:[%s2312_s2 + $0xa0] sm:$0xff] }
  0x2a   : > { %441 = vst [vmem:[#allocation2 + $0x50] sm:$0xff] %v409_v22  ;;  %442 = vst [vmem:[#allocation2 + $0x58] sm:$0xff] %v410_v26  ;;  %v418_v40 = vadd.f32 %v1814_v1, %v379_v37  ;;  %v381_v42 = vld [vmem:[%s2312_s2 + $0xa8] sm:$0xff]  ;;  %v382_v43 = vld [vmem:[%s2312_s2 + $0xb0] sm:$0xff]  ;;  %v419_v44 = vadd.f32 %v1814_v1, %v380_v41 }
  0x2b   : > { %443 = vst [vmem:[#allocation2 + $0x60] sm:$0xff] %v411_v27  ;;  %444 = vst [vmem:[#allocation2 + $0x68] sm:$0xff] %v412_v28  ;;  %v420_v45 = vadd.f32 %v1814_v1, %v381_v42  ;;  %v421_v46 = vadd.f32 %v1814_v1, %v382_v43  ;;  %v383_v47 = vld [vmem:[%s2312_s2 + $0xb8] sm:$0xff]  ;;  %v384_v48 = vld [vmem:[%s2312_s2 + $0xc0] sm:$0xff] }
  0x2c   : > { %445 = vst [vmem:[#allocation2 + $0x70] sm:$0xff] %v413_v32  ;;  %446 = vst [vmem:[#allocation2 + $0x78] sm:$0xff] %v414_v33  ;;  %v385_v49 = vld [vmem:[%s2312_s2 + $0xc8] sm:$0xff]  ;;  %v422_v50 = vadd.f32 %v1814_v1, %v383_v47  ;;  %v423_v51 = vadd.f32 %v1814_v1, %v384_v48  ;;  %v386_v53 = vld [vmem:[%s2312_s2 + $0xd0] sm:$0xff] }
  0x2d   : > { %447 = vst [vmem:[#allocation2 + $0x80] sm:$0xff] %v415_v34  ;;  %448 = vst [vmem:[#allocation2 + $0x88] sm:$0xff] %v416_v38  ;;  %v424_v52 = vadd.f32 %v1814_v1, %v385_v49  ;;  %v387_v54 = vld [vmem:[%s2312_s2 + $0xd8] sm:$0xff]  ;;  %v388_v55 = vld [vmem:[%s2312_s2 + $0xe0] sm:$0xff]  ;;  %v425_v56 = vadd.f32 %v1814_v1, %v386_v53 }
  0x2e   : > { %449 = vst [vmem:[#allocation2 + $0x90] sm:$0xff] %v417_v39  ;;  %450 = vst [vmem:[#allocation2 + $0x98] sm:$0xff] %v418_v40  ;;  %v426_v57 = vadd.f32 %v1814_v1, %v387_v54  ;;  %v427_v58 = vadd.f32 %v1814_v1, %v388_v55  ;;  %v389_v59 = vld [vmem:[%s2312_s2 + $0xe8] sm:$0xff]  ;;  %v390_v60 = vld [vmem:[%s2312_s2 + $0xf0] sm:$0xff] }
  0x2f   : > { %451 = vst [vmem:[#allocation2 + $0xa0] sm:$0xff] %v419_v44  ;;  %452 = vst [vmem:[#allocation2 + $0xa8] sm:$0xff] %v420_v45  ;;  %v391_v61 = vld [vmem:[%s2312_s2 + $0xf8] sm:$0xff]  ;;  %v428_v62 = vadd.f32 %v1814_v1, %v389_v59  ;;  %v429_v63 = vadd.f32 %v1814_v1, %v390_v60 }
  0x30   : > { %453 = vst [vmem:[#allocation2 + $0xb0] sm:$0xff] %v421_v46  ;;  %454 = vst [vmem:[#allocation2 + $0xb8] sm:$0xff] %v422_v50  ;;  %v430_v0 = vadd.f32 %v1814_v1, %v391_v61 }
  0x31   : > { %455 = vst [vmem:[#allocation2 + $0xc0] sm:$0xff] %v423_v51  ;;  %456 = vst [vmem:[#allocation2 + $0xc8] sm:$0xff] %v424_v52 }
  0x32   : > { %457 = vst [vmem:[#allocation2 + $0xd0] sm:$0xff] %v425_v56  ;;  %458 = vst [vmem:[#allocation2 + $0xd8] sm:$0xff] %v426_v57 }
  0x33   : > { %459 = vst [vmem:[#allocation2 + $0xe0] sm:$0xff] %v427_v58  ;;  %460 = vst [vmem:[#allocation2 + $0xe8] sm:$0xff] %v428_v62 }
  0x34   : > { %461 = vst [vmem:[#allocation2 + $0xf0] sm:$0xff] %v429_v63  ;;  %462 = vst [vmem:[#allocation2 + $0xf8] sm:$0xff] %v430_v0 }
  0x35 PF: > { %v1625_v2 = vld [vmem:[%s2311_s1 + $0x4] ss:$8 sps:$4 sm:$0xff]   ;;  %v1627_v3 = vld [vmem:[%s2311_s1] ss:$8 sps:$4 sm:$0xff]   ;;  %v1717_v4 = vmov 0   ;;  %v1032_v21 = vld [vmem:[%s1805_s17 + $0x10] sm:$0xff] }
  0x36   : > { %1624 = vset.pattern.permute.xlu1 %v1717_v4  ;;  %1623 = vset.pattern.permute.xlu0 %v1717_v4  ;;  %v1628_v1 = vld [vmem:[%s2311_s1 + $0x14] ss:$8 sps:$4 sm:$0xff]   ;;  %v1630_v5 = vld [vmem:[%s2311_s1 + $0x10] ss:$8 sps:$4 sm:$0xff]   ;;  %v1631_v6 = vld [vmem:[%s2311_s1 + $0x24] ss:$8 sps:$4 sm:$0xff]  }
  0x37   : > { %703 = vmatprep.subr.bf16.mxu0 %v1625_v2  ;;  %1555 = vmatprep.subr.bf16.mxu1 %v1625_v2  ;;  %v1633_v7 = vld [vmem:[%s2311_s1 + $0x20] ss:$8 sps:$4 sm:$0xff]   ;;  %v1634_v8 = vld [vmem:[%s2311_s1 + $0x34] ss:$8 sps:$4 sm:$0xff]   ;;  %v1636_v9 = vld [vmem:[%s2311_s1 + $0x30] ss:$8 sps:$4 sm:$0xff]  }
  0x38   : > { %704 = vmatpush1.bf16.msra.mxu0 %v1627_v3  ;;  %1571 = vmatpush1.bf16.msra.mxu1 %v1627_v3  ;;  %v1637_v10 = vld [vmem:[%s2311_s1 + $0x44] ss:$8 sps:$4 sm:$0xff]   ;;  %v1639_v11 = vld [vmem:[%s2311_s1 + $0x40] ss:$8 sps:$4 sm:$0xff]   ;;  %v1640_v12 = vld [vmem:[%s2311_s1 + $0x54] ss:$8 sps:$4 sm:$0xff]  }
  0x39   : > { %705 = vmatprep.subr.bf16.mxu0 %v1628_v1  ;;  %1556 = vmatprep.subr.bf16.mxu1 %v1628_v1  ;;  %v1642_v13 = vld [vmem:[%s2311_s1 + $0x50] ss:$8 sps:$4 sm:$0xff]   ;;  %v1643_v14 = vld [vmem:[%s2311_s1 + $0x64] ss:$8 sps:$4 sm:$0xff]   ;;  %v1645_v19 = vld [vmem:[%s2311_s1 + $0x60] ss:$8 sps:$4 sm:$0xff]  }
  0x3a   : > { %v1981_v15 = vld [vmem:[%s1800_s14 + $0x8] sm:$0xff]  ;;  %v1646_v20 = vld [vmem:[%s2311_s1 + $0x74] ss:$8 sps:$4 sm:$0xff]   ;;  %v1030_v22 = vld [vmem:[%s1805_s17] sm:$0xff]  ;;  %1074 = vperm.xlu1 %1624, %v1032_v21   ;;  %p1548_p3 = scmp.ne.s32.totalorder %s1706_s21, 2 }
  0x3b   : > { %v1984_v16 = vld [vmem:[%s1800_s14 + $0x48] sm:$0xff]  ;;  %v480_v17 = vunpack.c.l.s8.bf16 %v1981_v15  ;;  %1064 = vperm.xlu0 %1623, %v1030_v22   ;;  %v1648_v23 = vld [vmem:[%s2311_s1 + $0x70] ss:$8 sps:$4 sm:$0xff]   ;;  %v1034_v29 = vld [vmem:[%s1805_s17 + $0x20] sm:$0xff]  ;;  %v482_v62 = vunpack.c.h.s8.bf16 %v1981_v15 }
  0x3c   : > { %706 = vmatpush1.bf16.msra.mxu0 %v1630_v5  ;;  %1572 = vmatpush1.bf16.msra.mxu1 %v1630_v5  ;;  %v496_v18 = vunpack.c.l.s8.bf16 %v1984_v16  ;;  %v1033_v24 = vld [vmem:[%s1805_s17 + $0x18] sm:$0xff]  ;;  %v1031_v25 = vld [vmem:[%s1805_s17 + $0x8] sm:$0xff]  ;;  %v1036_v33 = vld [vmem:[%s1805_s17 + $0x30] sm:$0xff]  ;;  %v498_v63 = vunpack.c.h.s8.bf16 %v1984_v16 }
  0x3d   : > { %707 = vmatprep.subr.bf16.mxu0 %v1631_v6  ;;  %1557 = vmatprep.subr.bf16.mxu1 %v1631_v6  ;;  %v1649_v26 = vld [vmem:[%s2311_s1 + $0x84] ss:$8 sps:$4 sm:$0xff]   ;;  %v1651_v27 = vld [vmem:[%s2311_s1 + $0x80] ss:$8 sps:$4 sm:$0xff]   ;;  %v1652_v30 = vld [vmem:[%s2311_s1 + $0x94] ss:$8 sps:$4 sm:$0xff]  }
  0x3e   : > { %735 = vmatprep.mubr.bf16.mxu0 %v480_v17  ;;  %815 = vmatprep.mubr.bf16.mxu1 %v496_v18  ;;  %v1035_v28 = vld [vmem:[%s1805_s17 + $0x28] sm:$0xff]  ;;  %v1654_v31 = vld [vmem:[%s2311_s1 + $0x90] ss:$8 sps:$4 sm:$0xff]   ;;  %v1038_v37 = vld [vmem:[%s1805_s17 + $0x40] sm:$0xff] }
  0x3f   : > { %1079 = vperm.xlu1 %1624, %v1033_v24   ;;  %1069 = vperm.xlu0 %1623, %v1031_v25   ;;  %v1037_v32 = vld [vmem:[%s1805_s17 + $0x38] sm:$0xff]  ;;  %v1655_v34 = vld [vmem:[%s2311_s1 + $0xa4] ss:$8 sps:$4 sm:$0xff]   ;;  %v1657_v35 = vld [vmem:[%s2311_s1 + $0xa0] ss:$8 sps:$4 sm:$0xff]  }
  0x40   : > { %708 = vmatpush1.bf16.msra.mxu0 %v1633_v7  ;;  %1573 = vmatpush1.bf16.msra.mxu1 %v1633_v7  ;;  %v1039_v36 = vld [vmem:[%s1805_s17 + $0x48] sm:$0xff]  ;;  %v1658_v38 = vld [vmem:[%s2311_s1 + $0xb4] ss:$8 sps:$4 sm:$0xff]   ;;  %v1660_v39 = vld [vmem:[%s2311_s1 + $0xb0] ss:$8 sps:$4 sm:$0xff]  }
  0x41   : > { %709 = vmatprep.subr.bf16.mxu0 %v1634_v8  ;;  %1558 = vmatprep.subr.bf16.mxu1 %v1634_v8  ;;  %v1041_v40 = vld [vmem:[%s1805_s17 + $0x58] sm:$0xff]  ;;  %v1040_v41 = vld [vmem:[%s1805_s17 + $0x50] sm:$0xff]  ;;  %v1661_v42 = vld [vmem:[%s2311_s1 + $0xc4] ss:$8 sps:$4 sm:$0xff]  }
  0x42   : > { %v1663_v43 = vld [vmem:[%s2311_s1 + $0xc0] ss:$8 sps:$4 sm:$0xff]   ;;  %v1664_v46 = vld [vmem:[%s2311_s1 + $0xd4] ss:$8 sps:$4 sm:$0xff]   ;;  %v1666_v47 = vld [vmem:[%s2311_s1 + $0xd0] ss:$8 sps:$4 sm:$0xff]  }
  0x43   : > { %1089 = vperm.xlu1 %1624, %v1035_v28   ;;  %1084 = vperm.xlu0 %1623, %v1034_v29   ;;  %v1043_v44 = vld [vmem:[%s1805_s17 + $0x68] sm:$0xff]  ;;  %v1042_v45 = vld [vmem:[%s1805_s17 + $0x60] sm:$0xff]  ;;  %v1045_v48 = vld [vmem:[%s1805_s17 + $0x78] sm:$0xff] }
  0x44   : > { %710 = vmatpush1.bf16.msra.mxu0 %v1636_v9  ;;  %1574 = vmatpush1.bf16.msra.mxu1 %v1636_v9  ;;  %v1044_v49 = vld [vmem:[%s1805_s17 + $0x70] sm:$0xff]  ;;  %v1667_v50 = vld [vmem:[%s2311_s1 + $0xe4] ss:$8 sps:$4 sm:$0xff]   ;;  %v1669_v51 = vld [vmem:[%s2311_s1 + $0xe0] ss:$8 sps:$4 sm:$0xff]  }
  0x45   : > { %711 = vmatprep.subr.bf16.mxu0 %v1637_v10  ;;  %1559 = vmatprep.subr.bf16.mxu1 %v1637_v10  ;;  %v1047_v52 = vld [vmem:[%s1805_s17 + $0x88] sm:$0xff]  ;;  %v1046_v53 = vld [vmem:[%s1805_s17 + $0x80] sm:$0xff]  ;;  %v1670_v54 = vld [vmem:[%s2311_s1 + $0xf4] ss:$8 sps:$4 sm:$0xff]  }
  0x46   : > { %v1672_v55 = vld [vmem:[%s2311_s1 + $0xf0] ss:$8 sps:$4 sm:$0xff]   ;;  %v463_v56 = vld [vmem:[%s1800_s14] sm:$0xff]  ;;  %v1051_v0 = vld [vmem:[%s1805_s17 + $0xa8] sm:$0xff] }
  0x47   : > { %1099 = vperm.xlu1 %1624, %v1037_v32   ;;  %1094 = vperm.xlu0 %1623, %v1036_v33   ;;  %v471_v57 = vld [vmem:[%s1800_s14 + $0x40] sm:$0xff]  ;;  %v1049_v58 = vld [vmem:[%s1805_s17 + $0x98] sm:$0xff]  ;;  %v1048_v59 = vld [vmem:[%s1805_s17 + $0x90] sm:$0xff]  ;;  %v479_v60 = vunpack.c.l.s8.bf16 %v463_v56  ;;  %v481_v6 = vunpack.c.h.s8.bf16 %v463_v56 }
  0x48   : > { %712 = vmatpush1.bf16.msra.mxu0 %v1639_v11  ;;  %1575 = vmatpush1.bf16.msra.mxu1 %v1639_v11  ;;  %v495_v61 = vunpack.c.l.s8.bf16 %v471_v57  ;;  %v1050_v2 = vld [vmem:[%s1805_s17 + $0xa0] sm:$0xff]  ;;  %v466_v3 = vld [vmem:[%s1800_s14 + $0x18] sm:$0xff]  ;;  %v1052_v5 = vld [vmem:[%s1805_s17 + $0xb0] sm:$0xff]  ;;  %v497_v7 = vunpack.c.h.s8.bf16 %v471_v57 }
  0x49   : > { %713 = vmatprep.subr.bf16.mxu0 %v1640_v12  ;;  %1560 = vmatprep.subr.bf16.mxu1 %v1640_v12  ;;  %v474_v4 = vld [vmem:[%s1800_s14 + $0x58] sm:$0xff]  ;;  %v484_v8 = vunpack.c.l.s8.bf16 %v466_v3  ;;  %v1055_v10 = vld [vmem:[%s1805_s17 + $0xc8] sm:$0xff]  ;;  %v1054_v11 = vld [vmem:[%s1805_s17 + $0xc0] sm:$0xff]  ;;  %v486_v18 = vunpack.c.h.s8.bf16 %v466_v3 }
  0x4a   : > { %v1053_v1 = vld [vmem:[%s1805_s17 + $0xb8] sm:$0xff]  ;;  %v500_v9 = vunpack.c.l.s8.bf16 %v474_v4  ;;  %v465_v12 = vld [vmem:[%s1800_s14 + $0x10] sm:$0xff]  ;;  %v1058_v21 = vld [vmem:[%s1805_s17 + $0xe0] sm:$0xff] }
  0x4b   : > { %1109 = vperm.xlu1 %1624, %v1039_v36   ;;  %1104 = vperm.xlu0 %1623, %v1038_v37   ;;  %v1056_v15 = vld [vmem:[%s1805_s17 + $0xd0] sm:$0xff]  ;;  %v483_v16 = vunpack.c.l.s8.bf16 %v465_v12  ;;  %v468_v22 = vld [vmem:[%s1800_s14 + $0x28] sm:$0xff]  ;;  %v1061_v24 = vld [vmem:[%s1805_s17 + $0xf8] sm:$0xff] }
  0x4c   : > { %714 = vmatpush1.bf16.msra.mxu0 %v1642_v13  ;;  %1576 = vmatpush1.bf16.msra.mxu1 %v1642_v13  ;;  %v473_v13 = vld [vmem:[%s1800_s14 + $0x50] sm:$0xff]  ;;  %v488_v28 = vunpack.c.l.s8.bf16 %v468_v22  ;;  %v470_v36 = vld [vmem:[%s1800_s14 + $0x38] sm:$0xff] }
  0x4d   : > { %715 = vmatprep.subr.bf16.mxu0 %v1643_v14  ;;  %1561 = vmatprep.subr.bf16.mxu1 %v1643_v14  ;;  %v1057_v14 = vld [vmem:[%s1805_s17 + $0xd8] sm:$0xff]  ;;  %v499_v17 = vunpack.c.l.s8.bf16 %v473_v13  ;;  %v1060_v25 = vld [vmem:[%s1805_s17 + $0xf0] sm:$0xff] }
  0x4e   : > { %v478_v37 = vld [vmem:[%s1800_s14 + $0x78] sm:$0xff] }
  0x4f   : > { %1119 = vperm.xlu1 %1624, %v1041_v40   ;;  %1114 = vperm.xlu0 %1623, %v1040_v41   ;;  %v492_v40 = vunpack.c.l.s8.bf16 %v470_v36  ;;  %v508_v41 = vunpack.c.l.s8.bf16 %v478_v37 }
  0x50   : > { %716 = vmatpush1.bf16.msra.mxu0 %v1645_v19  ;;  %1577 = vmatpush1.bf16.msra.mxu1 %v1645_v19  ;;  %v502_v19 = vunpack.c.h.s8.bf16 %v474_v4 }
  0x51   : > { %717 = vmatprep.subr.bf16.mxu0 %v1646_v20  ;;  %1562 = vmatprep.subr.bf16.mxu1 %v1646_v20  ;;  %v1059_v20 = vld [vmem:[%s1805_s17 + $0xe8] sm:$0xff] }
  0x53   : > { %1129 = vperm.xlu1 %1624, %v1043_v44   ;;  %1124 = vperm.xlu0 %1623, %v1042_v45  }
  0x54   : > { %718 = vmatpush1.bf16.msra.mxu0 %v1648_v23  ;;  %1578 = vmatpush1.bf16.msra.mxu1 %v1648_v23  ;;  %v476_v23 = vld [vmem:[%s1800_s14 + $0x68] sm:$0xff] }
  0x55   : > { %719 = vmatprep.subr.bf16.mxu0 %v1649_v26  ;;  %1563 = vmatprep.subr.bf16.mxu1 %v1649_v26  ;;  %v485_v26 = vunpack.c.h.s8.bf16 %v465_v12  ;;  %v504_v29 = vunpack.c.l.s8.bf16 %v476_v23 }
  0x57   : > { %1139 = vperm.xlu1 %1624, %v1045_v48   ;;  %1134 = vperm.xlu0 %1623, %v1044_v49  }
  0x58   : > { %720 = vmatpush1.bf16.msra.mxu0 %v1651_v27  ;;  %1579 = vmatpush1.bf16.msra.mxu1 %v1651_v27  ;;  %v501_v27 = vunpack.c.h.s8.bf16 %v473_v13 }
  0x59   : > { %721 = vmatprep.subr.bf16.mxu0 %v1652_v30  ;;  %1564 = vmatprep.subr.bf16.mxu1 %v1652_v30  ;;  %v467_v30 = vld [vmem:[%s1800_s14 + $0x20] sm:$0xff] }
  0x5a   : > { %v487_v32 = vunpack.c.l.s8.bf16 %v467_v30 }
  0x5b   : > { %1149 = vperm.xlu1 %1624, %v1047_v52   ;;  %1144 = vperm.xlu0 %1623, %v1046_v53  }
  0x5c   : > { %722 = vmatpush1.bf16.msra.mxu0 %v1654_v31  ;;  %1580 = vmatpush1.bf16.msra.mxu1 %v1654_v31  ;;  %v475_v31 = vld [vmem:[%s1800_s14 + $0x60] sm:$0xff] }
  0x5d   : > { %723 = vmatprep.subr.bf16.mxu0 %v1655_v34  ;;  %1565 = vmatprep.subr.bf16.mxu1 %v1655_v34  ;;  %v503_v33 = vunpack.c.l.s8.bf16 %v475_v31  ;;  %v490_v34 = vunpack.c.h.s8.bf16 %v468_v22 }
  0x5f   : > { %1159 = vperm.xlu1 %1624, %v1049_v58   ;;  %1154 = vperm.xlu0 %1623, %v1048_v59  }
  0x60   : > { %724 = vmatpush1.bf16.msra.mxu0 %v1657_v35  ;;  %1581 = vmatpush1.bf16.msra.mxu1 %v1657_v35  ;;  %v506_v35 = vunpack.c.h.s8.bf16 %v476_v23  ;;  %v998_v23 = vld [vmem:[#allocation2] sm:$0xff] }
  0x61   : > { %725 = vmatprep.subr.bf16.mxu0 %v1658_v38  ;;  %1566 = vmatprep.subr.bf16.mxu1 %v1658_v38  ;;  %v489_v38 = vunpack.c.h.s8.bf16 %v467_v30  ;;  %v999_v30 = vld [vmem:[#allocation2 + $0x8] sm:$0xff] }
  0x63   : > { %1169 = vperm.xlu1 %1624, %v1051_v0   ;;  %1164 = vperm.xlu0 %1623, %v1050_v2  }
  0x64   : > { %726 = vmatpush1.bf16.msra.mxu0 %v1660_v39  ;;  %1582 = vmatpush1.bf16.msra.mxu1 %v1660_v39  ;;  %v505_v39 = vunpack.c.h.s8.bf16 %v475_v31  ;;  %v1015_v31 = vld [vmem:[#allocation2 + $0x88] sm:$0xff] }
  0x65   : > { %727 = vmatprep.subr.bf16.mxu0 %v1661_v42  ;;  %1567 = vmatprep.subr.bf16.mxu1 %v1661_v42  ;;  %v469_v42 = vld [vmem:[%s1800_s14 + $0x30] sm:$0xff] }
  0x66   : > { %v491_v44 = vunpack.c.l.s8.bf16 %v469_v42  ;;  %v493_v48 = vunpack.c.h.s8.bf16 %v469_v42 }
  0x67   : > { %1179 = vperm.xlu1 %1624, %v1053_v1   ;;  %1174 = vperm.xlu0 %1623, %v1052_v5  }
  0x68   : > { %728 = vmatpush1.bf16.msra.mxu0 %v1663_v43  ;;  %1583 = vmatpush1.bf16.msra.mxu1 %v1663_v43  ;;  %v477_v43 = vld [vmem:[%s1800_s14 + $0x70] sm:$0xff]  ;;  %s1547_s14 = sshll.u32 %s1706_s21, 7 }
  0x69   : > { %729 = vmatprep.subr.bf16.mxu0 %v1664_v46  ;;  %1568 = vmatprep.subr.bf16.mxu1 %v1664_v46  ;;  %v507_v45 = vunpack.c.l.s8.bf16 %v477_v43  ;;  %v494_v46 = vunpack.c.h.s8.bf16 %v470_v36  ;;  %v509_v49 = vunpack.c.h.s8.bf16 %v477_v43  ;;  %s931_s17 = sadd.s32 1, %s1547_s14  ;;  %s897_s26 = sld [smem:[#allocation3 + %s1547_s14]] }
  0x6a   : > { %s932_s27 = sld [smem:[#allocation3 + %s931_s17]] }
  0x6b   : > { %1189 = vperm.xlu1 %1624, %v1055_v10   ;;  %1184 = vperm.xlu0 %1623, %v1054_v11  }
  0x6c   : > { %730 = vmatpush1.bf16.msra.mxu0 %v1666_v47  ;;  %1584 = vmatpush1.bf16.msra.mxu1 %v1666_v47  ;;  %v510_v47 = vunpack.c.h.s8.bf16 %v478_v37 }
  0x6d   : > { %731 = vmatprep.subr.bf16.mxu0 %v1667_v50  ;;  %1569 = vmatprep.subr.bf16.mxu1 %v1667_v50 }
  0x6f   : > { %1199 = vperm.xlu1 %1624, %v1057_v14   ;;  %1194 = vperm.xlu0 %1623, %v1056_v15   ;;  %v2118_v0 = vstv %s897_s26 }
  0x70   : > { %732 = vmatpush1.bf16.msra.mxu0 %v1669_v51  ;;  %1585 = vmatpush1.bf16.msra.mxu1 %v1669_v51  ;;  %v2124_v4 = vstv %s932_s27 }
  0x71   : > { %733 = vmatprep.subr.bf16.mxu0 %v1670_v54  ;;  %1570 = vmatprep.subr.bf16.mxu1 %v1670_v54 }
  0x73   : > { %1209 = vperm.xlu1 %1624, %v1059_v20   ;;  %1204 = vperm.xlu0 %1623, %v1058_v21  }
  0x74   : > { %734 = vmatpush1.bf16.msra.mxu0 %v1672_v55  ;;  %1586 = vmatpush1.bf16.msra.mxu1 %v1672_v55 }
  0x77   : > { %736 = vmatmul.mubr.bf16.vlgmr.msra.gmra.mrb[0].mxu0 %v479_v60  ;;  %816 = vmatmul.mubr.bf16.vlgmr.msra.gmra.mrb[0].mxu1 %v495_v61 }
  0x78   : > { %745 = vmatprep.mubr.bf16.mxu0 %v482_v62  ;;  %825 = vmatprep.mubr.bf16.mxu1 %v498_v63 }
  0x79   : > { %1219 = vperm.xlu1 %1624, %v1061_v24   ;;  %1214 = vperm.xlu0 %1623, %v1060_v25   ;;  %v1014_v24 = vld [vmem:[#allocation2 + $0x80] sm:$0xff] }
  0x7f   : > { %746 = vmatmul.mubr.bf16.gmra.mrb[4].mxu0 %v481_v6  ;;  %826 = vmatmul.mubr.bf16.gmra.mrb[4].mxu1 %v497_v7 }
  0x80   : > { %755 = vmatprep.mubr.bf16.mxu0 %v484_v8  ;;  %835 = vmatprep.mubr.bf16.mxu1 %v500_v9 }
  0x87   : > { %756 = vmatmul.mubr.bf16.gmra.mrb[8].mxu0 %v483_v16  ;;  %836 = vmatmul.mubr.bf16.gmra.mrb[8].mxu1 %v499_v17 }
  0x88   : > { %765 = vmatprep.mubr.bf16.mxu0 %v486_v18  ;;  %845 = vmatprep.mubr.bf16.mxu1 %v502_v19 }
  0x8f   : > { %766 = vmatmul.mubr.bf16.gmra.mrb[12].mxu0 %v485_v26  ;;  %846 = vmatmul.mubr.bf16.gmra.mrb[12].mxu1 %v501_v27 }
  0x90   : > { %775 = vmatprep.mubr.bf16.mxu0 %v488_v28  ;;  %855 = vmatprep.mubr.bf16.mxu1 %v504_v29 }
  0x97   : > { %776 = vmatmul.mubr.bf16.gmra.mrb[16].mxu0 %v487_v32  ;;  %856 = vmatmul.mubr.bf16.gmra.mrb[16].mxu1 %v503_v33 }
  0x98   : > { %785 = vmatprep.mubr.bf16.mxu0 %v490_v34  ;;  %865 = vmatprep.mubr.bf16.mxu1 %v506_v35 }
  0x9f   : > { %786 = vmatmul.mubr.bf16.gmra.mrb[20].mxu0 %v489_v38  ;;  %866 = vmatmul.mubr.bf16.gmra.mrb[20].mxu1 %v505_v39 }
  0xa0   : > { %795 = vmatprep.mubr.bf16.mxu0 %v492_v40  ;;  %875 = vmatprep.mubr.bf16.mxu1 %v508_v41 }
  0xa7   : > { %796 = vmatmul.mubr.bf16.gmra.mrb[24].mxu0 %v491_v44  ;;  %876 = vmatmul.mubr.bf16.gmra.mrb[24].mxu1 %v507_v45 }
  0xa8   : > { %805 = vmatprep.mubr.bf16.mxu0 %v494_v46  ;;  %885 = vmatprep.mubr.bf16.mxu1 %v510_v47 }
  0xaf   : > { %806 = vmatmul.mubr.bf16.gmra.mrb[28].mxu0 %v493_v48  ;;  %886 = vmatmul.mubr.bf16.gmra.mrb[28].mxu1 %v509_v49 }
  0xb9   : > { %v2093_v50 = vpop.permute.xlu1 %1074 }
  0xba   : > { %v1065_v51 = vpop.permute.xlu0 %1064 }
  0xbe   : > { %v2095_v52 = vpop.permute.xlu1 %1079  ;;  %v1070_v53 = vpop.permute.xlu0 %1069 }
  0xc2   : > { %v2097_v54 = vpop.permute.xlu1 %1089  ;;  %v2099_v55 = vpop.permute.xlu0 %1084 }
  0xc6   : > { %v2101_v56 = vpop.permute.xlu1 %1099  ;;  %v2103_v57 = vpop.permute.xlu0 %1094 }
  0xca   : > { %v2105_v58 = vpop.permute.xlu1 %1109  ;;  %v2107_v59 = vpop.permute.xlu0 %1104 }
  0xce   : > { %v2110_v60 = vpop.permute.xlu1 %1119  ;;  %v2112_v61 = vpop.permute.xlu0 %1114 }
  0xd2   : > { %v2114_v62 = vpop.permute.xlu1 %1129  ;;  %v2116_v63 = vpop.permute.xlu0 %1124 }
  0xd6   : > { %v2120_v2 = vpop.permute.xlu1 %1139  ;;  %v2122_v3 = vpop.permute.xlu0 %1134 }
  0xda   : > { %v1145_v22 = vpop.permute.xlu0 %1144  ;;  %v1150_v29 = vpop.permute.xlu1 %1149 }
 0x14a   : > { %v737_v1 = vpop.f32.mrb[0].mxu0  ;;  %v817_v5 = vpop.f32.mrb[0].mxu1 }
 0x14b   : > { %v899_v6 = vmul.f32 %v2118_v0, %v737_v1  ;;  %v915_v7 = vmul.f32 %v2118_v0, %v817_v5  ;;  %v739_v8 = vpop.f32.mrb[1].mxu0  ;;  %v819_v9 = vpop.f32.mrb[1].mxu1 }
 0x14c   : > { %v934_v10 = vmul.f32 %v2124_v4, %v739_v8  ;;  %v950_v11 = vmul.f32 %v2124_v4, %v819_v9  ;;  %v741_v12 = vpop.f32.mrb[2].mxu0  ;;  %v821_v13 = vpop.f32.mrb[2].mxu1  ;;  %v1000_v9 = vld [vmem:[#allocation2 + $0x10] sm:$0xff] }
 0x14d   : > { %v900_v14 = vmul.f32 %v2118_v0, %v741_v12  ;;  %v916_v15 = vmul.f32 %v2118_v0, %v821_v13  ;;  %v743_v16 = vpop.f32.mrb[3].mxu0  ;;  %v823_v17 = vpop.f32.mrb[3].mxu1 }
 0x14e   : > { %v966_v18 = vadd.f32 %v934_v10, %v899_v6  ;;  %v982_v19 = vadd.f32 %v950_v11, %v915_v7  ;;  %v935_v20 = vmul.f32 %v2124_v4, %v743_v16  ;;  %v951_v21 = vmul.f32 %v2124_v4, %v823_v17  ;;  %v1155_v8 = vpop.permute.xlu0 %1154  ;;  %v1016_v10 = vld [vmem:[#allocation2 + $0x90] sm:$0xff]  ;;  %v1001_v16 = vld [vmem:[#allocation2 + $0x18] sm:$0xff] }
 0x14f   : > { %v1017_v17 = vld [vmem:[#allocation2 + $0x98] sm:$0xff] }
 0x150   : > { %v1222_v25 = vmul.f32 %v1065_v51, %v966_v18  ;;  %v1238_v26 = vmul.f32 %v1145_v22, %v982_v19  ;;  %v967_v27 = vadd.f32 %v935_v20, %v900_v14  ;;  %v983_v28 = vadd.f32 %v951_v21, %v916_v15  ;;  %v1160_v15 = vpop.permute.xlu1 %1159 }
 0x152   : > { %v1254_v32 = vadd.f32 %v1222_v25, %v998_v23  ;;  %v1270_v33 = vadd.f32 %v1238_v26, %v1014_v24  ;;  %v1223_v34 = vmul.f32 %v1070_v53, %v967_v27  ;;  %v1239_v35 = vmul.f32 %v1150_v29, %v983_v28  ;;  %v747_v36 = vpop.f32.mrb[4].mxu0  ;;  %v827_v37 = vpop.f32.mrb[4].mxu1 }
 0x153   : > { %v901_v38 = vmul.f32 %v2118_v0, %v747_v36  ;;  %v917_v39 = vmul.f32 %v2118_v0, %v827_v37  ;;  %v749_v40 = vpop.f32.mrb[5].mxu0  ;;  %v829_v41 = vpop.f32.mrb[5].mxu1 }
 0x154   : > { %1286 = vst [vmem:[#allocation2] sm:$0xff] %v1254_v32  ;;  %1302 = vst [vmem:[#allocation2 + $0x80] sm:$0xff] %v1270_v33  ;;  %v1255_v42 = vadd.f32 %v1223_v34, %v999_v30  ;;  %v1271_v43 = vadd.f32 %v1239_v35, %v1015_v31  ;;  %v936_v44 = vmul.f32 %v2124_v4, %v749_v40  ;;  %v751_v46 = vpop.f32.mrb[6].mxu0  ;;  %v831_v47 = vpop.f32.mrb[6].mxu1 }
 0x155   : > { %v952_v45 = vmul.f32 %v2124_v4, %v829_v41  ;;  %v902_v48 = vmul.f32 %v2118_v0, %v751_v46  ;;  %v918_v49 = vmul.f32 %v2118_v0, %v831_v47  ;;  %v753_v51 = vpop.f32.mrb[7].mxu0  ;;  %v833_v53 = vpop.f32.mrb[7].mxu1  ;;  %v1002_v41 = vld [vmem:[#allocation2 + $0x20] sm:$0xff] }
 0x156   : > { %1287 = vst [vmem:[#allocation2 + $0x8] sm:$0xff] %v1255_v42  ;;  %1303 = vst [vmem:[#allocation2 + $0x88] sm:$0xff] %v1271_v43  ;;  %v968_v1 = vadd.f32 %v936_v44, %v901_v38  ;;  %v937_v6 = vmul.f32 %v2124_v4, %v753_v51  ;;  %v953_v7 = vmul.f32 %v2124_v4, %v833_v53  ;;  %v1165_v40 = vpop.permute.xlu0 %1164  ;;  %v1018_v42 = vld [vmem:[#allocation2 + $0xa0] sm:$0xff]  ;;  %v1170_v47 = vpop.permute.xlu1 %1169 }
 0x157   : > { %v984_v5 = vadd.f32 %v952_v45, %v917_v39 }
 0x158   : > { %v1224_v11 = vmul.f32 %v2093_v50, %v968_v1  ;;  %v969_v13 = vadd.f32 %v937_v6, %v902_v48  ;;  %v985_v14 = vadd.f32 %v953_v7, %v918_v49  ;;  %v1003_v48 = vld [vmem:[#allocation2 + $0x28] sm:$0xff] }
 0x159   : > { %v1240_v12 = vmul.f32 %v1155_v8, %v984_v5  ;;  %v1019_v49 = vld [vmem:[#allocation2 + $0xa8] sm:$0xff] }
 0x15a   : > { %v1256_v18 = vadd.f32 %v1224_v11, %v1000_v9  ;;  %v1225_v20 = vmul.f32 %v2095_v52, %v969_v13  ;;  %v1241_v21 = vmul.f32 %v1160_v15, %v985_v14  ;;  %v757_v22 = vpop.f32.mrb[8].mxu0  ;;  %v837_v23 = vpop.f32.mrb[8].mxu1 }
 0x15b   : > { %v1272_v19 = vadd.f32 %v1240_v12, %v1016_v10  ;;  %v903_v24 = vmul.f32 %v2118_v0, %v757_v22  ;;  %v919_v25 = vmul.f32 %v2118_v0, %v837_v23  ;;  %v759_v26 = vpop.f32.mrb[9].mxu0  ;;  %v839_v27 = vpop.f32.mrb[9].mxu1 }
 0x15c   : > { %1288 = vst [vmem:[#allocation2 + $0x10] sm:$0xff] %v1256_v18  ;;  %v1257_v50 = vadd.f32 %v1225_v20, %v1001_v16  ;;  %v1273_v28 = vadd.f32 %v1241_v21, %v1017_v17  ;;  %v938_v29 = vmul.f32 %v2124_v4, %v759_v26  ;;  %v954_v30 = vmul.f32 %v2124_v4, %v839_v27  ;;  %v761_v31 = vpop.f32.mrb[10].mxu0  ;;  %v841_v32 = vpop.f32.mrb[10].mxu1  ;;  %v1020_v26 = vld [vmem:[#allocation2 + $0xb0] sm:$0xff] }
 0x15d   : > { %1304 = vst [vmem:[#allocation2 + $0x90] sm:$0xff] %v1272_v19  ;;  %v904_v52 = vmul.f32 %v2118_v0, %v761_v31  ;;  %v920_v33 = vmul.f32 %v2118_v0, %v841_v32  ;;  %v763_v34 = vpop.f32.mrb[11].mxu0  ;;  %v843_v35 = vpop.f32.mrb[11].mxu1  ;;  %v1005_v31 = vld [vmem:[#allocation2 + $0x38] sm:$0xff] }
 0x15e   : > { %1289 = vst [vmem:[#allocation2 + $0x18] sm:$0xff] %v1257_v50  ;;  %1305 = vst [vmem:[#allocation2 + $0x98] sm:$0xff] %v1273_v28  ;;  %v970_v36 = vadd.f32 %v938_v29, %v903_v24  ;;  %v986_v37 = vadd.f32 %v954_v30, %v919_v25  ;;  %v939_v38 = vmul.f32 %v2124_v4, %v763_v34  ;;  %v1175_v24 = vpop.permute.xlu0 %1174  ;;  %v1004_v25 = vld [vmem:[#allocation2 + $0x30] sm:$0xff]  ;;  %v1180_v30 = vpop.permute.xlu1 %1179  ;;  %v1021_v32 = vld [vmem:[#allocation2 + $0xb8] sm:$0xff] }
 0x15f   : > { %v955_v39 = vmul.f32 %v2124_v4, %v843_v35 }
 0x160   : > { %v1226_v43 = vmul.f32 %v2099_v55, %v970_v36  ;;  %v1242_v44 = vmul.f32 %v1165_v40, %v986_v37  ;;  %v971_v45 = vadd.f32 %v939_v38, %v904_v52 }
 0x161   : > { %v987_v46 = vadd.f32 %v955_v39, %v920_v33 }
 0x162   : > { %v1258_v51 = vadd.f32 %v1226_v43, %v1002_v41  ;;  %v1274_v53 = vadd.f32 %v1242_v44, %v1018_v42  ;;  %v1227_v1 = vmul.f32 %v2097_v54, %v971_v45  ;;  %v767_v6 = vpop.f32.mrb[12].mxu0  ;;  %v847_v7 = vpop.f32.mrb[12].mxu1 }
 0x163   : > { %v1243_v5 = vmul.f32 %v1170_v47, %v987_v46  ;;  %v905_v8 = vmul.f32 %v2118_v0, %v767_v6  ;;  %v921_v9 = vmul.f32 %v2118_v0, %v847_v7  ;;  %v769_v10 = vpop.f32.mrb[13].mxu0  ;;  %v849_v11 = vpop.f32.mrb[13].mxu1  ;;  %v1006_v7 = vld [vmem:[#allocation2 + $0x40] sm:$0xff] }
 0x164   : > { %1290 = vst [vmem:[#allocation2 + $0x20] sm:$0xff] %v1258_v51  ;;  %1306 = vst [vmem:[#allocation2 + $0xa0] sm:$0xff] %v1274_v53  ;;  %v1259_v55 = vadd.f32 %v1227_v1, %v1003_v48  ;;  %v940_v13 = vmul.f32 %v2124_v4, %v769_v10  ;;  %v956_v14 = vmul.f32 %v2124_v4, %v849_v11  ;;  %v771_v15 = vpop.f32.mrb[14].mxu0  ;;  %v851_v16 = vpop.f32.mrb[14].mxu1 }
 0x165   : > { %v1275_v12 = vadd.f32 %v1243_v5, %v1019_v49  ;;  %v906_v54 = vmul.f32 %v2118_v0, %v771_v15  ;;  %v922_v17 = vmul.f32 %v2118_v0, %v851_v16  ;;  %v773_v18 = vpop.f32.mrb[15].mxu0  ;;  %v853_v19 = vpop.f32.mrb[15].mxu1 }
 0x166   : > { %1291 = vst [vmem:[#allocation2 + $0x28] sm:$0xff] %v1259_v55  ;;  %v972_v20 = vadd.f32 %v940_v13, %v905_v8  ;;  %v988_v21 = vadd.f32 %v956_v14, %v921_v9  ;;  %v941_v22 = vmul.f32 %v2124_v4, %v773_v18  ;;  %v957_v23 = vmul.f32 %v2124_v4, %v853_v19  ;;  %v1185_v6 = vpop.permute.xlu0 %1184  ;;  %v1022_v8 = vld [vmem:[#allocation2 + $0xc0] sm:$0xff]  ;;  %v1007_v13 = vld [vmem:[#allocation2 + $0x48] sm:$0xff] }
 0x167   : > { %1307 = vst [vmem:[#allocation2 + $0xa8] sm:$0xff] %v1275_v12  ;;  %v1190_v12 = vpop.permute.xlu1 %1189  ;;  %v1023_v14 = vld [vmem:[#allocation2 + $0xc8] sm:$0xff] }
 0x168   : > { %v1228_v27 = vmul.f32 %v2103_v57, %v972_v20  ;;  %v1244_v50 = vmul.f32 %v1175_v24, %v988_v21  ;;  %v973_v28 = vadd.f32 %v941_v22, %v906_v54  ;;  %v989_v29 = vadd.f32 %v957_v23, %v922_v17 }
 0x16a   : > { %v1260_v52 = vadd.f32 %v1228_v27, %v1004_v25  ;;  %v1276_v33 = vadd.f32 %v1244_v50, %v1020_v26  ;;  %v1229_v34 = vmul.f32 %v2101_v56, %v973_v28  ;;  %v1245_v35 = vmul.f32 %v1180_v30, %v989_v29  ;;  %v777_v36 = vpop.f32.mrb[16].mxu0  ;;  %v857_v37 = vpop.f32.mrb[16].mxu1 }
 0x16b   : > { %v907_v38 = vmul.f32 %v2118_v0, %v777_v36  ;;  %v923_v39 = vmul.f32 %v2118_v0, %v857_v37  ;;  %v779_v40 = vpop.f32.mrb[17].mxu0  ;;  %v859_v41 = vpop.f32.mrb[17].mxu1  ;;  %v1024_v36 = vld [vmem:[#allocation2 + $0xd0] sm:$0xff] }
 0x16c   : > { %1292 = vst [vmem:[#allocation2 + $0x30] sm:$0xff] %v1260_v52  ;;  %1308 = vst [vmem:[#allocation2 + $0xb0] sm:$0xff] %v1276_v33  ;;  %v1261_v57 = vadd.f32 %v1229_v34, %v1005_v31  ;;  %v1277_v42 = vadd.f32 %v1245_v35, %v1021_v32  ;;  %v942_v43 = vmul.f32 %v2124_v4, %v779_v40  ;;  %v781_v45 = vpop.f32.mrb[18].mxu0  ;;  %v861_v46 = vpop.f32.mrb[18].mxu1  ;;  %v1008_v35 = vld [vmem:[#allocation2 + $0x50] sm:$0xff] }
 0x16d   : > { %v958_v44 = vmul.f32 %v2124_v4, %v859_v41  ;;  %v908_v56 = vmul.f32 %v2118_v0, %v781_v45  ;;  %v924_v47 = vmul.f32 %v2118_v0, %v861_v46  ;;  %v783_v48 = vpop.f32.mrb[19].mxu0  ;;  %v863_v49 = vpop.f32.mrb[19].mxu1 }
 0x16e   : > { %1293 = vst [vmem:[#allocation2 + $0x38] sm:$0xff] %v1261_v57  ;;  %1309 = vst [vmem:[#allocation2 + $0xb8] sm:$0xff] %v1277_v42  ;;  %v974_v51 = vadd.f32 %v942_v43, %v907_v38  ;;  %v943_v1 = vmul.f32 %v2124_v4, %v783_v48  ;;  %v959_v5 = vmul.f32 %v2124_v4, %v863_v49  ;;  %v1195_v34 = vpop.permute.xlu0 %1194  ;;  %v1200_v41 = vpop.permute.xlu1 %1199  ;;  %v1009_v57 = vld [vmem:[#allocation2 + $0x58] sm:$0xff] }
 0x16f   : > { %v990_v53 = vadd.f32 %v958_v44, %v923_v39  ;;  %v1025_v42 = vld [vmem:[#allocation2 + $0xd8] sm:$0xff] }
 0x170   : > { %v1230_v9 = vmul.f32 %v2107_v59, %v974_v51  ;;  %v975_v11 = vadd.f32 %v943_v1, %v908_v56  ;;  %v991_v55 = vadd.f32 %v959_v5, %v924_v47 }
 0x171   : > { %v1246_v10 = vmul.f32 %v1185_v6, %v990_v53 }
 0x172   : > { %v1262_v15 = vadd.f32 %v1230_v9, %v1006_v7  ;;  %v1231_v54 = vmul.f32 %v2105_v58, %v975_v11  ;;  %v1247_v17 = vmul.f32 %v1190_v12, %v991_v55  ;;  %v787_v18 = vpop.f32.mrb[20].mxu0  ;;  %v867_v19 = vpop.f32.mrb[20].mxu1 }
 0x173   : > { %v1278_v16 = vadd.f32 %v1246_v10, %v1022_v8  ;;  %v909_v20 = vmul.f32 %v2118_v0, %v787_v18  ;;  %v925_v21 = vmul.f32 %v2118_v0, %v867_v19  ;;  %v789_v22 = vpop.f32.mrb[21].mxu0  ;;  %v869_v23 = vpop.f32.mrb[21].mxu1 }
 0x174   : > { %1294 = vst [vmem:[#allocation2 + $0x40] sm:$0xff] %v1262_v15  ;;  %v1263_v59 = vadd.f32 %v1231_v54, %v1007_v13  ;;  %v1279_v24 = vadd.f32 %v1247_v17, %v1023_v14  ;;  %v944_v25 = vmul.f32 %v2124_v4, %v789_v22  ;;  %v960_v26 = vmul.f32 %v2124_v4, %v869_v23  ;;  %v791_v27 = vpop.f32.mrb[22].mxu0  ;;  %v871_v50 = vpop.f32.mrb[22].mxu1  ;;  %v1026_v54 = vld [vmem:[#allocation2 + $0xe0] sm:$0xff]  ;;  %v1011_v22 = vld [vmem:[#allocation2 + $0x68] sm:$0xff] }
 0x175   : > { %1310 = vst [vmem:[#allocation2 + $0xc0] sm:$0xff] %v1278_v16  ;;  %v910_v58 = vmul.f32 %v2118_v0, %v791_v27  ;;  %v926_v28 = vmul.f32 %v2118_v0, %v871_v50  ;;  %v793_v29 = vpop.f32.mrb[23].mxu0  ;;  %v873_v30 = vpop.f32.mrb[23].mxu1  ;;  %v1010_v16 = vld [vmem:[#allocation2 + $0x60] sm:$0xff]  ;;  %v1027_v23 = vld [vmem:[#allocation2 + $0xe8] sm:$0xff] }
 0x176   : > { %1295 = vst [vmem:[#allocation2 + $0x48] sm:$0xff] %v1263_v59  ;;  %1311 = vst [vmem:[#allocation2 + $0xc8] sm:$0xff] %v1279_v24  ;;  %v976_v31 = vadd.f32 %v944_v25, %v909_v20  ;;  %v992_v32 = vadd.f32 %v960_v26, %v925_v21  ;;  %v945_v52 = vmul.f32 %v2124_v4, %v793_v29  ;;  %v1205_v15 = vpop.permute.xlu0 %1204  ;;  %v1210_v21 = vpop.permute.xlu1 %1209 }
 0x177   : > { %v961_v33 = vmul.f32 %v2124_v4, %v873_v30 }
 0x178   : > { %v1232_v37 = vmul.f32 %v2112_v61, %v976_v31  ;;  %v1248_v38 = vmul.f32 %v1195_v34, %v992_v32  ;;  %v977_v39 = vadd.f32 %v945_v52, %v910_v58 }
 0x179   : > { %v993_v40 = vadd.f32 %v961_v33, %v926_v28 }
 0x17a   : > { %v1264_v43 = vadd.f32 %v1232_v37, %v1008_v35  ;;  %v1280_v44 = vadd.f32 %v1248_v38, %v1024_v36  ;;  %v1233_v45 = vmul.f32 %v2110_v60, %v977_v39  ;;  %v797_v56 = vpop.f32.mrb[24].mxu0  ;;  %v877_v47 = vpop.f32.mrb[24].mxu1 }
 0x17b   : > { %v1249_v46 = vmul.f32 %v1200_v41, %v993_v40  ;;  %v911_v48 = vmul.f32 %v2118_v0, %v797_v56  ;;  %v927_v49 = vmul.f32 %v2118_v0, %v877_v47  ;;  %v799_v51 = vpop.f32.mrb[25].mxu0  ;;  %v879_v53 = vpop.f32.mrb[25].mxu1 }
 0x17c   : > { %1296 = vst [vmem:[#allocation2 + $0x50] sm:$0xff] %v1264_v43  ;;  %1312 = vst [vmem:[#allocation2 + $0xd0] sm:$0xff] %v1280_v44  ;;  %v1265_v61 = vadd.f32 %v1233_v45, %v1009_v57  ;;  %v946_v5 = vmul.f32 %v2124_v4, %v799_v51  ;;  %v962_v6 = vmul.f32 %v2124_v4, %v879_v53  ;;  %v801_v7 = vpop.f32.mrb[26].mxu0  ;;  %v881_v8 = vpop.f32.mrb[26].mxu1  ;;  %v1028_v43 = vld [vmem:[#allocation2 + $0xf0] sm:$0xff] }
 0x17d   : > { %v1281_v1 = vadd.f32 %v1249_v46, %v1025_v42  ;;  %v912_v60 = vmul.f32 %v2118_v0, %v801_v7  ;;  %v928_v9 = vmul.f32 %v2118_v0, %v881_v8  ;;  %v803_v10 = vpop.f32.mrb[27].mxu0  ;;  %v883_v11 = vpop.f32.mrb[27].mxu1  ;;  %v1012_v42 = vld [vmem:[#allocation2 + $0x70] sm:$0xff]  ;;  %v1326_v7 = vld [vmem:[#allocation2 + $0x20] sm:$0xff] (!%p1548_p3)  ;;  %v1327_v8 = vld [vmem:[#allocation2 + $0x28] sm:$0xff] (!%p1548_p3) }
 0x17e   : > { %1297 = vst [vmem:[#allocation2 + $0x58] sm:$0xff] %v1265_v61  ;;  %v978_v55 = vadd.f32 %v946_v5, %v911_v48  ;;  %v994_v12 = vadd.f32 %v962_v6, %v927_v49  ;;  %v947_v13 = vmul.f32 %v2124_v4, %v803_v10  ;;  %v963_v14 = vmul.f32 %v2124_v4, %v883_v11  ;;  %v1215_v57 = vpop.permute.xlu0 %1214  ;;  %v1220_v47 = vpop.permute.xlu1 %1219  ;;  %v1029_v48 = vld [vmem:[#allocation2 + $0xf8] sm:$0xff]  ;;  %v1323_v5 = vld [vmem:[#allocation2 + $0x8] sm:$0xff] (!%p1548_p3)  ;;  %v1324_v6 = vld [vmem:[#allocation2 + $0x10] sm:$0xff] (!%p1548_p3) }
 0x17f   : > { %1313 = vst [vmem:[#allocation2 + $0xd8] sm:$0xff] %v1281_v1  ;;  %1355 = vst [vmem:[%s2316_s6 + $0x8] sm:$0xff] (!%p1548_p3), %v1323_v5  ;;  %v1330_v10 = vld [vmem:[#allocation2 + $0x40] sm:$0xff] (!%p1548_p3)  ;;  %v1331_v11 = vld [vmem:[#allocation2 + $0x48] sm:$0xff] (!%p1548_p3) }
 0x180   : > { %v1234_v17 = vmul.f32 %v2116_v63, %v978_v55  ;;  %v1250_v18 = vmul.f32 %v1205_v15, %v994_v12  ;;  %v979_v19 = vadd.f32 %v947_v13, %v912_v60  ;;  %v995_v20 = vadd.f32 %v963_v14, %v928_v9  ;;  %1356 = vst [vmem:[%s2316_s6 + $0x10] sm:$0xff] (!%p1548_p3), %v1324_v6  ;;  %v1328_v60 = vld [vmem:[#allocation2 + $0x30] sm:$0xff] (!%p1548_p3)  ;;  %v1329_v9 = vld [vmem:[#allocation2 + $0x38] sm:$0xff] (!%p1548_p3) }
 0x181   : > { %1358 = vst [vmem:[%s2316_s6 + $0x20] sm:$0xff] (!%p1548_p3), %v1326_v7  ;;  %1359 = vst [vmem:[%s2316_s6 + $0x28] sm:$0xff] (!%p1548_p3), %v1327_v8 }
 0x182   : > { %v1266_v59 = vadd.f32 %v1234_v17, %v1010_v16  ;;  %v1282_v24 = vadd.f32 %v1250_v18, %v1026_v54  ;;  %v1235_v25 = vmul.f32 %v2114_v62, %v979_v19  ;;  %v1251_v26 = vmul.f32 %v1210_v21, %v995_v20  ;;  %v807_v27 = vpop.f32.mrb[28].mxu0  ;;  %v887_v50 = vpop.f32.mrb[28].mxu1  ;;  %1360 = vst [vmem:[%s2316_s6 + $0x30] sm:$0xff] (!%p1548_p3), %v1328_v60  ;;  %v1338_v54 = vld [vmem:[#allocation2 + $0x80] sm:$0xff] (!%p1548_p3)  ;;  %v1339_v17 = vld [vmem:[#allocation2 + $0x88] sm:$0xff] (!%p1548_p3)  ;;  %v1340_v18 = vld [vmem:[#allocation2 + $0x90] sm:$0xff] (!%p1548_p3) }
 0x183   : > { %v913_v58 = vmul.f32 %v2118_v0, %v807_v27  ;;  %v929_v28 = vmul.f32 %v2118_v0, %v887_v50  ;;  %v809_v29 = vpop.f32.mrb[29].mxu0  ;;  %v889_v30 = vpop.f32.mrb[29].mxu1  ;;  %1361 = vst [vmem:[%s2316_s6 + $0x38] sm:$0xff] (!%p1548_p3), %v1329_v9  ;;  %1362 = vst [vmem:[%s2316_s6 + $0x40] sm:$0xff] (!%p1548_p3), %v1330_v10  ;;  %v1332_v55 = vld [vmem:[#allocation2 + $0x50] sm:$0xff] (!%p1548_p3)  ;;  %v1341_v19 = vld [vmem:[#allocation2 + $0x98] sm:$0xff] (!%p1548_p3) }
 0x184   : > { %1298 = vst [vmem:[#allocation2 + $0x60] sm:$0xff] %v1266_v59  ;;  %1314 = vst [vmem:[#allocation2 + $0xe0] sm:$0xff] %v1282_v24  ;;  %v1267_v63 = vadd.f32 %v1235_v25, %v1011_v22  ;;  %v1283_v31 = vadd.f32 %v1251_v26, %v1027_v23  ;;  %v948_v32 = vmul.f32 %v2124_v4, %v809_v29  ;;  %v811_v33 = vpop.f32.mrb[30].mxu0  ;;  %v891_v34 = vpop.f32.mrb[30].mxu1  ;;  %v1342_v20 = vld [vmem:[#allocation2 + $0xa0] sm:$0xff] (!%p1548_p3)  ;;  %v1343_v21 = vld [vmem:[#allocation2 + $0xa8] sm:$0xff] (!%p1548_p3) }
 0x185   : > { %v964_v52 = vmul.f32 %v2124_v4, %v889_v30  ;;  %v914_v62 = vmul.f32 %v2118_v0, %v811_v33  ;;  %v930_v35 = vmul.f32 %v2118_v0, %v891_v34  ;;  %v813_v36 = vpop.f32.mrb[31].mxu0  ;;  %v893_v37 = vpop.f32.mrb[31].mxu1  ;;  %v1013_v0 = vld [vmem:[#allocation2 + $0x78] sm:$0xff]  ;;  %1363 = vst [vmem:[%s2316_s6 + $0x48] sm:$0xff] (!%p1548_p3), %v1331_v11  ;;  %1364 = vst [vmem:[%s2316_s6 + $0x50] sm:$0xff] (!%p1548_p3), %v1332_v55  ;;  %v1344_v22 = vld [vmem:[#allocation2 + $0xb0] sm:$0xff] (!%p1548_p3) }
 0x186   : > { %1299 = vst [vmem:[#allocation2 + $0x68] sm:$0xff] %v1267_v63  ;;  %1315 = vst [vmem:[#allocation2 + $0xe8] sm:$0xff] %v1283_v31  ;;  %v980_v38 = vadd.f32 %v948_v32, %v913_v58  ;;  %v949_v40 = vmul.f32 %v2124_v4, %v813_v36  ;;  %v965_v41 = vmul.f32 %v2124_v4, %v893_v37  ;;  %v1333_v12 = vld [vmem:[#allocation2 + $0x58] sm:$0xff] (!%p1548_p3)  ;;  %v1346_v59 = vld [vmem:[#allocation2 + $0xc0] sm:$0xff] (!%p1548_p3) }
 0x187   : > { %v996_v39 = vadd.f32 %v964_v52, %v929_v28  ;;  %1365 = vst [vmem:[%s2316_s6 + $0x58] sm:$0xff] (!%p1548_p3), %v1333_v12  ;;  %1370 = vst [vmem:[%s2316_s6 + $0x80] sm:$0xff] (!%p1548_p3), %v1338_v54  ;;  %v1345_v23 = vld [vmem:[#allocation2 + $0xb8] sm:$0xff] (!%p1548_p3)  ;;  %v1347_v24 = vld [vmem:[#allocation2 + $0xc8] sm:$0xff] (!%p1548_p3) }
 0x188   : > { %v1236_v44 = vmul.f32 %v2122_v3, %v980_v38  ;;  %v981_v46 = vadd.f32 %v949_v40, %v914_v62  ;;  %v997_v56 = vadd.f32 %v965_v41, %v930_v35  ;;  %1321 = sbr.rel (%p1548_p3) target bundleno = 408 (0x198), region = 56  ;;  %v1322_v3 = vld [vmem:[#allocation2] sm:$0xff] (!%p1548_p3)  ;;  %1371 = vst [vmem:[%s2316_s6 + $0x88] sm:$0xff] (!%p1548_p3), %v1339_v17  ;;  %1372 = vst [vmem:[%s2316_s6 + $0x90] sm:$0xff] (!%p1548_p3), %v1340_v18  ;;  %v1348_v25 = vld [vmem:[#allocation2 + $0xd0] sm:$0xff] (!%p1548_p3) }
 0x189   : > { %v1252_v45 = vmul.f32 %v1215_v57, %v996_v39  ;;  %1354 = vst [vmem:[%s2316_s6] sm:$0xff] (!%p1548_p3), %v1322_v3  ;;  %1373 = vst [vmem:[%s2316_s6 + $0x98] sm:$0xff] (!%p1548_p3), %v1341_v19  ;;  %v1349_v26 = vld [vmem:[#allocation2 + $0xd8] sm:$0xff] (!%p1548_p3) }
 0x18a   : > { %v1268_v49 = vadd.f32 %v1236_v44, %v1012_v42  ;;  %v1237_v53 = vmul.f32 %v2120_v2, %v981_v46  ;;  %v1253_v61 = vmul.f32 %v1220_v47, %v997_v56  ;;  %v1325_v2 = vld [vmem:[#allocation2 + $0x18] sm:$0xff] (!%p1548_p3)  ;;  %1374 = vst [vmem:[%s2316_s6 + $0xa0] sm:$0xff] (!%p1548_p3), %v1342_v20  ;;  %1375 = vst [vmem:[%s2316_s6 + $0xa8] sm:$0xff] (!%p1548_p3), %v1343_v21 }
 0x18b   : > { %v1284_v51 = vadd.f32 %v1252_v45, %v1028_v43  ;;  %1357 = vst [vmem:[%s2316_s6 + $0x18] sm:$0xff] (!%p1548_p3), %v1325_v2  ;;  %v1334_v13 = vld [vmem:[#allocation2 + $0x60] sm:$0xff] (!%p1548_p3)  ;;  %1376 = vst [vmem:[%s2316_s6 + $0xb0] sm:$0xff] (!%p1548_p3), %v1344_v22 }
 0x18c   : > { %1300 = vst [vmem:[#allocation2 + $0x70] sm:$0xff] %v1268_v49  ;;  %v1269_v1 = vadd.f32 %v1237_v53, %v1013_v0  ;;  %v1285_v4 = vadd.f32 %v1253_v61, %v1029_v48  ;;  %1366 = vst [vmem:[%s2316_s6 + $0x60] sm:$0xff] (!%p1548_p3), %v1334_v13  ;;  %v1350_v27 = vld [vmem:[#allocation2 + $0xe0] sm:$0xff] (!%p1548_p3) }
 0x18d   : > { %1316 = vst [vmem:[#allocation2 + $0xf0] sm:$0xff] %v1284_v51  ;;  %v1335_v14 = vld [vmem:[#allocation2 + $0x68] sm:$0xff] (!%p1548_p3)  ;;  %1377 = vst [vmem:[%s2316_s6 + $0xb8] sm:$0xff] (!%p1548_p3), %v1345_v23 }
 0x18e   : > { %1301 = vst [vmem:[#allocation2 + $0x78] sm:$0xff] %v1269_v1  ;;  %1317 = vst [vmem:[#allocation2 + $0xf8] sm:$0xff] %v1285_v4  ;;  %v1351_v50 = vld [vmem:[#allocation2 + $0xe8] sm:$0xff] (!%p1548_p3) }
 0x18f   : > { %1367 = vst [vmem:[%s2316_s6 + $0x68] sm:$0xff] %v1335_v14  ;;  %1378 = vst [vmem:[%s2316_s6 + $0xc0] sm:$0xff] %v1346_v59 }
 0x190   : > { %1379 = vst [vmem:[%s2316_s6 + $0xc8] sm:$0xff] %v1347_v24  ;;  %1380 = vst [vmem:[%s2316_s6 + $0xd0] sm:$0xff] %v1348_v25 }
 0x191   : > { %1381 = vst [vmem:[%s2316_s6 + $0xd8] sm:$0xff] %v1349_v26  ;;  %1382 = vst [vmem:[%s2316_s6 + $0xe0] sm:$0xff] %v1350_v27 }
 0x192   : > { %1383 = vst [vmem:[%s2316_s6 + $0xe8] sm:$0xff] %v1351_v50 }
 0x193   : > { %v1336_v15 = vld [vmem:[#allocation2 + $0x70] sm:$0xff] }
 0x194   : > { %1368 = vst [vmem:[%s2316_s6 + $0x70] sm:$0xff] %v1336_v15  ;;  %v1352_v58 = vld [vmem:[#allocation2 + $0xf0] sm:$0xff] }
 0x195   : > { %v1337_v16 = vld [vmem:[#allocation2 + $0x78] sm:$0xff]  ;;  %1384 = vst [vmem:[%s2316_s6 + $0xf0] sm:$0xff] %v1352_v58 }
 0x196   : > { %1369 = vst [vmem:[%s2316_s6 + $0x78] sm:$0xff] %v1337_v16  ;;  %v1353_v28 = vld [vmem:[#allocation2 + $0xf8] sm:$0xff] }
 0x197   : > { %1385 = vst [vmem:[%s2316_s6 + $0xf8] sm:$0xff] %v1353_v28 }
 0x198 PF: > { %s17_s23 = sadd.s32 1, %s1714_s23   ;;  %s2319_s21 = smov %s1710_s22 }
 0x199   : > { %p14_p4 = scmp.ge.s32.totalorder %s17_s23, 5   ;;  %s2320_s22 = smov %s2322_s25 }
 0x19b   :  { %16 = sbr.rel (!%p14_p4) target bundleno = 2 (0x2), region = 93 }
 0x1a2   :  { %1408 = vsyncpa [#allocation4], 1 }
 0x1a3   :  { %1410 = vsyncpa [#allocation4 + $0x1], 1 }

</bundles_post_ra>
